<compile_context>
chip_gen: v6e
topology: v6e:2x2x1
jax: 0.10.0
libtpu: 0.0.40
codegen_flags: <defaults>
</compile_context>

<pallas_src>
import jax
import jax.numpy as jnp
from jax import lax
from jax.experimental import pallas as pl
from jax.experimental.pallas import tpu as pltpu

LANE = 128      # lane padding for nhidden / obs_dim / out_dim
B_TILE = 8      # sublane-aligned batch tile


def odernn_kernel(t_ref,                      # SMEM (nsteps,) f32 time grid
                  x_ref, h0_ref,              # VMEM (B_TILE, LANE) each
                  w1_ref, b1_ref,             # ODE func layer 1 (padded)
                  w2_ref, b2_ref,             # ODE func layer 2 (padded)
                  wix_ref, wih_ref, bi_ref,   # i2h split (padded)
                  wo_ref, bo_ref,             # h2o (padded)
                  out_ref, hout_ref):
    w1 = w1_ref[...]
    b1 = b1_ref[...]
    w2 = w2_ref[...]
    b2 = b2_ref[...]

    def func(h):
        # dh/dt = tanh(h @ W1 + b1) @ W2 + b2   (autonomous; ignores t)
        z = jnp.tanh(jnp.dot(h, w1, preferred_element_type=jnp.float32) + b1)
        return jnp.dot(z, w2, preferred_element_type=jnp.float32) + b2

    # x-side of i2h is independent of h: issue it before the RK4 chain so its
    # MXU latency hides under the first integration step.
    xi = (jnp.dot(x_ref[...], wix_ref[...], preferred_element_type=jnp.float32)
          + bi_ref[...])

    h = h0_ref[...]
    nsteps = t_ref.shape[0]
    # Fully unrolled fixed-step RK4 (nsteps is static and small).
    for i in range(nsteps - 1):
        dt = t_ref[i + 1] - t_ref[i]
        k1 = func(h)
        k2 = func(h + 0.5 * dt * k1)
        k3 = func(h + 0.5 * dt * k2)
        k4 = func(h + dt * k3)
        h = h + (dt / 6.0) * (k1 + 2.0 * k2 + 2.0 * k3 + k4)

    # combined = cat((x, h));  i2h(combined) == x @ Wi_x + h @ Wi_h + bi
    h_new = jnp.tanh(xi + jnp.dot(h, wih_ref[...],
                                  preferred_element_type=jnp.float32))
    out = (jnp.dot(h_new, wo_ref[...], preferred_element_type=jnp.float32)
           + bo_ref[...])

    out_ref[...] = out          # lane-dense (B_TILE, 128) stores
    hout_ref[...] = h_new


def prepare_params(params, obs_dim, nhidden, out_dim):
    """One-time weight prep: transpose, split i2h, zero-pad to (128, 128) /
    (1, 128).  Hoisted out of the per-call path."""

    def pad_mat(w):
        w = jnp.asarray(w, jnp.float32)
        return jnp.zeros((LANE, LANE), jnp.float32).at[:w.shape[0], :w.shape[1]].set(w)

    def pad_bias(b):
        b = jnp.asarray(b, jnp.float32)
        return jnp.zeros((1, LANE), jnp.float32).at[0, :b.shape[0]].set(b)

    wi = params["i2h_w"]                       # (nhidden, obs_dim + nhidden)
    return {
        "w1": pad_mat(params["func_w1"].T),
        "b1": pad_bias(params["func_b1"]),
        "w2": pad_mat(params["func_w2"].T),
        "b2": pad_bias(params["func_b2"]),
        "wix": pad_mat(wi[:, :obs_dim].T),     # (obs_dim, nhidden) padded
        "wih": pad_mat(wi[:, obs_dim:].T),     # (nhidden, nhidden) padded
        "bi": pad_bias(params["i2h_b"]),
        "wo": pad_mat(params["h2o_w"].T),      # (nhidden, out_dim) padded
        "bo": pad_bias(params["h2o_b"]),
        "obs_dim": obs_dim,
        "nhidden": nhidden,
        "out_dim": out_dim,
    }


def odernn_forward(x, h, t, prep):
    """x: (obs_dim,) or (B, obs_dim); h: same batching, (nhidden,); t: (nsteps,).

    Returns (out, h_new) matching the batching of the inputs."""
    obs_dim, nhidden, out_dim = prep["obs_dim"], prep["nhidden"], prep["out_dim"]

    squeeze = (x.ndim == 1)
    if squeeze:
        x = x[None, :]
        h = h[None, :]
    B = x.shape[0]
    n_tiles = pl.cdiv(B, B_TILE)
    B_pad = n_tiles * B_TILE

    xp = jnp.zeros((B_pad, LANE), jnp.float32).at[:B, :obs_dim].set(
        x.astype(jnp.float32))
    hp = jnp.zeros((B_pad, LANE), jnp.float32).at[:B, :nhidden].set(
        h.astype(jnp.float32))
    t = t.astype(jnp.float32)

    smem = pl.BlockSpec(memory_space=pltpu.MemorySpace.SMEM)
    batch_spec = pl.BlockSpec((B_TILE, LANE), lambda i: (i, 0))
    weight_spec = pl.BlockSpec((LANE, LANE), lambda i: (0, 0))
    bias_spec = pl.BlockSpec((1, LANE), lambda i: (0, 0))

    out_p, hout_p = pl.pallas_call(
        odernn_kernel,
        out_shape=(jax.ShapeDtypeStruct((B_pad, LANE), jnp.float32),
                   jax.ShapeDtypeStruct((B_pad, LANE), jnp.float32)),
        grid=(n_tiles,),
        in_specs=[
            smem,                              # t
            batch_spec, batch_spec,            # x, h0
            weight_spec, bias_spec,            # w1, b1
            weight_spec, bias_spec,            # w2, b2
            weight_spec, weight_spec, bias_spec,   # wix, wih, bi
            weight_spec, bias_spec,            # wo, bo
        ],
        out_specs=(batch_spec, batch_spec),
        compiler_params=pltpu.CompilerParams(
            dimension_semantics=("parallel",)),
    )(t, xp, hp,
      prep["w1"], prep["b1"], prep["w2"], prep["b2"],
      prep["wix"], prep["wih"], prep["bi"], prep["wo"], prep["bo"])

    out = out_p[:B, :out_dim]
    h_new = hout_p[:B, :nhidden]
    if squeeze:
        out = out[0]
        h_new = h_new[0]
    return out, h_new


def odernn_reference(x, h, t, params):
    """Pure-JAX reference (same fixed-step RK4) for validation."""
    hp = lax.Precision.HIGHEST
    w1, b1 = params["func_w1"], params["func_b1"]
    w2, b2 = params["func_w2"], params["func_b2"]

    def func(hh):
        return jnp.dot(jnp.tanh(jnp.dot(hh, w1.T, precision=hp) + b1),
                       w2.T, precision=hp) + b2

    for i in range(t.shape[0] - 1):
        dt = t[i + 1] - t[i]
        k1 = func(h)
        k2 = func(h + 0.5 * dt * k1)
        k3 = func(h + 0.5 * dt * k2)
        k4 = func(h + dt * k3)
        h = h + (dt / 6.0) * (k1 + 2.0 * k2 + 2.0 * k3 + k4)

    combined = jnp.concatenate([x, h], axis=-1)
    h_new = jnp.tanh(jnp.dot(combined, params["i2h_w"].T, precision=hp)
                     + params["i2h_b"])
    out = jnp.dot(h_new, params["h2o_w"].T, precision=hp) + params["h2o_b"]
    return out, h_new


def init_params(key, obs_dim, nhidden, out_dim):
    ks = jax.random.split(key, 8)
    s = 0.1
    return {
        # ODE dynamics func: 2-layer tanh MLP (nhidden -> nhidden)
        "func_w1": s * jax.random.normal(ks[0], (nhidden, nhidden), jnp.float32),
        "func_b1": s * jax.random.normal(ks[1], (nhidden,), jnp.float32),
        "func_w2": s * jax.random.normal(ks[2], (nhidden, nhidden), jnp.float32),
        "func_b2": s * jax.random.normal(ks[3], (nhidden,), jnp.float32),
        # i2h: Linear(obs_dim + nhidden -> nhidden)
        "i2h_w": s * jax.random.normal(ks[4], (nhidden, obs_dim + nhidden), jnp.float32),
        "i2h_b": s * jax.random.normal(ks[5], (nhidden,), jnp.float32),
        # h2o: Linear(nhidden -> out_dim)
        "h2o_w": s * jax.random.normal(ks[6], (out_dim, nhidden), jnp.float32),
        "h2o_b": s * jax.random.normal(ks[7], (out_dim,), jnp.float32),
    }


if __name__ == "__main__":
    obs_dim, nhidden, out_dim, nsteps, batch = 16, 32, 8, 8, 16

    key = jax.random.PRNGKey(0)
    kp, kx = jax.random.split(key, 2)
    params = init_params(kp, obs_dim, nhidden, out_dim)
    prep = prepare_params(params, obs_dim, nhidden, out_dim)   # one-time prep

    x = jax.random.normal(kx, (batch, obs_dim), jnp.float32)
    h0 = jnp.zeros((batch, nhidden), jnp.float32)              # ODERNN.initHidden()
    t = jnp.linspace(0.0, 1.0, nsteps, dtype=jnp.float32)

    # Batched path (grid over batch tiles).
    out, h_new = odernn_forward(x, h0, t, prep)
    jax.block_until_ready((out, h_new))
    assert out.shape == (batch, out_dim) and h_new.shape == (batch, nhidden)
    assert jnp.all(jnp.isfinite(out)) and jnp.all(jnp.isfinite(h_new))

    # Validate against a pure-JAX reference of the same fixed-step RK4.
    out_ref, h_ref = odernn_reference(x, h0, t, params)
    assert jnp.allclose(out, out_ref, atol=1e-2, rtol=1e-2)
    assert jnp.allclose(h_new, h_ref, atol=1e-2, rtol=1e-2)

    # Original single-sample semantics (1-D x, h) still supported.
    out1, h1 = odernn_forward(x[0], h0[0], t, prep)
    jax.block_until_ready((out1, h1))
    assert out1.shape == (out_dim,) and h1.shape == (nhidden,)
    assert jnp.allclose(out1, out[0], atol=1e-2, rtol=1e-2)

    print("KERNEL_OK")
</pallas_src>

<mosaic_0001>
module attributes {stable_mosaic.version = 11 : i64} {
  func.func @odernn_kernel(%arg0: i32, %arg1: memref<8xf32, #tpu.memory_space<smem>>, %arg2: memref<8x128xf32, #tpu.memory_space<vmem>>, %arg3: memref<8x128xf32, #tpu.memory_space<vmem>>, %arg4: memref<128x128xf32, #tpu.memory_space<vmem>>, %arg5: memref<1x128xf32, #tpu.memory_space<vmem>>, %arg6: memref<128x128xf32, #tpu.memory_space<vmem>>, %arg7: memref<1x128xf32, #tpu.memory_space<vmem>>, %arg8: memref<128x128xf32, #tpu.memory_space<vmem>>, %arg9: memref<128x128xf32, #tpu.memory_space<vmem>>, %arg10: memref<1x128xf32, #tpu.memory_space<vmem>>, %arg11: memref<128x128xf32, #tpu.memory_space<vmem>>, %arg12: memref<1x128xf32, #tpu.memory_space<vmem>>, %arg13: memref<8x128xf32, #tpu.memory_space<vmem>>, %arg14: memref<8x128xf32, #tpu.memory_space<vmem>>) attributes {dimension_semantics = [#tpu.dimension_semantics<parallel>], iteration_bounds = array<i64: 2>, scalar_prefetch = 0 : i64, scratch_operands = 0 : i64, tpu.core_type = #tpu.core_type<tc>, window_params = [{transform_indices = @transform_0, window_bounds = array<i64: 8>}, {transform_indices = @transform_1, window_bounds = array<i64: 8, 128>}, {transform_indices = @transform_2, window_bounds = array<i64: 8, 128>}, {pipeline_mode = #tpu.pipeline_mode<synchronous>, transform_indices = @transform_3, window_bounds = array<i64: 128, 128>}, {pipeline_mode = #tpu.pipeline_mode<synchronous>, transform_indices = @transform_4, window_bounds = array<i64: 1, 128>}, {pipeline_mode = #tpu.pipeline_mode<synchronous>, transform_indices = @transform_5, window_bounds = array<i64: 128, 128>}, {pipeline_mode = #tpu.pipeline_mode<synchronous>, transform_indices = @transform_6, window_bounds = array<i64: 1, 128>}, {pipeline_mode = #tpu.pipeline_mode<synchronous>, transform_indices = @transform_7, window_bounds = array<i64: 128, 128>}, {pipeline_mode = #tpu.pipeline_mode<synchronous>, transform_indices = @transform_8, window_bounds = array<i64: 128, 128>}, {pipeline_mode = #tpu.pipeline_mode<synchronous>, transform_indices = @transform_9, window_bounds = array<i64: 1, 128>}, {pipeline_mode = #tpu.pipeline_mode<synchronous>, transform_indices = @transform_10, window_bounds = array<i64: 128, 128>}, {pipeline_mode = #tpu.pipeline_mode<synchronous>, transform_indices = @transform_11, window_bounds = array<i64: 1, 128>}, {transform_indices = @transform_12, window_bounds = array<i64: 8, 128>}, {transform_indices = @transform_13, window_bounds = array<i64: 8, 128>}]} {
    %c0 = arith.constant 0 : index
    %c0_0 = arith.constant 0 : index
    %0 = vector.load %arg4[%c0, %c0_0] : memref<128x128xf32, #tpu.memory_space<vmem>>, vector<128x128xf32>
    %c0_1 = arith.constant 0 : index
    %c0_2 = arith.constant 0 : index
    %1 = vector.load %arg5[%c0_1, %c0_2] : memref<1x128xf32, #tpu.memory_space<vmem>>, vector<1x128xf32>
    %c0_3 = arith.constant 0 : index
    %c0_4 = arith.constant 0 : index
    %2 = vector.load %arg6[%c0_3, %c0_4] : memref<128x128xf32, #tpu.memory_space<vmem>>, vector<128x128xf32>
    %c0_5 = arith.constant 0 : index
    %c0_6 = arith.constant 0 : index
    %3 = vector.load %arg7[%c0_5, %c0_6] : memref<1x128xf32, #tpu.memory_space<vmem>>, vector<1x128xf32>
    %c0_7 = arith.constant 0 : index
    %c0_8 = arith.constant 0 : index
    %4 = vector.load %arg2[%c0_7, %c0_8] : memref<8x128xf32, #tpu.memory_space<vmem>>, vector<8x128xf32>
    %c0_9 = arith.constant 0 : index
    %c0_10 = arith.constant 0 : index
    %5 = vector.load %arg8[%c0_9, %c0_10] : memref<128x128xf32, #tpu.memory_space<vmem>>, vector<128x128xf32>
    %cst = arith.constant dense<0.000000e+00> : vector<8x128xf32>
    %6 = tpu.matmul %4, %5, %cst {dimension_numbers = #tpu.dot_dimension_numbers<[1], [0], [0], [1], [0, 0, 1, 1], [], []>} : vector<8x128xf32>, vector<128x128xf32>, vector<8x128xf32> -> vector<8x128xf32>
    %c0_11 = arith.constant 0 : index
    %c0_12 = arith.constant 0 : index
    %7 = vector.load %arg10[%c0_11, %c0_12] : memref<1x128xf32, #tpu.memory_space<vmem>>, vector<1x128xf32>
    %8 = vector.broadcast %7 : vector<1x128xf32> to vector<8x128xf32>
    %9 = arith.addf %6, %8 : vector<8x128xf32>
    %c0_13 = arith.constant 0 : index
    %c0_14 = arith.constant 0 : index
    %10 = vector.load %arg3[%c0_13, %c0_14] : memref<8x128xf32, #tpu.memory_space<vmem>>, vector<8x128xf32>
    %c1 = arith.constant 1 : index
    %11 = memref.load %arg1[%c1] : memref<8xf32, #tpu.memory_space<smem>>
    %c0_15 = arith.constant 0 : index
    %12 = memref.load %arg1[%c0_15] : memref<8xf32, #tpu.memory_space<smem>>
    %13 = arith.subf %11, %12 : f32
    %cst_16 = arith.constant dense<0.000000e+00> : vector<8x128xf32>
    %14 = tpu.matmul %10, %0, %cst_16 {dimension_numbers = #tpu.dot_dimension_numbers<[1], [0], [0], [1], [0, 0, 1, 1], [], []>} : vector<8x128xf32>, vector<128x128xf32>, vector<8x128xf32> -> vector<8x128xf32>
    %15 = vector.broadcast %1 : vector<1x128xf32> to vector<8x128xf32>
    %16 = arith.addf %14, %15 : vector<8x128xf32>
    %17 = math.tanh %16 : vector<8x128xf32>
    %cst_17 = arith.constant dense<0.000000e+00> : vector<8x128xf32>
    %18 = tpu.matmul %17, %2, %cst_17 {dimension_numbers = #tpu.dot_dimension_numbers<[1], [0], [0], [1], [0, 0, 1, 1], [], []>} : vector<8x128xf32>, vector<128x128xf32>, vector<8x128xf32> -> vector<8x128xf32>
    %19 = vector.broadcast %3 : vector<1x128xf32> to vector<8x128xf32>
    %20 = arith.addf %18, %19 : vector<8x128xf32>
    %cst_18 = arith.constant 5.000000e-01 : f32
    %21 = arith.mulf %cst_18, %13 : f32
    %22 = vector.broadcast %21 : f32 to vector<8x128xf32>
    %23 = arith.mulf %22, %20 : vector<8x128xf32>
    %24 = arith.addf %10, %23 : vector<8x128xf32>
    %cst_19 = arith.constant dense<0.000000e+00> : vector<8x128xf32>
    %25 = tpu.matmul %24, %0, %cst_19 {dimension_numbers = #tpu.dot_dimension_numbers<[1], [0], [0], [1], [0, 0, 1, 1], [], []>} : vector<8x128xf32>, vector<128x128xf32>, vector<8x128xf32> -> vector<8x128xf32>
    %26 = vector.broadcast %1 : vector<1x128xf32> to vector<8x128xf32>
    %27 = arith.addf %25, %26 : vector<8x128xf32>
    %28 = math.tanh %27 : vector<8x128xf32>
    %cst_20 = arith.constant dense<0.000000e+00> : vector<8x128xf32>
    %29 = tpu.matmul %28, %2, %cst_20 {dimension_numbers = #tpu.dot_dimension_numbers<[1], [0], [0], [1], [0, 0, 1, 1], [], []>} : vector<8x128xf32>, vector<128x128xf32>, vector<8x128xf32> -> vector<8x128xf32>
    %30 = vector.broadcast %3 : vector<1x128xf32> to vector<8x128xf32>
    %31 = arith.addf %29, %30 : vector<8x128xf32>
    %cst_21 = arith.constant 5.000000e-01 : f32
    %32 = arith.mulf %cst_21, %13 : f32
    %33 = vector.broadcast %32 : f32 to vector<8x128xf32>
    %34 = arith.mulf %33, %31 : vector<8x128xf32>
    %35 = arith.addf %10, %34 : vector<8x128xf32>
    %cst_22 = arith.constant dense<0.000000e+00> : vector<8x128xf32>
    %36 = tpu.matmul %35, %0, %cst_22 {dimension_numbers = #tpu.dot_dimension_numbers<[1], [0], [0], [1], [0, 0, 1, 1], [], []>} : vector<8x128xf32>, vector<128x128xf32>, vector<8x128xf32> -> vector<8x128xf32>
    %37 = vector.broadcast %1 : vector<1x128xf32> to vector<8x128xf32>
    %38 = arith.addf %36, %37 : vector<8x128xf32>
    %39 = math.tanh %38 : vector<8x128xf32>
    %cst_23 = arith.constant dense<0.000000e+00> : vector<8x128xf32>
    %40 = tpu.matmul %39, %2, %cst_23 {dimension_numbers = #tpu.dot_dimension_numbers<[1], [0], [0], [1], [0, 0, 1, 1], [], []>} : vector<8x128xf32>, vector<128x128xf32>, vector<8x128xf32> -> vector<8x128xf32>
    %41 = vector.broadcast %3 : vector<1x128xf32> to vector<8x128xf32>
    %42 = arith.addf %40, %41 : vector<8x128xf32>
    %43 = vector.broadcast %13 : f32 to vector<8x128xf32>
    %44 = arith.mulf %43, %42 : vector<8x128xf32>
    %45 = arith.addf %10, %44 : vector<8x128xf32>
    %cst_24 = arith.constant dense<0.000000e+00> : vector<8x128xf32>
    %46 = tpu.matmul %45, %0, %cst_24 {dimension_numbers = #tpu.dot_dimension_numbers<[1], [0], [0], [1], [0, 0, 1, 1], [], []>} : vector<8x128xf32>, vector<128x128xf32>, vector<8x128xf32> -> vector<8x128xf32>
    %47 = vector.broadcast %1 : vector<1x128xf32> to vector<8x128xf32>
    %48 = arith.addf %46, %47 : vector<8x128xf32>
    %49 = math.tanh %48 : vector<8x128xf32>
    %cst_25 = arith.constant dense<0.000000e+00> : vector<8x128xf32>
    %50 = tpu.matmul %49, %2, %cst_25 {dimension_numbers = #tpu.dot_dimension_numbers<[1], [0], [0], [1], [0, 0, 1, 1], [], []>} : vector<8x128xf32>, vector<128x128xf32>, vector<8x128xf32> -> vector<8x128xf32>
    %51 = vector.broadcast %3 : vector<1x128xf32> to vector<8x128xf32>
    %52 = arith.addf %50, %51 : vector<8x128xf32>
    %cst_26 = arith.constant 6.000000e+00 : f32
    %53 = arith.divf %13, %cst_26 : f32
    %cst_27 = arith.constant 2.000000e+00 : f32
    %54 = vector.broadcast %cst_27 : f32 to vector<8x128xf32>
    %55 = arith.mulf %54, %31 : vector<8x128xf32>
    %56 = arith.addf %20, %55 : vector<8x128xf32>
    %cst_28 = arith.constant 2.000000e+00 : f32
    %57 = vector.broadcast %cst_28 : f32 to vector<8x128xf32>
    %58 = arith.mulf %57, %42 : vector<8x128xf32>
    %59 = arith.addf %56, %58 : vector<8x128xf32>
    %60 = arith.addf %59, %52 : vector<8x128xf32>
    %61 = vector.broadcast %53 : f32 to vector<8x128xf32>
    %62 = arith.mulf %61, %60 : vector<8x128xf32>
    %63 = arith.addf %10, %62 : vector<8x128xf32>
    %c2 = arith.constant 2 : index
    %64 = memref.load %arg1[%c2] : memref<8xf32, #tpu.memory_space<smem>>
    %c1_29 = arith.constant 1 : index
    %65 = memref.load %arg1[%c1_29] : memref<8xf32, #tpu.memory_space<smem>>
    %66 = arith.subf %64, %65 : f32
    %cst_30 = arith.constant dense<0.000000e+00> : vector<8x128xf32>
    %67 = tpu.matmul %63, %0, %cst_30 {dimension_numbers = #tpu.dot_dimension_numbers<[1], [0], [0], [1], [0, 0, 1, 1], [], []>} : vector<8x128xf32>, vector<128x128xf32>, vector<8x128xf32> -> vector<8x128xf32>
    %68 = vector.broadcast %1 : vector<1x128xf32> to vector<8x128xf32>
    %69 = arith.addf %67, %68 : vector<8x128xf32>
    %70 = math.tanh %69 : vector<8x128xf32>
    %cst_31 = arith.constant dense<0.000000e+00> : vector<8x128xf32>
    %71 = tpu.matmul %70, %2, %cst_31 {dimension_numbers = #tpu.dot_dimension_numbers<[1], [0], [0], [1], [0, 0, 1, 1], [], []>} : vector<8x128xf32>, vector<128x128xf32>, vector<8x128xf32> -> vector<8x128xf32>
    %72 = vector.broadcast %3 : vector<1x128xf32> to vector<8x128xf32>
    %73 = arith.addf %71, %72 : vector<8x128xf32>
    %cst_32 = arith.constant 5.000000e-01 : f32
    %74 = arith.mulf %cst_32, %66 : f32
    %75 = vector.broadcast %74 : f32 to vector<8x128xf32>
    %76 = arith.mulf %75, %73 : vector<8x128xf32>
    %77 = arith.addf %63, %76 : vector<8x128xf32>
    %cst_33 = arith.constant dense<0.000000e+00> : vector<8x128xf32>
    %78 = tpu.matmul %77, %0, %cst_33 {dimension_numbers = #tpu.dot_dimension_numbers<[1], [0], [0], [1], [0, 0, 1, 1], [], []>} : vector<8x128xf32>, vector<128x128xf32>, vector<8x128xf32> -> vector<8x128xf32>
    %79 = vector.broadcast %1 : vector<1x128xf32> to vector<8x128xf32>
    %80 = arith.addf %78, %79 : vector<8x128xf32>
    %81 = math.tanh %80 : vector<8x128xf32>
    %cst_34 = arith.constant dense<0.000000e+00> : vector<8x128xf32>
    %82 = tpu.matmul %81, %2, %cst_34 {dimension_numbers = #tpu.dot_dimension_numbers<[1], [0], [0], [1], [0, 0, 1, 1], [], []>} : vector<8x128xf32>, vector<128x128xf32>, vector<8x128xf32> -> vector<8x128xf32>
    %83 = vector.broadcast %3 : vector<1x128xf32> to vector<8x128xf32>
    %84 = arith.addf %82, %83 : vector<8x128xf32>
    %cst_35 = arith.constant 5.000000e-01 : f32
    %85 = arith.mulf %cst_35, %66 : f32
    %86 = vector.broadcast %85 : f32 to vector<8x128xf32>
    %87 = arith.mulf %86, %84 : vector<8x128xf32>
    %88 = arith.addf %63, %87 : vector<8x128xf32>
    %cst_36 = arith.constant dense<0.000000e+00> : vector<8x128xf32>
    %89 = tpu.matmul %88, %0, %cst_36 {dimension_numbers = #tpu.dot_dimension_numbers<[1], [0], [0], [1], [0, 0, 1, 1], [], []>} : vector<8x128xf32>, vector<128x128xf32>, vector<8x128xf32> -> vector<8x128xf32>
    %90 = vector.broadcast %1 : vector<1x128xf32> to vector<8x128xf32>
    %91 = arith.addf %89, %90 : vector<8x128xf32>
    %92 = math.tanh %91 : vector<8x128xf32>
    %cst_37 = arith.constant dense<0.000000e+00> : vector<8x128xf32>
    %93 = tpu.matmul %92, %2, %cst_37 {dimension_numbers = #tpu.dot_dimension_numbers<[1], [0], [0], [1], [0, 0, 1, 1], [], []>} : vector<8x128xf32>, vector<128x128xf32>, vector<8x128xf32> -> vector<8x128xf32>
    %94 = vector.broadcast %3 : vector<1x128xf32> to vector<8x128xf32>
    %95 = arith.addf %93, %94 : vector<8x128xf32>
    %96 = vector.broadcast %66 : f32 to vector<8x128xf32>
    %97 = arith.mulf %96, %95 : vector<8x128xf32>
    %98 = arith.addf %63, %97 : vector<8x128xf32>
    %cst_38 = arith.constant dense<0.000000e+00> : vector<8x128xf32>
    %99 = tpu.matmul %98, %0, %cst_38 {dimension_numbers = #tpu.dot_dimension_numbers<[1], [0], [0], [1], [0, 0, 1, 1], [], []>} : vector<8x128xf32>, vector<128x128xf32>, vector<8x128xf32> -> vector<8x128xf32>
    %100 = vector.broadcast %1 : vector<1x128xf32> to vector<8x128xf32>
    %101 = arith.addf %99, %100 : vector<8x128xf32>
    %102 = math.tanh %101 : vector<8x128xf32>
    %cst_39 = arith.constant dense<0.000000e+00> : vector<8x128xf32>
    %103 = tpu.matmul %102, %2, %cst_39 {dimension_numbers = #tpu.dot_dimension_numbers<[1], [0], [0], [1], [0, 0, 1, 1], [], []>} : vector<8x128xf32>, vector<128x128xf32>, vector<8x128xf32> -> vector<8x128xf32>
    %104 = vector.broadcast %3 : vector<1x128xf32> to vector<8x128xf32>
    %105 = arith.addf %103, %104 : vector<8x128xf32>
    %cst_40 = arith.constant 6.000000e+00 : f32
    %106 = arith.divf %66, %cst_40 : f32
    %cst_41 = arith.constant 2.000000e+00 : f32
    %107 = vector.broadcast %cst_41 : f32 to vector<8x128xf32>
    %108 = arith.mulf %107, %84 : vector<8x128xf32>
    %109 = arith.addf %73, %108 : vector<8x128xf32>
    %cst_42 = arith.constant 2.000000e+00 : f32
    %110 = vector.broadcast %cst_42 : f32 to vector<8x128xf32>
    %111 = arith.mulf %110, %95 : vector<8x128xf32>
    %112 = arith.addf %109, %111 : vector<8x128xf32>
    %113 = arith.addf %112, %105 : vector<8x128xf32>
    %114 = vector.broadcast %106 : f32 to vector<8x128xf32>
    %115 = arith.mulf %114, %113 : vector<8x128xf32>
    %116 = arith.addf %63, %115 : vector<8x128xf32>
    %c3 = arith.constant 3 : index
    %117 = memref.load %arg1[%c3] : memref<8xf32, #tpu.memory_space<smem>>
    %c2_43 = arith.constant 2 : index
    %118 = memref.load %arg1[%c2_43] : memref<8xf32, #tpu.memory_space<smem>>
    %119 = arith.subf %117, %118 : f32
    %cst_44 = arith.constant dense<0.000000e+00> : vector<8x128xf32>
    %120 = tpu.matmul %116, %0, %cst_44 {dimension_numbers = #tpu.dot_dimension_numbers<[1], [0], [0], [1], [0, 0, 1, 1], [], []>} : vector<8x128xf32>, vector<128x128xf32>, vector<8x128xf32> -> vector<8x128xf32>
    %121 = vector.broadcast %1 : vector<1x128xf32> to vector<8x128xf32>
    %122 = arith.addf %120, %121 : vector<8x128xf32>
    %123 = math.tanh %122 : vector<8x128xf32>
    %cst_45 = arith.constant dense<0.000000e+00> : vector<8x128xf32>
    %124 = tpu.matmul %123, %2, %cst_45 {dimension_numbers = #tpu.dot_dimension_numbers<[1], [0], [0], [1], [0, 0, 1, 1], [], []>} : vector<8x128xf32>, vector<128x128xf32>, vector<8x128xf32> -> vector<8x128xf32>
    %125 = vector.broadcast %3 : vector<1x128xf32> to vector<8x128xf32>
    %126 = arith.addf %124, %125 : vector<8x128xf32>
    %cst_46 = arith.constant 5.000000e-01 : f32
    %127 = arith.mulf %cst_46, %119 : f32
    %128 = vector.broadcast %127 : f32 to vector<8x128xf32>
    %129 = arith.mulf %128, %126 : vector<8x128xf32>
    %130 = arith.addf %116, %129 : vector<8x128xf32>
    %cst_47 = arith.constant dense<0.000000e+00> : vector<8x128xf32>
    %131 = tpu.matmul %130, %0, %cst_47 {dimension_numbers = #tpu.dot_dimension_numbers<[1], [0], [0], [1], [0, 0, 1, 1], [], []>} : vector<8x128xf32>, vector<128x128xf32>, vector<8x128xf32> -> vector<8x128xf32>
    %132 = vector.broadcast %1 : vector<1x128xf32> to vector<8x128xf32>
    %133 = arith.addf %131, %132 : vector<8x128xf32>
    %134 = math.tanh %133 : vector<8x128xf32>
    %cst_48 = arith.constant dense<0.000000e+00> : vector<8x128xf32>
    %135 = tpu.matmul %134, %2, %cst_48 {dimension_numbers = #tpu.dot_dimension_numbers<[1], [0], [0], [1], [0, 0, 1, 1], [], []>} : vector<8x128xf32>, vector<128x128xf32>, vector<8x128xf32> -> vector<8x128xf32>
    %136 = vector.broadcast %3 : vector<1x128xf32> to vector<8x128xf32>
    %137 = arith.addf %135, %136 : vector<8x128xf32>
    %cst_49 = arith.constant 5.000000e-01 : f32
    %138 = arith.mulf %cst_49, %119 : f32
    %139 = vector.broadcast %138 : f32 to vector<8x128xf32>
    %140 = arith.mulf %139, %137 : vector<8x128xf32>
    %141 = arith.addf %116, %140 : vector<8x128xf32>
    %cst_50 = arith.constant dense<0.000000e+00> : vector<8x128xf32>
    %142 = tpu.matmul %141, %0, %cst_50 {dimension_numbers = #tpu.dot_dimension_numbers<[1], [0], [0], [1], [0, 0, 1, 1], [], []>} : vector<8x128xf32>, vector<128x128xf32>, vector<8x128xf32> -> vector<8x128xf32>
    %143 = vector.broadcast %1 : vector<1x128xf32> to vector<8x128xf32>
    %144 = arith.addf %142, %143 : vector<8x128xf32>
    %145 = math.tanh %144 : vector<8x128xf32>
    %cst_51 = arith.constant dense<0.000000e+00> : vector<8x128xf32>
    %146 = tpu.matmul %145, %2, %cst_51 {dimension_numbers = #tpu.dot_dimension_numbers<[1], [0], [0], [1], [0, 0, 1, 1], [], []>} : vector<8x128xf32>, vector<128x128xf32>, vector<8x128xf32> -> vector<8x128xf32>
    %147 = vector.broadcast %3 : vector<1x128xf32> to vector<8x128xf32>
    %148 = arith.addf %146, %147 : vector<8x128xf32>
    %149 = vector.broadcast %119 : f32 to vector<8x128xf32>
    %150 = arith.mulf %149, %148 : vector<8x128xf32>
    %151 = arith.addf %116, %150 : vector<8x128xf32>
    %cst_52 = arith.constant dense<0.000000e+00> : vector<8x128xf32>
    %152 = tpu.matmul %151, %0, %cst_52 {dimension_numbers = #tpu.dot_dimension_numbers<[1], [0], [0], [1], [0, 0, 1, 1], [], []>} : vector<8x128xf32>, vector<128x128xf32>, vector<8x128xf32> -> vector<8x128xf32>
    %153 = vector.broadcast %1 : vector<1x128xf32> to vector<8x128xf32>
    %154 = arith.addf %152, %153 : vector<8x128xf32>
    %155 = math.tanh %154 : vector<8x128xf32>
    %cst_53 = arith.constant dense<0.000000e+00> : vector<8x128xf32>
    %156 = tpu.matmul %155, %2, %cst_53 {dimension_numbers = #tpu.dot_dimension_numbers<[1], [0], [0], [1], [0, 0, 1, 1], [], []>} : vector<8x128xf32>, vector<128x128xf32>, vector<8x128xf32> -> vector<8x128xf32>
    %157 = vector.broadcast %3 : vector<1x128xf32> to vector<8x128xf32>
    %158 = arith.addf %156, %157 : vector<8x128xf32>
    %cst_54 = arith.constant 6.000000e+00 : f32
    %159 = arith.divf %119, %cst_54 : f32
    %cst_55 = arith.constant 2.000000e+00 : f32
    %160 = vector.broadcast %cst_55 : f32 to vector<8x128xf32>
    %161 = arith.mulf %160, %137 : vector<8x128xf32>
    %162 = arith.addf %126, %161 : vector<8x128xf32>
    %cst_56 = arith.constant 2.000000e+00 : f32
    %163 = vector.broadcast %cst_56 : f32 to vector<8x128xf32>
    %164 = arith.mulf %163, %148 : vector<8x128xf32>
    %165 = arith.addf %162, %164 : vector<8x128xf32>
    %166 = arith.addf %165, %158 : vector<8x128xf32>
    %167 = vector.broadcast %159 : f32 to vector<8x128xf32>
    %168 = arith.mulf %167, %166 : vector<8x128xf32>
    %169 = arith.addf %116, %168 : vector<8x128xf32>
    %c4 = arith.constant 4 : index
    %170 = memref.load %arg1[%c4] : memref<8xf32, #tpu.memory_space<smem>>
    %c3_57 = arith.constant 3 : index
    %171 = memref.load %arg1[%c3_57] : memref<8xf32, #tpu.memory_space<smem>>
    %172 = arith.subf %170, %171 : f32
    %cst_58 = arith.constant dense<0.000000e+00> : vector<8x128xf32>
    %173 = tpu.matmul %169, %0, %cst_58 {dimension_numbers = #tpu.dot_dimension_numbers<[1], [0], [0], [1], [0, 0, 1, 1], [], []>} : vector<8x128xf32>, vector<128x128xf32>, vector<8x128xf32> -> vector<8x128xf32>
    %174 = vector.broadcast %1 : vector<1x128xf32> to vector<8x128xf32>
    %175 = arith.addf %173, %174 : vector<8x128xf32>
    %176 = math.tanh %175 : vector<8x128xf32>
    %cst_59 = arith.constant dense<0.000000e+00> : vector<8x128xf32>
    %177 = tpu.matmul %176, %2, %cst_59 {dimension_numbers = #tpu.dot_dimension_numbers<[1], [0], [0], [1], [0, 0, 1, 1], [], []>} : vector<8x128xf32>, vector<128x128xf32>, vector<8x128xf32> -> vector<8x128xf32>
    %178 = vector.broadcast %3 : vector<1x128xf32> to vector<8x128xf32>
    %179 = arith.addf %177, %178 : vector<8x128xf32>
    %cst_60 = arith.constant 5.000000e-01 : f32
    %180 = arith.mulf %cst_60, %172 : f32
    %181 = vector.broadcast %180 : f32 to vector<8x128xf32>
    %182 = arith.mulf %181, %179 : vector<8x128xf32>
    %183 = arith.addf %169, %182 : vector<8x128xf32>
    %cst_61 = arith.constant dense<0.000000e+00> : vector<8x128xf32>
    %184 = tpu.matmul %183, %0, %cst_61 {dimension_numbers = #tpu.dot_dimension_numbers<[1], [0], [0], [1], [0, 0, 1, 1], [], []>} : vector<8x128xf32>, vector<128x128xf32>, vector<8x128xf32> -> vector<8x128xf32>
    %185 = vector.broadcast %1 : vector<1x128xf32> to vector<8x128xf32>
    %186 = arith.addf %184, %185 : vector<8x128xf32>
    %187 = math.tanh %186 : vector<8x128xf32>
    %cst_62 = arith.constant dense<0.000000e+00> : vector<8x128xf32>
    %188 = tpu.matmul %187, %2, %cst_62 {dimension_numbers = #tpu.dot_dimension_numbers<[1], [0], [0], [1], [0, 0, 1, 1], [], []>} : vector<8x128xf32>, vector<128x128xf32>, vector<8x128xf32> -> vector<8x128xf32>
    %189 = vector.broadcast %3 : vector<1x128xf32> to vector<8x128xf32>
    %190 = arith.addf %188, %189 : vector<8x128xf32>
    %cst_63 = arith.constant 5.000000e-01 : f32
    %191 = arith.mulf %cst_63, %172 : f32
    %192 = vector.broadcast %191 : f32 to vector<8x128xf32>
    %193 = arith.mulf %192, %190 : vector<8x128xf32>
    %194 = arith.addf %169, %193 : vector<8x128xf32>
    %cst_64 = arith.constant dense<0.000000e+00> : vector<8x128xf32>
    %195 = tpu.matmul %194, %0, %cst_64 {dimension_numbers = #tpu.dot_dimension_numbers<[1], [0], [0], [1], [0, 0, 1, 1], [], []>} : vector<8x128xf32>, vector<128x128xf32>, vector<8x128xf32> -> vector<8x128xf32>
    %196 = vector.broadcast %1 : vector<1x128xf32> to vector<8x128xf32>
    %197 = arith.addf %195, %196 : vector<8x128xf32>
    %198 = math.tanh %197 : vector<8x128xf32>
    %cst_65 = arith.constant dense<0.000000e+00> : vector<8x128xf32>
    %199 = tpu.matmul %198, %2, %cst_65 {dimension_numbers = #tpu.dot_dimension_numbers<[1], [0], [0], [1], [0, 0, 1, 1], [], []>} : vector<8x128xf32>, vector<128x128xf32>, vector<8x128xf32> -> vector<8x128xf32>
    %200 = vector.broadcast %3 : vector<1x128xf32> to vector<8x128xf32>
    %201 = arith.addf %199, %200 : vector<8x128xf32>
    %202 = vector.broadcast %172 : f32 to vector<8x128xf32>
    %203 = arith.mulf %202, %201 : vector<8x128xf32>
    %204 = arith.addf %169, %203 : vector<8x128xf32>
    %cst_66 = arith.constant dense<0.000000e+00> : vector<8x128xf32>
    %205 = tpu.matmul %204, %0, %cst_66 {dimension_numbers = #tpu.dot_dimension_numbers<[1], [0], [0], [1], [0, 0, 1, 1], [], []>} : vector<8x128xf32>, vector<128x128xf32>, vector<8x128xf32> -> vector<8x128xf32>
    %206 = vector.broadcast %1 : vector<1x128xf32> to vector<8x128xf32>
    %207 = arith.addf %205, %206 : vector<8x128xf32>
    %208 = math.tanh %207 : vector<8x128xf32>
    %cst_67 = arith.constant dense<0.000000e+00> : vector<8x128xf32>
    %209 = tpu.matmul %208, %2, %cst_67 {dimension_numbers = #tpu.dot_dimension_numbers<[1], [0], [0], [1], [0, 0, 1, 1], [], []>} : vector<8x128xf32>, vector<128x128xf32>, vector<8x128xf32> -> vector<8x128xf32>
    %210 = vector.broadcast %3 : vector<1x128xf32> to vector<8x128xf32>
    %211 = arith.addf %209, %210 : vector<8x128xf32>
    %cst_68 = arith.constant 6.000000e+00 : f32
    %212 = arith.divf %172, %cst_68 : f32
    %cst_69 = arith.constant 2.000000e+00 : f32
    %213 = vector.broadcast %cst_69 : f32 to vector<8x128xf32>
    %214 = arith.mulf %213, %190 : vector<8x128xf32>
    %215 = arith.addf %179, %214 : vector<8x128xf32>
    %cst_70 = arith.constant 2.000000e+00 : f32
    %216 = vector.broadcast %cst_70 : f32 to vector<8x128xf32>
    %217 = arith.mulf %216, %201 : vector<8x128xf32>
    %218 = arith.addf %215, %217 : vector<8x128xf32>
    %219 = arith.addf %218, %211 : vector<8x128xf32>
    %220 = vector.broadcast %212 : f32 to vector<8x128xf32>
    %221 = arith.mulf %220, %219 : vector<8x128xf32>
    %222 = arith.addf %169, %221 : vector<8x128xf32>
    %c5 = arith.constant 5 : index
    %223 = memref.load %arg1[%c5] : memref<8xf32, #tpu.memory_space<smem>>
    %c4_71 = arith.constant 4 : index
    %224 = memref.load %arg1[%c4_71] : memref<8xf32, #tpu.memory_space<smem>>
    %225 = arith.subf %223, %224 : f32
    %cst_72 = arith.constant dense<0.000000e+00> : vector<8x128xf32>
    %226 = tpu.matmul %222, %0, %cst_72 {dimension_numbers = #tpu.dot_dimension_numbers<[1], [0], [0], [1], [0, 0, 1, 1], [], []>} : vector<8x128xf32>, vector<128x128xf32>, vector<8x128xf32> -> vector<8x128xf32>
    %227 = vector.broadcast %1 : vector<1x128xf32> to vector<8x128xf32>
    %228 = arith.addf %226, %227 : vector<8x128xf32>
    %229 = math.tanh %228 : vector<8x128xf32>
    %cst_73 = arith.constant dense<0.000000e+00> : vector<8x128xf32>
    %230 = tpu.matmul %229, %2, %cst_73 {dimension_numbers = #tpu.dot_dimension_numbers<[1], [0], [0], [1], [0, 0, 1, 1], [], []>} : vector<8x128xf32>, vector<128x128xf32>, vector<8x128xf32> -> vector<8x128xf32>
    %231 = vector.broadcast %3 : vector<1x128xf32> to vector<8x128xf32>
    %232 = arith.addf %230, %231 : vector<8x128xf32>
    %cst_74 = arith.constant 5.000000e-01 : f32
    %233 = arith.mulf %cst_74, %225 : f32
    %234 = vector.broadcast %233 : f32 to vector<8x128xf32>
    %235 = arith.mulf %234, %232 : vector<8x128xf32>
    %236 = arith.addf %222, %235 : vector<8x128xf32>
    %cst_75 = arith.constant dense<0.000000e+00> : vector<8x128xf32>
    %237 = tpu.matmul %236, %0, %cst_75 {dimension_numbers = #tpu.dot_dimension_numbers<[1], [0], [0], [1], [0, 0, 1, 1], [], []>} : vector<8x128xf32>, vector<128x128xf32>, vector<8x128xf32> -> vector<8x128xf32>
    %238 = vector.broadcast %1 : vector<1x128xf32> to vector<8x128xf32>
    %239 = arith.addf %237, %238 : vector<8x128xf32>
    %240 = math.tanh %239 : vector<8x128xf32>
    %cst_76 = arith.constant dense<0.000000e+00> : vector<8x128xf32>
    %241 = tpu.matmul %240, %2, %cst_76 {dimension_numbers = #tpu.dot_dimension_numbers<[1], [0], [0], [1], [0, 0, 1, 1], [], []>} : vector<8x128xf32>, vector<128x128xf32>, vector<8x128xf32> -> vector<8x128xf32>
    %242 = vector.broadcast %3 : vector<1x128xf32> to vector<8x128xf32>
    %243 = arith.addf %241, %242 : vector<8x128xf32>
    %cst_77 = arith.constant 5.000000e-01 : f32
    %244 = arith.mulf %cst_77, %225 : f32
    %245 = vector.broadcast %244 : f32 to vector<8x128xf32>
    %246 = arith.mulf %245, %243 : vector<8x128xf32>
    %247 = arith.addf %222, %246 : vector<8x128xf32>
    %cst_78 = arith.constant dense<0.000000e+00> : vector<8x128xf32>
    %248 = tpu.matmul %247, %0, %cst_78 {dimension_numbers = #tpu.dot_dimension_numbers<[1], [0], [0], [1], [0, 0, 1, 1], [], []>} : vector<8x128xf32>, vector<128x128xf32>, vector<8x128xf32> -> vector<8x128xf32>
    %249 = vector.broadcast %1 : vector<1x128xf32> to vector<8x128xf32>
    %250 = arith.addf %248, %249 : vector<8x128xf32>
    %251 = math.tanh %250 : vector<8x128xf32>
    %cst_79 = arith.constant dense<0.000000e+00> : vector<8x128xf32>
    %252 = tpu.matmul %251, %2, %cst_79 {dimension_numbers = #tpu.dot_dimension_numbers<[1], [0], [0], [1], [0, 0, 1, 1], [], []>} : vector<8x128xf32>, vector<128x128xf32>, vector<8x128xf32> -> vector<8x128xf32>
    %253 = vector.broadcast %3 : vector<1x128xf32> to vector<8x128xf32>
    %254 = arith.addf %252, %253 : vector<8x128xf32>
    %255 = vector.broadcast %225 : f32 to vector<8x128xf32>
    %256 = arith.mulf %255, %254 : vector<8x128xf32>
    %257 = arith.addf %222, %256 : vector<8x128xf32>
    %cst_80 = arith.constant dense<0.000000e+00> : vector<8x128xf32>
    %258 = tpu.matmul %257, %0, %cst_80 {dimension_numbers = #tpu.dot_dimension_numbers<[1], [0], [0], [1], [0, 0, 1, 1], [], []>} : vector<8x128xf32>, vector<128x128xf32>, vector<8x128xf32> -> vector<8x128xf32>
    %259 = vector.broadcast %1 : vector<1x128xf32> to vector<8x128xf32>
    %260 = arith.addf %258, %259 : vector<8x128xf32>
    %261 = math.tanh %260 : vector<8x128xf32>
    %cst_81 = arith.constant dense<0.000000e+00> : vector<8x128xf32>
    %262 = tpu.matmul %261, %2, %cst_81 {dimension_numbers = #tpu.dot_dimension_numbers<[1], [0], [0], [1], [0, 0, 1, 1], [], []>} : vector<8x128xf32>, vector<128x128xf32>, vector<8x128xf32> -> vector<8x128xf32>
    %263 = vector.broadcast %3 : vector<1x128xf32> to vector<8x128xf32>
    %264 = arith.addf %262, %263 : vector<8x128xf32>
    %cst_82 = arith.constant 6.000000e+00 : f32
    %265 = arith.divf %225, %cst_82 : f32
    %cst_83 = arith.constant 2.000000e+00 : f32
    %266 = vector.broadcast %cst_83 : f32 to vector<8x128xf32>
    %267 = arith.mulf %266, %243 : vector<8x128xf32>
    %268 = arith.addf %232, %267 : vector<8x128xf32>
    %cst_84 = arith.constant 2.000000e+00 : f32
    %269 = vector.broadcast %cst_84 : f32 to vector<8x128xf32>
    %270 = arith.mulf %269, %254 : vector<8x128xf32>
    %271 = arith.addf %268, %270 : vector<8x128xf32>
    %272 = arith.addf %271, %264 : vector<8x128xf32>
    %273 = vector.broadcast %265 : f32 to vector<8x128xf32>
    %274 = arith.mulf %273, %272 : vector<8x128xf32>
    %275 = arith.addf %222, %274 : vector<8x128xf32>
    %c6 = arith.constant 6 : index
    %276 = memref.load %arg1[%c6] : memref<8xf32, #tpu.memory_space<smem>>
    %c5_85 = arith.constant 5 : index
    %277 = memref.load %arg1[%c5_85] : memref<8xf32, #tpu.memory_space<smem>>
    %278 = arith.subf %276, %277 : f32
    %cst_86 = arith.constant dense<0.000000e+00> : vector<8x128xf32>
    %279 = tpu.matmul %275, %0, %cst_86 {dimension_numbers = #tpu.dot_dimension_numbers<[1], [0], [0], [1], [0, 0, 1, 1], [], []>} : vector<8x128xf32>, vector<128x128xf32>, vector<8x128xf32> -> vector<8x128xf32>
    %280 = vector.broadcast %1 : vector<1x128xf32> to vector<8x128xf32>
    %281 = arith.addf %279, %280 : vector<8x128xf32>
    %282 = math.tanh %281 : vector<8x128xf32>
    %cst_87 = arith.constant dense<0.000000e+00> : vector<8x128xf32>
    %283 = tpu.matmul %282, %2, %cst_87 {dimension_numbers = #tpu.dot_dimension_numbers<[1], [0], [0], [1], [0, 0, 1, 1], [], []>} : vector<8x128xf32>, vector<128x128xf32>, vector<8x128xf32> -> vector<8x128xf32>
    %284 = vector.broadcast %3 : vector<1x128xf32> to vector<8x128xf32>
    %285 = arith.addf %283, %284 : vector<8x128xf32>
    %cst_88 = arith.constant 5.000000e-01 : f32
    %286 = arith.mulf %cst_88, %278 : f32
    %287 = vector.broadcast %286 : f32 to vector<8x128xf32>
    %288 = arith.mulf %287, %285 : vector<8x128xf32>
    %289 = arith.addf %275, %288 : vector<8x128xf32>
    %cst_89 = arith.constant dense<0.000000e+00> : vector<8x128xf32>
    %290 = tpu.matmul %289, %0, %cst_89 {dimension_numbers = #tpu.dot_dimension_numbers<[1], [0], [0], [1], [0, 0, 1, 1], [], []>} : vector<8x128xf32>, vector<128x128xf32>, vector<8x128xf32> -> vector<8x128xf32>
    %291 = vector.broadcast %1 : vector<1x128xf32> to vector<8x128xf32>
    %292 = arith.addf %290, %291 : vector<8x128xf32>
    %293 = math.tanh %292 : vector<8x128xf32>
    %cst_90 = arith.constant dense<0.000000e+00> : vector<8x128xf32>
    %294 = tpu.matmul %293, %2, %cst_90 {dimension_numbers = #tpu.dot_dimension_numbers<[1], [0], [0], [1], [0, 0, 1, 1], [], []>} : vector<8x128xf32>, vector<128x128xf32>, vector<8x128xf32> -> vector<8x128xf32>
    %295 = vector.broadcast %3 : vector<1x128xf32> to vector<8x128xf32>
    %296 = arith.addf %294, %295 : vector<8x128xf32>
    %cst_91 = arith.constant 5.000000e-01 : f32
    %297 = arith.mulf %cst_91, %278 : f32
    %298 = vector.broadcast %297 : f32 to vector<8x128xf32>
    %299 = arith.mulf %298, %296 : vector<8x128xf32>
    %300 = arith.addf %275, %299 : vector<8x128xf32>
    %cst_92 = arith.constant dense<0.000000e+00> : vector<8x128xf32>
    %301 = tpu.matmul %300, %0, %cst_92 {dimension_numbers = #tpu.dot_dimension_numbers<[1], [0], [0], [1], [0, 0, 1, 1], [], []>} : vector<8x128xf32>, vector<128x128xf32>, vector<8x128xf32> -> vector<8x128xf32>
    %302 = vector.broadcast %1 : vector<1x128xf32> to vector<8x128xf32>
    %303 = arith.addf %301, %302 : vector<8x128xf32>
    %304 = math.tanh %303 : vector<8x128xf32>
    %cst_93 = arith.constant dense<0.000000e+00> : vector<8x128xf32>
    %305 = tpu.matmul %304, %2, %cst_93 {dimension_numbers = #tpu.dot_dimension_numbers<[1], [0], [0], [1], [0, 0, 1, 1], [], []>} : vector<8x128xf32>, vector<128x128xf32>, vector<8x128xf32> -> vector<8x128xf32>
    %306 = vector.broadcast %3 : vector<1x128xf32> to vector<8x128xf32>
    %307 = arith.addf %305, %306 : vector<8x128xf32>
    %308 = vector.broadcast %278 : f32 to vector<8x128xf32>
    %309 = arith.mulf %308, %307 : vector<8x128xf32>
    %310 = arith.addf %275, %309 : vector<8x128xf32>
    %cst_94 = arith.constant dense<0.000000e+00> : vector<8x128xf32>
    %311 = tpu.matmul %310, %0, %cst_94 {dimension_numbers = #tpu.dot_dimension_numbers<[1], [0], [0], [1], [0, 0, 1, 1], [], []>} : vector<8x128xf32>, vector<128x128xf32>, vector<8x128xf32> -> vector<8x128xf32>
    %312 = vector.broadcast %1 : vector<1x128xf32> to vector<8x128xf32>
    %313 = arith.addf %311, %312 : vector<8x128xf32>
    %314 = math.tanh %313 : vector<8x128xf32>
    %cst_95 = arith.constant dense<0.000000e+00> : vector<8x128xf32>
    %315 = tpu.matmul %314, %2, %cst_95 {dimension_numbers = #tpu.dot_dimension_numbers<[1], [0], [0], [1], [0, 0, 1, 1], [], []>} : vector<8x128xf32>, vector<128x128xf32>, vector<8x128xf32> -> vector<8x128xf32>
    %316 = vector.broadcast %3 : vector<1x128xf32> to vector<8x128xf32>
    %317 = arith.addf %315, %316 : vector<8x128xf32>
    %cst_96 = arith.constant 6.000000e+00 : f32
    %318 = arith.divf %278, %cst_96 : f32
    %cst_97 = arith.constant 2.000000e+00 : f32
    %319 = vector.broadcast %cst_97 : f32 to vector<8x128xf32>
    %320 = arith.mulf %319, %296 : vector<8x128xf32>
    %321 = arith.addf %285, %320 : vector<8x128xf32>
    %cst_98 = arith.constant 2.000000e+00 : f32
    %322 = vector.broadcast %cst_98 : f32 to vector<8x128xf32>
    %323 = arith.mulf %322, %307 : vector<8x128xf32>
    %324 = arith.addf %321, %323 : vector<8x128xf32>
    %325 = arith.addf %324, %317 : vector<8x128xf32>
    %326 = vector.broadcast %318 : f32 to vector<8x128xf32>
    %327 = arith.mulf %326, %325 : vector<8x128xf32>
    %328 = arith.addf %275, %327 : vector<8x128xf32>
    %c7 = arith.constant 7 : index
    %329 = memref.load %arg1[%c7] : memref<8xf32, #tpu.memory_space<smem>>
    %c6_99 = arith.constant 6 : index
    %330 = memref.load %arg1[%c6_99] : memref<8xf32, #tpu.memory_space<smem>>
    %331 = arith.subf %329, %330 : f32
    %cst_100 = arith.constant dense<0.000000e+00> : vector<8x128xf32>
    %332 = tpu.matmul %328, %0, %cst_100 {dimension_numbers = #tpu.dot_dimension_numbers<[1], [0], [0], [1], [0, 0, 1, 1], [], []>} : vector<8x128xf32>, vector<128x128xf32>, vector<8x128xf32> -> vector<8x128xf32>
    %333 = vector.broadcast %1 : vector<1x128xf32> to vector<8x128xf32>
    %334 = arith.addf %332, %333 : vector<8x128xf32>
    %335 = math.tanh %334 : vector<8x128xf32>
    %cst_101 = arith.constant dense<0.000000e+00> : vector<8x128xf32>
    %336 = tpu.matmul %335, %2, %cst_101 {dimension_numbers = #tpu.dot_dimension_numbers<[1], [0], [0], [1], [0, 0, 1, 1], [], []>} : vector<8x128xf32>, vector<128x128xf32>, vector<8x128xf32> -> vector<8x128xf32>
    %337 = vector.broadcast %3 : vector<1x128xf32> to vector<8x128xf32>
    %338 = arith.addf %336, %337 : vector<8x128xf32>
    %cst_102 = arith.constant 5.000000e-01 : f32
    %339 = arith.mulf %cst_102, %331 : f32
    %340 = vector.broadcast %339 : f32 to vector<8x128xf32>
    %341 = arith.mulf %340, %338 : vector<8x128xf32>
    %342 = arith.addf %328, %341 : vector<8x128xf32>
    %cst_103 = arith.constant dense<0.000000e+00> : vector<8x128xf32>
    %343 = tpu.matmul %342, %0, %cst_103 {dimension_numbers = #tpu.dot_dimension_numbers<[1], [0], [0], [1], [0, 0, 1, 1], [], []>} : vector<8x128xf32>, vector<128x128xf32>, vector<8x128xf32> -> vector<8x128xf32>
    %344 = vector.broadcast %1 : vector<1x128xf32> to vector<8x128xf32>
    %345 = arith.addf %343, %344 : vector<8x128xf32>
    %346 = math.tanh %345 : vector<8x128xf32>
    %cst_104 = arith.constant dense<0.000000e+00> : vector<8x128xf32>
    %347 = tpu.matmul %346, %2, %cst_104 {dimension_numbers = #tpu.dot_dimension_numbers<[1], [0], [0], [1], [0, 0, 1, 1], [], []>} : vector<8x128xf32>, vector<128x128xf32>, vector<8x128xf32> -> vector<8x128xf32>
    %348 = vector.broadcast %3 : vector<1x128xf32> to vector<8x128xf32>
    %349 = arith.addf %347, %348 : vector<8x128xf32>
    %cst_105 = arith.constant 5.000000e-01 : f32
    %350 = arith.mulf %cst_105, %331 : f32
    %351 = vector.broadcast %350 : f32 to vector<8x128xf32>
    %352 = arith.mulf %351, %349 : vector<8x128xf32>
    %353 = arith.addf %328, %352 : vector<8x128xf32>
    %cst_106 = arith.constant dense<0.000000e+00> : vector<8x128xf32>
    %354 = tpu.matmul %353, %0, %cst_106 {dimension_numbers = #tpu.dot_dimension_numbers<[1], [0], [0], [1], [0, 0, 1, 1], [], []>} : vector<8x128xf32>, vector<128x128xf32>, vector<8x128xf32> -> vector<8x128xf32>
    %355 = vector.broadcast %1 : vector<1x128xf32> to vector<8x128xf32>
    %356 = arith.addf %354, %355 : vector<8x128xf32>
    %357 = math.tanh %356 : vector<8x128xf32>
    %cst_107 = arith.constant dense<0.000000e+00> : vector<8x128xf32>
    %358 = tpu.matmul %357, %2, %cst_107 {dimension_numbers = #tpu.dot_dimension_numbers<[1], [0], [0], [1], [0, 0, 1, 1], [], []>} : vector<8x128xf32>, vector<128x128xf32>, vector<8x128xf32> -> vector<8x128xf32>
    %359 = vector.broadcast %3 : vector<1x128xf32> to vector<8x128xf32>
    %360 = arith.addf %358, %359 : vector<8x128xf32>
    %361 = vector.broadcast %331 : f32 to vector<8x128xf32>
    %362 = arith.mulf %361, %360 : vector<8x128xf32>
    %363 = arith.addf %328, %362 : vector<8x128xf32>
    %cst_108 = arith.constant dense<0.000000e+00> : vector<8x128xf32>
    %364 = tpu.matmul %363, %0, %cst_108 {dimension_numbers = #tpu.dot_dimension_numbers<[1], [0], [0], [1], [0, 0, 1, 1], [], []>} : vector<8x128xf32>, vector<128x128xf32>, vector<8x128xf32> -> vector<8x128xf32>
    %365 = vector.broadcast %1 : vector<1x128xf32> to vector<8x128xf32>
    %366 = arith.addf %364, %365 : vector<8x128xf32>
    %367 = math.tanh %366 : vector<8x128xf32>
    %cst_109 = arith.constant dense<0.000000e+00> : vector<8x128xf32>
    %368 = tpu.matmul %367, %2, %cst_109 {dimension_numbers = #tpu.dot_dimension_numbers<[1], [0], [0], [1], [0, 0, 1, 1], [], []>} : vector<8x128xf32>, vector<128x128xf32>, vector<8x128xf32> -> vector<8x128xf32>
    %369 = vector.broadcast %3 : vector<1x128xf32> to vector<8x128xf32>
    %370 = arith.addf %368, %369 : vector<8x128xf32>
    %cst_110 = arith.constant 6.000000e+00 : f32
    %371 = arith.divf %331, %cst_110 : f32
    %cst_111 = arith.constant 2.000000e+00 : f32
    %372 = vector.broadcast %cst_111 : f32 to vector<8x128xf32>
    %373 = arith.mulf %372, %349 : vector<8x128xf32>
    %374 = arith.addf %338, %373 : vector<8x128xf32>
    %cst_112 = arith.constant 2.000000e+00 : f32
    %375 = vector.broadcast %cst_112 : f32 to vector<8x128xf32>
    %376 = arith.mulf %375, %360 : vector<8x128xf32>
    %377 = arith.addf %374, %376 : vector<8x128xf32>
    %378 = arith.addf %377, %370 : vector<8x128xf32>
    %379 = vector.broadcast %371 : f32 to vector<8x128xf32>
    %380 = arith.mulf %379, %378 : vector<8x128xf32>
    %381 = arith.addf %328, %380 : vector<8x128xf32>
    %c0_113 = arith.constant 0 : index
    %c0_114 = arith.constant 0 : index
    %382 = vector.load %arg9[%c0_113, %c0_114] : memref<128x128xf32, #tpu.memory_space<vmem>>, vector<128x128xf32>
    %cst_115 = arith.constant dense<0.000000e+00> : vector<8x128xf32>
    %383 = tpu.matmul %381, %382, %cst_115 {dimension_numbers = #tpu.dot_dimension_numbers<[1], [0], [0], [1], [0, 0, 1, 1], [], []>} : vector<8x128xf32>, vector<128x128xf32>, vector<8x128xf32> -> vector<8x128xf32>
    %384 = arith.addf %9, %383 : vector<8x128xf32>
    %385 = math.tanh %384 : vector<8x128xf32>
    %c0_116 = arith.constant 0 : index
    %c0_117 = arith.constant 0 : index
    %386 = vector.load %arg11[%c0_116, %c0_117] : memref<128x128xf32, #tpu.memory_space<vmem>>, vector<128x128xf32>
    %cst_118 = arith.constant dense<0.000000e+00> : vector<8x128xf32>
    %387 = tpu.matmul %385, %386, %cst_118 {dimension_numbers = #tpu.dot_dimension_numbers<[1], [0], [0], [1], [0, 0, 1, 1], [], []>} : vector<8x128xf32>, vector<128x128xf32>, vector<8x128xf32> -> vector<8x128xf32>
    %c0_119 = arith.constant 0 : index
    %c0_120 = arith.constant 0 : index
    %388 = vector.load %arg12[%c0_119, %c0_120] : memref<1x128xf32, #tpu.memory_space<vmem>>, vector<1x128xf32>
    %389 = vector.broadcast %388 : vector<1x128xf32> to vector<8x128xf32>
    %390 = arith.addf %387, %389 : vector<8x128xf32>
    %c0_121 = arith.constant 0 : index
    %c0_122 = arith.constant 0 : index
    %391 = vector.load %arg13[%c0_121, %c0_122] : memref<8x128xf32, #tpu.memory_space<vmem>>, vector<8x128xf32>
    tpu.vector_store %arg13[%c0_121, %c0_122], %390 {strides = array<i32>} : memref<8x128xf32, #tpu.memory_space<vmem>>, vector<8x128xf32>,
    %c0_123 = arith.constant 0 : index
    %c0_124 = arith.constant 0 : index
    %392 = vector.load %arg14[%c0_123, %c0_124] : memref<8x128xf32, #tpu.memory_space<vmem>>, vector<8x128xf32>
    tpu.vector_store %arg14[%c0_123, %c0_124], %385 {strides = array<i32>} : memref<8x128xf32, #tpu.memory_space<vmem>>, vector<8x128xf32>,
    return
  }
  func.func @transform_0(%arg0: i32) -> i32 {
    %c0_i32 = arith.constant 0 : i32
    %c0_i32_0 = arith.constant 0 : i32
    return %c0_i32 : i32
  }
  func.func @transform_1(%arg0: i32) -> (i32, i32) {
    %c0_i32 = arith.constant 0 : i32
    %c0_i32_0 = arith.constant 0 : i32
    return %arg0, %c0_i32 : i32, i32
  }
  func.func @transform_2(%arg0: i32) -> (i32, i32) {
    %c0_i32 = arith.constant 0 : i32
    %c0_i32_0 = arith.constant 0 : i32
    return %arg0, %c0_i32 : i32, i32
  }
  func.func @transform_3(%arg0: i32) -> (i32, i32) {
    %c0_i32 = arith.constant 0 : i32
    %c0_i32_0 = arith.constant 0 : i32
    %c0_i32_1 = arith.constant 0 : i32
    return %c0_i32, %c0_i32_0 : i32, i32
  }
  func.func @transform_4(%arg0: i32) -> (i32, i32) {
    %c0_i32 = arith.constant 0 : i32
    %c0_i32_0 = arith.constant 0 : i32
    %c0_i32_1 = arith.constant 0 : i32
    return %c0_i32, %c0_i32_0 : i32, i32
  }
  func.func @transform_5(%arg0: i32) -> (i32, i32) {
    %c0_i32 = arith.constant 0 : i32
    %c0_i32_0 = arith.constant 0 : i32
    %c0_i32_1 = arith.constant 0 : i32
    return %c0_i32, %c0_i32_0 : i32, i32
  }
  func.func @transform_6(%arg0: i32) -> (i32, i32) {
    %c0_i32 = arith.constant 0 : i32
    %c0_i32_0 = arith.constant 0 : i32
    %c0_i32_1 = arith.constant 0 : i32
    return %c0_i32, %c0_i32_0 : i32, i32
  }
  func.func @transform_7(%arg0: i32) -> (i32, i32) {
    %c0_i32 = arith.constant 0 : i32
    %c0_i32_0 = arith.constant 0 : i32
    %c0_i32_1 = arith.constant 0 : i32
    return %c0_i32, %c0_i32_0 : i32, i32
  }
  func.func @transform_8(%arg0: i32) -> (i32, i32) {
    %c0_i32 = arith.constant 0 : i32
    %c0_i32_0 = arith.constant 0 : i32
    %c0_i32_1 = arith.constant 0 : i32
    return %c0_i32, %c0_i32_0 : i32, i32
  }
  func.func @transform_9(%arg0: i32) -> (i32, i32) {
    %c0_i32 = arith.constant 0 : i32
    %c0_i32_0 = arith.constant 0 : i32
    %c0_i32_1 = arith.constant 0 : i32
    return %c0_i32, %c0_i32_0 : i32, i32
  }
  func.func @transform_10(%arg0: i32) -> (i32, i32) {
    %c0_i32 = arith.constant 0 : i32
    %c0_i32_0 = arith.constant 0 : i32
    %c0_i32_1 = arith.constant 0 : i32
    return %c0_i32, %c0_i32_0 : i32, i32
  }
  func.func @transform_11(%arg0: i32) -> (i32, i32) {
    %c0_i32 = arith.constant 0 : i32
    %c0_i32_0 = arith.constant 0 : i32
    %c0_i32_1 = arith.constant 0 : i32
    return %c0_i32, %c0_i32_0 : i32, i32
  }
  func.func @transform_12(%arg0: i32) -> (i32, i32) {
    %c0_i32 = arith.constant 0 : i32
    %c0_i32_0 = arith.constant 0 : i32
    return %arg0, %c0_i32 : i32, i32
  }
  func.func @transform_13(%arg0: i32) -> (i32, i32) {
    %c0_i32 = arith.constant 0 : i32
    %c0_i32_0 = arith.constant 0 : i32
    return %arg0, %c0_i32 : i32, i32
  }
}

</mosaic_0001>

<bundles_post_ra>
// kernel: tpu_custom_call.1
= control target key start
LH: loop header
LB: loop body
LE: loop exit
PB: predicated region body
PF: predicated region fallthrough
CT: control target
= control target key end

     0   :  { %s11871_s0 = inlined_call_operand.hbm [shape: f32[8], index: 0, kind: input, shape index: {}]   ;;  %s11872_s1 = inlined_call_operand.hbm [shape: f32[16,128], index: 1, kind: input, shape index: {}]   ;;  %s11873_s2 = inlined_call_operand.hbm [shape: f32[16,128], index: 2, kind: input, shape index: {}]   ;;  %s11874_s3 = inlined_call_operand.hbm [shape: f32[128,128], index: 3, kind: input, shape index: {}]   ;;  %s11875_s4 = inlined_call_operand.vmem [shape: f32[1,128], index: 4, kind: input, shape index: {}]   ;;  %s11876_s5 = inlined_call_operand.hbm [shape: f32[128,128], index: 5, kind: input, shape index: {}]   ;;  %s11877_s6 = inlined_call_operand.vmem [shape: f32[1,128], index: 6, kind: input, shape index: {}]   ;;  %s11878_s7 = inlined_call_operand.hbm [shape: f32[128,128], index: 7, kind: input, shape index: {}]   ;;  %s11879_s8 = inlined_call_operand.hbm [shape: f32[128,128], index: 8, kind: input, shape index: {}]   ;;  %s11880_s9 = inlined_call_operand.vmem [shape: f32[1,128], index: 9, kind: input, shape index: {}]   ;;  %s11881_s10 = inlined_call_operand.hbm [shape: f32[128,128], index: 10, kind: input, shape index: {}]   ;;  %s11882_s11 = inlined_call_operand.vmem [shape: f32[1,128], index: 11, kind: input, shape index: {}]   ;;  %s11883_s12 = inlined_call_operand.hbm [shape: f32[16,128], index: 12, kind: output, shape index: {0}]   ;;  %s11884_s13 = inlined_call_operand.hbm [shape: f32[16,128], index: 13, kind: output, shape index: {1}]  }
   0x1   :  { %11891 = sst [smem:[#allocation29_spill]] %s11871_s0 }
   0x2   :  { %11892 = sst [smem:[#allocation30_spill]] %s11874_s3 }
   0x3   :  { %11893 = sst [smem:[#allocation31_spill]] %s11876_s5 }
   0x4   :  { %11894 = sst [smem:[#allocation32_spill]] %s11878_s7 }
   0x5   :  { %11895 = sst [smem:[#allocation33_spill]] %s11879_s8 }
   0x6   :  { %11896 = sst [smem:[#allocation34_spill]] %s11881_s10 }
   0x7   :  { %11897 = sst [smem:[#allocation35_spill]] %s11882_s11 }
   0x8   :  { %11898 = sst [smem:[#allocation36_spill]] %s11883_s12 }
   0x9   :  { %19 = vsyncpa [#allocation5], 0 }
   0xa   :  { %20 = vsyncpa [#allocation3], 0 }
   0xb   :  { %22 = vsyncpa [#allocation3 + $0x1], 0 }
   0xc   :  { %23 = vsyncpa [#allocation8], 0 }
   0xd   :  { %25 = vsyncpa [#allocation8 + $0x1], 0 }
   0xe   :  { %26 = vsyncpa [#allocation11], 0 }
   0xf   :  { %27 = vsyncpa [#allocation14], 0 }
  0x10   :  { %28 = vsyncpa [#allocation4], 0 }
  0x11   :  { %30 = vsyncpa [#allocation4 + $0x1], 0 }
  0x12   :  { %31 = vsyncpa [#allocation18], 0 }
  0x13   :  { %33 = vsyncpa [#allocation18 + $0x1], 0  ;;  %s9034_s25 = smov 0   ;;  %s9036_s26 = smov 0  }
  0x14   :  { %s9038_s27 = smov 0   ;;  %s9040_s28 = smov 0  }
  0x15 LB: > { %11899 = sst [smem:[#allocation27_spill]] %s8944_s27  ;;  %s8950_s29 = smov [#allocation9]   ;;  %s8948_s28 = sphi %s9040_s28, %s11934_s28   ;;  %s8944_s27 = sphi %s9038_s27, %s11931_s27   ;;  %s8940_s26 = sphi %s9036_s26, %s11933_s26   ;;  %s8936_s25 = sphi %s9034_s25, %s11932_s25  }
  0x16   : > { %s379_s30 = sshll.u32 %s8950_s29, 4  ;;  %s9055_s14 = sadd.s32 4294967295, %s8948_s28   ;;  %s380_s30 = int_to_ptr.vmem [resolvable:$true] %s379_s30 }
  0x17   : > { %p5232_p0 = scmp.ge.s32.totalorder %s8948_s28, 1  ;;  %p11887_p1 = scmp.eq.s32.totalorder %s9055_s14, 0 }
  0x18   : > { %p358_p2 = scmp.lt.s32.totalorder %s8948_s28, 3  ;;  %s8951_s16 = smov [#allocation10]  }
  0x19   : > { %s395_s17 = sshll.u32 %s8951_s16, 4  ;;  %s8952_s19 = smov [#allocation13]   ;;  %s9073_s17 = int_to_ptr.vmem [resolvable:$true] %s395_s17 }
  0x1a   : > { %p9060_p3 = pnand %p5232_p0, %p358_p2  ;;  %s424_s20 = sshll.u32 %s8952_s19, 4  ;;  %s9075_s20 = int_to_ptr.vmem [resolvable:$true] %s424_s20 }
  0x1b   : > { %s8648_s22 = scalar_lea.vmem %s380_s30, 2048  ;;  %p8656_p11 = scmp.lt.s32.totalorder %s380_s30, %s380_s30 }
  0x1c   : > { %s11900_s15 = scalar_select %p9060_p3, 1, 0 }
  0x1d   : > { %p8372_p5 = pneg %p9060_p3  ;;  %p8649_p8 = scmp.ne.s32.totalorder %s380_s30, %s8648_s22 }
  0x1e   : > { %p8657_p12 = scmp.lt.s32.totalorder %s8648_s22, %s8648_s22 }
  0x1f   : > { %p9069_p6 = pnand %p8372_p5, %p11887_p1 }
  0x20   : > { %p8658_p13 = por %p8657_p12, %p8656_p11 }
  0x21   : > { %p9079_p7 = pneg %p9069_p6 }
  0x23   : > { %p8651_p9 = pnand %p8649_p8, %p9079_p7 }
  0x25   : > { %p8652_p10 = pneg %p8651_p9 }
  0x27   : > { %p8659_p0 = pnand %p8658_p13, %p8652_p10 }
  0x29   : > { %8662 = shalt.err (!%p8659_p0)
}
  0x2a   : > { %s8953_s23 = smov 128   ;;  %s8954_s24 = smov 8  }
  0x2b   : > { %s11903_s3 = sld [smem:[#allocation30_spill]]  ;;  %s8674_s19 = scalar_lea.vmem %s9073_s17, 2048 }
  0x2c   : > { %p8675_p2 = scmp.ne.s32.totalorder %s9073_s17, %s8674_s19  ;;  %p8682_p9 = scmp.lt.s32.totalorder %s9073_s17, %s9073_s17 }
  0x2d   : > { %p8683_p10 = scmp.lt.s32.totalorder %s8674_s19, %s8674_s19 }
  0x2e   : > { %p8677_p5 = pnand %p8675_p2, %p9079_p7 }
  0x2f   : > { %p8684_p11 = por %p8683_p10, %p8682_p9 }
  0x30   : > { %p8678_p8 = pneg %p8677_p5 }
  0x31   : > { %8378 = dma.hbm_to_vmem [thread:$0]  (!%p9069_p6), %s11903_s3, 2048, %s380_s30, [#allocation8], %s8953_s23, %s8953_s23, %s8954_s24  }
  0x32   : > { %p8685_p12 = pnand %p8684_p11, %p8678_p8 }
  0x34   : > { %8688 = shalt.err (!%p8685_p12)
}
  0x35   : > { %s11904_s5 = sld [smem:[#allocation31_spill]]  ;;  %s8700_s30 = scalar_lea.vmem %s9075_s20, 2048 }
  0x36   : > { %p8701_p13 = scmp.ne.s32.totalorder %s9075_s20, %s8700_s30  ;;  %p8708_p5 = scmp.lt.s32.totalorder %s9075_s20, %s9075_s20 }
  0x37   : > { %p8709_p8 = scmp.lt.s32.totalorder %s8700_s30, %s8700_s30 }
  0x38   : > { %p8703_p0 = pnand %p8701_p13, %p9079_p7 }
  0x39   : > { %p8710_p9 = por %p8709_p8, %p8708_p5 }
  0x3a   : > { %p8704_p2 = pneg %p8703_p0 }
  0x3b   : > { %8381 = dma.hbm_to_vmem [thread:$0]  (!%p9069_p6), %s11904_s5, 2048, %s9073_s17, [#allocation11], %s8953_s23, %s8953_s23, %s8954_s24  }
  0x3c   : > { %p8711_p10 = pnand %p8710_p9, %p8704_p2 }
  0x3e   : > { %8714 = shalt.err (!%p8711_p10)
}
  0x3f   : > { %s11905_s8 = sld [smem:[#allocation33_spill]]  ;;  %s8955_s17 = smov [#allocation2]  }
  0x40   : > { %s11906_s0 = sld [smem:[#allocation29_spill]]  ;;  %s8956_s30 = smov [#allocation12]  }
  0x41   : > { %s411_s3 = sshll.u32 %s8956_s30, 4  ;;  %s8957_s5 = smov [#allocation15]   ;;  %s412_s3 = int_to_ptr.vmem [resolvable:$true] %s411_s3 }
  0x42   : > { %s440_s12 = sshll.u32 %s8957_s5, 4  ;;  %s8737_s11 = scalar_lea.vmem %s412_s3, 2048  ;;  %s441_s12 = int_to_ptr.vmem [resolvable:$true] %s440_s12 }
  0x43   : > { %p8738_p11 = scmp.ne.s32.totalorder %s412_s3, %s8737_s11  ;;  %p8745_p0 = scmp.lt.s32.totalorder %s412_s3, %s412_s3 }
  0x44   : > { %p8746_p2 = scmp.lt.s32.totalorder %s8737_s11, %s8737_s11 }
  0x45   : > { %8387 = dma.hbm_to_vmem [thread:$0]  (!%p9069_p6), %s11905_s8, 2048, %s9075_s20, [#allocation14], %s8953_s23, %s8953_s23, %s8954_s24  }
  0x46   : > { %8375 = dma.hbm_to_smem (!%p9069_p6), %s11906_s0, 16, %s8955_s17, [#allocation5]  }
  0x47   : > { %p8740_p12 = pnand %p8738_p11, %p9079_p7  ;;  %p8747_p5 = por %p8746_p2, %p8745_p0 }
  0x49   : > { %p8741_p13 = pneg %p8740_p12 }
  0x4b   : > { %p8748_p8 = pnand %p8747_p5, %p8741_p13 }
  0x4d   : > { %8751 = shalt.err (!%p8748_p8)
}
  0x4e   : > { %s11907_s7 = sld [smem:[#allocation32_spill]]  ;;  %s8763_s5 = scalar_lea.vmem %s441_s12, 2048 }
  0x4f   : > { %p8764_p9 = scmp.ne.s32.totalorder %s441_s12, %s8763_s5  ;;  %p8771_p12 = scmp.lt.s32.totalorder %s441_s12, %s441_s12 }
  0x50   : > { %p8772_p4 = scmp.lt.s32.totalorder %s8763_s5, %s8763_s5 }
  0x51   : > { %p8766_p10 = pnand %p8764_p9, %p9079_p7 }
  0x52   : > { %p8773_p0 = por %p8772_p4, %p8771_p12 }
  0x53   : > { %p8767_p11 = pneg %p8766_p10 }
  0x54   : > { %8384 = dma.hbm_to_vmem [thread:$0]  (!%p9069_p6), %s11907_s7, 2048, %s412_s3, [#allocation11], %s8953_s23, %s8953_s23, %s8954_s24  }
  0x55   : > { %p8774_p13 = pnand %p8773_p0, %p8767_p11 }
  0x57   : > { %8777 = shalt.err (!%p8774_p13)
}
  0x58   : > { %s11908_s10 = sld [smem:[#allocation34_spill]]  ;;  %s5231_s3 = sadd.s32 4294967294, %s8948_s28  }
  0x59   : > { %s9150_s18 = sadd.s32 1, %s8948_s28   ;;  %s67_s17 = sadd.s32 1, %s8944_s27 }
  0x5a   : > { %s64_s21 = ssub.s32 %s8948_s28, %s9150_s18  ;;  %p74_p7 = scmp.ne.s32.totalorder %s8944_s27, %s8940_s26 }
  0x5b   : > { %p65_p4 = scmp.eq.s32.totalorder %s64_s21, 0  ;;  %p75_p2 = scmp.eq.s32.totalorder %s8948_s28, 0 }
  0x5c   : > { %p80_p5 = scmp.ne.s32.totalorder %s8940_s26, %s8936_s25  ;;  %p319_p9 = scmp.eq.s32.totalorder %s9055_s14, 1 }
  0x5d   : > { %s9161_s22 = scalar_select %p65_p4, %s8944_s27, %s67_s17  }
  0x5e   : > { %8390 = dma.hbm_to_vmem [thread:$0]  (!%p9069_p6), %s11908_s10, 2048, %s441_s12, [#allocation14], %s8953_s23, %s8953_s23, %s8954_s24  }
  0x5f   : > { %11909 = sst [smem:[#allocation28_spill]] %s9161_s22  ;;  %p9163_p8 = por %p75_p2, %p74_p7 }
  0x60   : > { %p9169_p6 = por %p11887_p1, %p80_p5  ;;  %p325_p10 = scmp.eq.s32.totalorder %s5231_s3, 1 }
  0x61   : > { %p8411_p11 = scmp.lt.s32.totalorder %s8948_s28, 2  ;;  %s457_s23 = sand.u32 1, %s8944_s27  }
  0x62   : > { %s11911_s12 = scalar_select %p9169_p6, 1, 0 }
  0x63   : > { %p9176_p12 = por %p319_p9, %p74_p7  ;;  %p9180_p0 = por %p325_p10, %p80_p5 }
  0x64   : > { %s9184_s20 = sshll.u32 %s457_s23, 3  ;;  %s5241_s16 = sshll.u32 %s8948_s28, 7 }
  0x65   : > { %s11912_s24 = scalar_select %p9176_p12, 1, 0 }
  0x66   : > { %s11913_s30 = scalar_select %p9180_p0, 1, 0 }
  0x67   : > { %s9190_s19 = scalar_lea.hbm %s11872_s1, %s5241_s16  ;;  %s461_s3 = scalar_lea.vmem [#allocation6], %s9184_s20 }
  0x68   : > { %s468_s21 = sshll.u32 %s461_s3, 4  ;;  %p9197_p13 = pnand %p8411_p11, %p9163_p8  ;;  %s9193_s21 = int_to_ptr.vmem [resolvable:$true] %s468_s21 }
  0x69   : > { %s9204_s5 = scalar_lea.hbm %s11873_s2, %s5241_s16  ;;  %s475_s11 = sand.u32 1, %s8948_s28  }
  0x6a   : > { %s458_s8 = scalar_lea.sflag [#allocation3], %s457_s23  ;;  %s8778_s10 = scalar_lea.hbm %s9190_s19, 128 }
  0x6b   : > { %p8779_p4 = scmp.ne.s32.totalorder %s9190_s19, %s8778_s10  ;;  %p8780_p7 = pneg %p9197_p13 }
  0x6c   : > { %s8783_s22 = scalar_lea.hbm %s11872_s1, 256  ;;  %p8784_p8 = scmp.lt.s32.totalorder %s9190_s19, %s11872_s1 }
  0x6d   : > { %p8781_p2 = pnand %p8780_p7, %p8779_p4  ;;  %p8785_p9 = scmp.lt.s32.totalorder %s8783_s22, %s8778_s10 }
  0x6f   : > { %p8782_p5 = pneg %p8781_p2  ;;  %p8786_p10 = por %p8785_p9, %p8784_p8 }
  0x71   : > { %p8787_p11 = pnand %p8786_p10, %p8782_p5 }
  0x73   : > { %8790 = shalt.err (!%p8787_p11)
}
  0x74   : > { %s8791_s7 = scalar_lea.vmem %s9193_s21, 128  ;;  %s8958_s23 = smov [#allocation6]  }
  0x75   : > { %p8792_p1 = scmp.ne.s32.totalorder %s9193_s21, %s8791_s7  ;;  %s8796_s16 = sshll.u32 %s8958_s23, 4  ;;  %s8797_s16 = int_to_ptr.vmem [resolvable:$false] %s8796_s16 }
  0x76   : > { %s8798_s29 = scalar_lea.vmem %s8797_s16, 256  ;;  %p8799_p0 = scmp.lt.s32.totalorder %s9193_s21, %s8797_s16 }
  0x77   : > { %p8794_p4 = pnand %p8792_p1, %p8780_p7  ;;  %p8800_p12 = scmp.lt.s32.totalorder %s8798_s29, %s8791_s7 }
  0x79   : > { %p8795_p2 = pneg %p8794_p4  ;;  %p8801_p6 = por %p8800_p12, %p8799_p0 }
  0x7b   : > { %p8802_p8 = pnand %p8801_p6, %p8795_p2 }
  0x7d   : > { %8805 = shalt.err (!%p8802_p8)
}
  0x7e   : > { %8394 = dma.hbm_to_vmem [thread:$0]  (!%p9197_p13), %s9190_s19, 128, %s9193_s21, %s458_s8  }
  0x7f   : > { %s479_s10 = scalar_lea.vmem [#allocation7], %s9184_s20  ;;  %s476_s22 = scalar_lea.sflag [#allocation8], %s475_s11 }
  0x80   : > { %s486_s27 = sshll.u32 %s479_s10, 4  ;;  %s8806_s3 = scalar_lea.hbm %s9204_s5, 128  ;;  %s487_s27 = int_to_ptr.vmem [resolvable:$true] %s486_s27 }
  0x81   : > { %p8807_p1 = scmp.ne.s32.totalorder %s9204_s5, %s8806_s3  ;;  %s8811_s23 = scalar_lea.hbm %s11873_s2, 256 }
  0x82   : > { %p8812_p0 = scmp.lt.s32.totalorder %s9204_s5, %s11873_s2  ;;  %p8813_p5 = scmp.lt.s32.totalorder %s8811_s23, %s8806_s3 }
  0x83   : > { %p8809_p6 = pnand %p8807_p1, %p8780_p7 }
  0x84   : > { %p8814_p9 = por %p8813_p5, %p8812_p0 }
  0x85   : > { %p8810_p12 = pneg %p8809_p6 }
  0x87   : > { %p8815_p10 = pnand %p8814_p9, %p8810_p12 }
  0x89   : > { %8818 = shalt.err (!%p8815_p10)
}
  0x8a   : > { %s8819_s8 = scalar_lea.vmem %s487_s27, 128  ;;  %s8959_s20 = smov [#allocation7]  }
  0x8b   : > { %p8820_p11 = scmp.ne.s32.totalorder %s487_s27, %s8819_s8  ;;  %s8824_s19 = sshll.u32 %s8959_s20, 4  ;;  %s8825_s19 = int_to_ptr.vmem [resolvable:$false] %s8824_s19 }
  0x8c   : > { %s8826_s21 = scalar_lea.vmem %s8825_s19, 256  ;;  %p8827_p8 = scmp.lt.s32.totalorder %s487_s27, %s8825_s19 }
  0x8d   : > { %p8822_p4 = pnand %p8820_p11, %p8780_p7  ;;  %p8828_p1 = scmp.lt.s32.totalorder %s8826_s21, %s8819_s8 }
  0x8f   : > { %p8823_p2 = pneg %p8822_p4  ;;  %p8829_p6 = por %p8828_p1, %p8827_p8 }
  0x91   : > { %p8830_p3 = pnand %p8829_p6, %p8823_p2 }
  0x93   : > { %8833 = shalt.err (!%p8830_p3)
}
  0x94   : > { %8397 = dma.hbm_to_vmem [thread:$0]  (!%p9197_p13), %s9204_s5, 128, %s487_s27, %s476_s22  }
  0x95   : > { %p11915_p12 = scmp.ne.s32.totalorder %s11900_s15, 0 }
  0x96   : > { %p11916_p0 = scmp.eq.s32.totalorder (!%p11915_p12), %s9055_s14, 0 }
  0x97   : > { %495 = sbr.rel (%p11915_p12) target bundleno = 12063 (0x2f1f), region = 68 }
  0x9c   : > { %8903 = dma.done.wait (%p11916_p0), [#allocation5], 16   ;;  %p11917_p7 = pmov %p11916_p0 }
  0x9d   : > { %s9259_s11 = sand.u32 1, %s8940_s26   ;;  %p11918_p3 = scmp.ne.s32.totalorder %s11911_s12, 0 }
  0x9e   : > { %8905 = vsyncadd (%p11917_p7), [#allocation5], 4294967280  ;;  %s9262_s10 = sshll.u32 %s9259_s11, 3  ;;  %s502_s17 = scalar_lea.sflag [#allocation3], %s9259_s11 }
  0x9f   : > { %s505_s5 = scalar_lea.vmem [#allocation6], %s9262_s10 }
  0xa0   : > { %8907 = dma.done.wait (%p11918_p3), %s502_s17, 128  }
  0xa1   : > { %8909 = vsyncadd (%p11918_p3), %s502_s17, 4294967168  ;;  %s510_s15 = sand.u32 1, %s9055_s14   ;;  %s514_s22 = scalar_lea.vmem [#allocation7], %s9262_s10 }
  0xa2   : > { %s511_s27 = scalar_lea.sflag [#allocation8], %s510_s15 }
  0xa3   : > { %8911 = dma.done.wait (%p11918_p3), %s511_s27, 128  }
  0xa4   : > { %8913 = vsyncadd (%p11918_p3), %s511_s27, 4294967168  ;;  %p11919_p13 = pmov %p11916_p0 }
  0xa5   : > { %p11920_p5 = pmov %p11916_p0 }
  0xa6   : > { %8915 = dma.done.wait (%p11919_p13), [#allocation8], 2048  }
  0xa7   : > { %8917 = vsyncadd (%p11920_p5), [#allocation8], 4294965248  ;;  %p11921_p9 = pmov %p11916_p0 }
  0xa8   : > { %p11922_p10 = pmov %p11916_p0 }
  0xa9   : > { %8919 = dma.done.wait (%p11921_p9), [#allocation11], 4096  }
  0xaa   : > { %8921 = vsyncadd (%p11922_p10), [#allocation11], 4294963200  ;;  %p11923_p11 = pmov %p11916_p0 }
  0xab   : > { %p11924_p4 = pmov %p11916_p0 }
  0xac   : > { %8923 = dma.done.wait (%p11923_p11), [#allocation14], 4096  }
  0xad   : > { %8925 = vsyncadd (%p11924_p4), [#allocation14], 4294963200 }
  0xae   : > { %539 = sfence }
  0xaf   : > { %v9288_v0 = vld [vmem:[#allocation9 + $0x78] sm:$0xff]  ;;  %v8960_v1 = vmov 0.0   ;;  %v9291_v2 = vld [vmem:[#allocation9 + $0x70] sm:$0xff]  ;;  %vm8961_vm0 = vmmov 0   ;;  %v9298_v3 = vld [vmem:[#allocation9 + $0x68] sm:$0xff]  ;;  %s9523_s0 = sld [smem:[#allocation2 + $0x1]] }
  0xb0   : > { %6310 = vmatprep.subr.mxu1 %v8960_v1  ;;  %6342 = vmatprep.mubr.msk.f32.mxu1 %vm8961_vm0, %v8960_v1  ;;  %v9304_v4 = vld [vmem:[#allocation9 + $0x60] sm:$0xff]  ;;  %v638_v5 = vld [vmem:[#allocation12 + $0x78] sm:$0xff]  ;;  %v637_v6 = vld [vmem:[#allocation12 + $0x70] sm:$0xff]  ;;  %s718_s7 = sld [smem:[#allocation2]]  ;;  %p11925_p8 = scmp.ne.s32.totalorder %s11912_s24, 0 }
  0xb1   : > { %6311 = vmatpush3.msra.mxu1 %v9288_v0  ;;  %6275 = vmatprep.subr.mxu0 %v8960_v1  ;;  %v9308_v7 = vld [vmem:[#allocation9 + $0x58] sm:$0xff]  ;;  %v636_v8 = vld [vmem:[#allocation12 + $0x68] sm:$0xff]  ;;  %v9313_v9 = vld [vmem:[#allocation9 + $0x50] sm:$0xff]  ;;  %s9838_s19 = sld [smem:[#allocation2 + $0x2]] }
  0xb2   : > { %6312 = vmatprep.subr.mxu1 %v8960_v1  ;;  %6307 = vmatprep.mubr.msk.f32.mxu0 %vm8961_vm0, %v8960_v1  ;;  %v635_v10 = vld [vmem:[#allocation12 + $0x60] sm:$0xff]  ;;  %v9318_v11 = vld [vmem:[#allocation9 + $0x48] sm:$0xff]  ;;  %v634_v12 = vld [vmem:[#allocation12 + $0x58] sm:$0xff]  ;;  %s10223_s3 = sld [smem:[#allocation2 + $0x3]] }
  0xb3   : > { %6313 = vmatpush3.msra.mxu1 %v9291_v2  ;;  %6276 = vmatpush3.msra.mxu0 %v638_v5  ;;  %v9323_v13 = vld [vmem:[#allocation9 + $0x40] sm:$0xff]  ;;  %v633_v14 = vld [vmem:[#allocation12 + $0x50] sm:$0xff]  ;;  %v9328_v15 = vld [vmem:[#allocation9 + $0x38] sm:$0xff]  ;;  %s10919_s15 = sld [smem:[#allocation2 + $0x5]] }
  0xb4   : > { %6314 = vmatprep.subr.mxu1 %v8960_v1  ;;  %6277 = vmatprep.subr.mxu0 %v8960_v1  ;;  %v632_v16 = vld [vmem:[#allocation12 + $0x48] sm:$0xff]  ;;  %v9333_v17 = vld [vmem:[#allocation9 + $0x30] sm:$0xff]  ;;  %v631_v18 = vld [vmem:[#allocation12 + $0x40] sm:$0xff] }
  0xb5   : > { %6315 = vmatpush3.msra.mxu1 %v9298_v3  ;;  %6278 = vmatpush3.msra.mxu0 %v637_v6  ;;  %v9338_v19 = vld [vmem:[#allocation9 + $0x28] sm:$0xff]  ;;  %v630_v20 = vld [vmem:[#allocation12 + $0x38] sm:$0xff]  ;;  %v9343_v21 = vld [vmem:[#allocation9 + $0x20] sm:$0xff] }
  0xb6   : > { %6316 = vmatprep.subr.mxu1 %v8960_v1  ;;  %6279 = vmatprep.subr.mxu0 %v8960_v1  ;;  %v629_v22 = vld [vmem:[#allocation12 + $0x30] sm:$0xff]  ;;  %v9348_v23 = vld [vmem:[#allocation9 + $0x18] sm:$0xff]  ;;  %v628_v24 = vld [vmem:[#allocation12 + $0x28] sm:$0xff]  ;;  %s9526_s23 = ssub.f32 %s9523_s0, %s718_s7 }
  0xb7   : > { %6317 = vmatpush3.msra.mxu1 %v9304_v4  ;;  %6280 = vmatpush3.msra.mxu0 %v636_v8  ;;  %v9353_v25 = vld [vmem:[#allocation9 + $0x10] sm:$0xff]  ;;  %v627_v26 = vld [vmem:[#allocation12 + $0x20] sm:$0xff]  ;;  %v9358_v27 = vld [vmem:[#allocation9 + $0x8] sm:$0xff]  ;;  %s9842_s21 = ssub.f32 %s9838_s19, %s9523_s0 }
  0xb8   : > { %6318 = vmatprep.subr.mxu1 %v8960_v1  ;;  %6281 = vmatprep.subr.mxu0 %v8960_v1  ;;  %v626_v28 = vld [vmem:[#allocation12 + $0x18] sm:$0xff]  ;;  %v9363_v29 = vld [vmem:[#allocation9] sm:$0xff]  ;;  %v625_v30 = vld [vmem:[#allocation12 + $0x10] sm:$0xff]  ;;  %s873_s16 = smul.f32 0.5, %s9526_s23  ;;  %s10227_s0 = ssub.f32 %s10223_s3, %s9838_s19 }
  0xb9   : > { %6319 = vmatpush3.msra.mxu1 %v9308_v7  ;;  %6282 = vmatpush3.msra.mxu0 %v635_v10  ;;  %v9369_v31 = vld [vmem:[%s514_s22] sm:$0xff]  ;;  %v624_v32 = vld [vmem:[#allocation12 + $0x8] sm:$0xff]  ;;  %v623_v33 = vld [vmem:[#allocation12] sm:$0xff]  ;;  %s1307_s20 = smul.f32 0.16666667, %s9526_s23  ;;  %s5264_s19 = sld [smem:[#allocation2 + $0x7]] }
  0xba   : > { %6320 = vmatprep.subr.mxu1 %v8960_v1  ;;  %6283 = vmatprep.subr.mxu0 %v8960_v1  ;;  %v622_v34 = vld [vmem:[%s505_s5] sm:$0xff]  ;;  %v9380_v35 = vld [vmem:[#allocation10 + $0x78] sm:$0xff]  ;;  %v9385_v36 = vld [vmem:[#allocation10 + $0x70] sm:$0xff]  ;;  %v9534_v60 = vstv %s873_s16  ;;  %s1459_s17 = smul.f32 0.5, %s9842_s21  ;;  %s10566_s16 = sld [smem:[#allocation2 + $0x4]] }
  0xbb   : > { %6321 = vmatpush3.msra.mxu1 %v9313_v9  ;;  %6284 = vmatpush3.msra.mxu0 %v634_v12  ;;  %v9391_v37 = vld [vmem:[#allocation10 + $0x68] sm:$0xff]  ;;  %v9397_v38 = vld [vmem:[#allocation10 + $0x60] sm:$0xff]  ;;  %v9403_v39 = vld [vmem:[#allocation10 + $0x58] sm:$0xff]  ;;  %s1893_s27 = smul.f32 0.16666667, %s9842_s21 }
  0xbc   : > { %6322 = vmatprep.subr.mxu1 %v8960_v1  ;;  %6285 = vmatprep.subr.mxu0 %v8960_v1  ;;  %v9409_v40 = vld [vmem:[#allocation10 + $0x50] sm:$0xff]  ;;  %v9415_v41 = vld [vmem:[#allocation10 + $0x48] sm:$0xff]  ;;  %v9445_v42 = vld [vmem:[#allocation10 + $0x40] sm:$0xff]  ;;  %s2045_s7 = smul.f32 0.5, %s10227_s0 }
  0xbd   : > { %6323 = vmatpush3.msra.mxu1 %v9318_v11  ;;  %6286 = vmatpush3.msra.mxu0 %v633_v14  ;;  %v9449_v43 = vld [vmem:[#allocation10 + $0x38] sm:$0xff]  ;;  %v9453_v44 = vld [vmem:[#allocation10 + $0x30] sm:$0xff]  ;;  %v9455_v45 = vld [vmem:[#allocation10 + $0x28] sm:$0xff] }
  0xbe   : > { %6324 = vmatprep.subr.mxu1 %v8960_v1  ;;  %6287 = vmatprep.subr.mxu0 %v8960_v1  ;;  %v9459_v46 = vld [vmem:[#allocation10 + $0x20] sm:$0xff]  ;;  %v9463_v47 = vld [vmem:[#allocation10 + $0x18] sm:$0xff]  ;;  %v9467_v48 = vld [vmem:[#allocation10 + $0x10] sm:$0xff] }
  0xbf   : > { %6325 = vmatpush3.msra.mxu1 %v9323_v13  ;;  %6288 = vmatpush3.msra.mxu0 %v632_v16  ;;  %v9471_v49 = vld [vmem:[#allocation10 + $0x8] sm:$0xff]  ;;  %v9475_v50 = vld [vmem:[#allocation10] sm:$0xff] }
  0xc0   : > { %6326 = vmatprep.subr.mxu1 %v8960_v1  ;;  %6289 = vmatprep.subr.mxu0 %v8960_v1  ;;  %v9484_v51 = vld [vmem:[%s11875_s4] ss:$0 sm:$0xff]  ;;  %s10570_s29 = ssub.f32 %s10566_s16, %s10223_s3 }
  0xc1   : > { %6327 = vmatpush3.msra.mxu1 %v9328_v15  ;;  %6290 = vmatpush3.msra.mxu0 %v631_v18  ;;  %v9532_v58 = vld [vmem:[%s11877_s6] ss:$0 sm:$0xff]  ;;  %s11294_s3 = sld [smem:[#allocation2 + $0x6]] }
  0xc2   : > { %6328 = vmatprep.subr.mxu1 %v8960_v1  ;;  %6291 = vmatprep.subr.mxu0 %v8960_v1  ;;  %s2631_s8 = smul.f32 0.5, %s10570_s29 }
  0xc3   : > { %6329 = vmatpush3.msra.mxu1 %v9333_v17  ;;  %6292 = vmatpush3.msra.mxu0 %v630_v20  ;;  %s3065_s5 = smul.f32 0.16666667, %s10570_s29 }
  0xc4   : > { %6330 = vmatprep.subr.mxu1 %v8960_v1  ;;  %6293 = vmatprep.subr.mxu0 %v8960_v1 }
  0xc5   : > { %6331 = vmatpush3.msra.mxu1 %v9338_v19  ;;  %6294 = vmatpush3.msra.mxu0 %v629_v22 }
  0xc6   : > { %6332 = vmatprep.subr.mxu1 %v8960_v1  ;;  %6295 = vmatprep.subr.mxu0 %v8960_v1 }
  0xc7   : > { %6333 = vmatpush3.msra.mxu1 %v9343_v21  ;;  %6296 = vmatpush3.msra.mxu0 %v628_v24 }
  0xc8   : > { %6334 = vmatprep.subr.mxu1 %v8960_v1  ;;  %6297 = vmatprep.subr.mxu0 %v8960_v1 }
  0xc9   : > { %6335 = vmatpush3.msra.mxu1 %v9348_v23  ;;  %6298 = vmatpush3.msra.mxu0 %v627_v26 }
  0xca   : > { %6336 = vmatprep.subr.mxu1 %v8960_v1  ;;  %6299 = vmatprep.subr.mxu0 %v8960_v1 }
  0xcb   : > { %6337 = vmatpush3.msra.mxu1 %v9353_v25  ;;  %6300 = vmatpush3.msra.mxu0 %v626_v28 }
  0xcc   : > { %6338 = vmatprep.subr.mxu1 %v8960_v1  ;;  %6301 = vmatprep.subr.mxu0 %v8960_v1 }
  0xcd   : > { %6339 = vmatpush3.msra.mxu1 %v9358_v27  ;;  %6302 = vmatpush3.msra.mxu0 %v625_v30 }
  0xce   : > { %6340 = vmatprep.subr.mxu1 %v8960_v1  ;;  %6303 = vmatprep.subr.mxu0 %v8960_v1 }
  0xcf   : > { %6341 = vmatpush3.msra.mxu1 %v9363_v29  ;;  %6304 = vmatpush3.msra.mxu0 %v624_v32 }
  0xd0   : > { %6343 = vmatmul.mubr.f32.vlgmr.msra.gmra.mxu1 %v9369_v31  ;;  %6380 = vmatprep.subr.mxu1 %v8960_v1 }
  0xd1   : > { %6305 = vmatprep.subr.mxu0 %v8960_v1  ;;  %6381 = vmatpush3.msra.mxu1 %v9288_v0 }
  0xd2   : > { %6306 = vmatpush3.msra.mxu0 %v623_v33  ;;  %6382 = vmatprep.subr.mxu1 %v8960_v1 }
  0xd3   : > { %6308 = vmatmul.mubr.f32.vlgmr.msra.gmra.mxu0 %v622_v34  ;;  %6345 = vmatprep.subr.mxu0 %v8960_v1  ;;  %v1161_v34 = vstv %s9526_s23  ;;  %s2479_s23 = smul.f32 0.16666667, %s10227_s0 }
  0xd4   : > { %6346 = vmatpush3.msra.mxu0 %v9380_v35  ;;  %6377 = vmatprep.mubr.msk.f32.mxu0 %vm8961_vm0, %v8960_v1 }
  0xd5   : > { %6347 = vmatprep.subr.mxu0 %v8960_v1  ;;  %6383 = vmatpush3.msra.mxu1 %v9291_v2 }
  0xd6   : > { %6348 = vmatpush3.msra.mxu0 %v9385_v36  ;;  %6384 = vmatprep.subr.mxu1 %v8960_v1 }
  0xd7   : > { %6349 = vmatprep.subr.mxu0 %v8960_v1  ;;  %6385 = vmatpush3.msra.mxu1 %v9298_v3 }
  0xd8   : > { %6350 = vmatpush3.msra.mxu0 %v9391_v37  ;;  %6386 = vmatprep.subr.mxu1 %v8960_v1 }
  0xd9   : > { %6351 = vmatprep.subr.mxu0 %v8960_v1  ;;  %6387 = vmatpush3.msra.mxu1 %v9304_v4 }
  0xda   : > { %6352 = vmatpush3.msra.mxu0 %v9397_v38  ;;  %6388 = vmatprep.subr.mxu1 %v8960_v1 }
  0xdb   : > { %6353 = vmatprep.subr.mxu0 %v8960_v1  ;;  %6389 = vmatpush3.msra.mxu1 %v9308_v7 }
  0xdc   : > { %6354 = vmatpush3.msra.mxu0 %v9403_v39  ;;  %6390 = vmatprep.subr.mxu1 %v8960_v1 }
  0xdd   : > { %6355 = vmatprep.subr.mxu0 %v8960_v1  ;;  %6391 = vmatpush3.msra.mxu1 %v9313_v9 }
  0xde   : > { %6356 = vmatpush3.msra.mxu0 %v9409_v40  ;;  %6392 = vmatprep.subr.mxu1 %v8960_v1 }
  0xdf   : > { %6357 = vmatprep.subr.mxu0 %v8960_v1  ;;  %6393 = vmatpush3.msra.mxu1 %v9318_v11 }
  0xe0   : > { %6358 = vmatpush3.msra.mxu0 %v9415_v41  ;;  %6394 = vmatprep.subr.mxu1 %v8960_v1 }
  0xe1   : > { %6359 = vmatprep.subr.mxu0 %v8960_v1  ;;  %6395 = vmatpush3.msra.mxu1 %v9323_v13 }
  0xe2   : > { %6396 = vmatprep.subr.mxu1 %v8960_v1  ;;  %6412 = vmatprep.mubr.msk.f32.mxu1 %vm8961_vm0, %v8960_v1 }
  0xe3   : > { %6397 = vmatpush3.msra.mxu1 %v9328_v15  ;;  %6360 = vmatpush3.msra.mxu0 %v9445_v42 }
  0xe4   : > { %6398 = vmatprep.subr.mxu1 %v8960_v1  ;;  %6361 = vmatprep.subr.mxu0 %v8960_v1 }
  0xe5   : > { %6399 = vmatpush3.msra.mxu1 %v9333_v17  ;;  %6362 = vmatpush3.msra.mxu0 %v9449_v43 }
  0xe6   : > { %6400 = vmatprep.subr.mxu1 %v8960_v1  ;;  %6363 = vmatprep.subr.mxu0 %v8960_v1 }
  0xe7   : > { %6401 = vmatpush3.msra.mxu1 %v9338_v19  ;;  %6364 = vmatpush3.msra.mxu0 %v9453_v44 }
  0xe8   : > { %6402 = vmatprep.subr.mxu1 %v8960_v1  ;;  %6365 = vmatprep.subr.mxu0 %v8960_v1 }
  0xe9   : > { %6403 = vmatpush3.msra.mxu1 %v9343_v21  ;;  %6366 = vmatpush3.msra.mxu0 %v9455_v45 }
  0xea   : > { %6404 = vmatprep.subr.mxu1 %v8960_v1  ;;  %6367 = vmatprep.subr.mxu0 %v8960_v1 }
  0xeb   : > { %6405 = vmatpush3.msra.mxu1 %v9348_v23  ;;  %6368 = vmatpush3.msra.mxu0 %v9459_v46 }
  0xec   : > { %6406 = vmatprep.subr.mxu1 %v8960_v1  ;;  %6369 = vmatprep.subr.mxu0 %v8960_v1 }
  0xed   : > { %6407 = vmatpush3.msra.mxu1 %v9353_v25  ;;  %6370 = vmatpush3.msra.mxu0 %v9463_v47 }
  0xee   : > { %6408 = vmatprep.subr.mxu1 %v8960_v1  ;;  %6371 = vmatprep.subr.mxu0 %v8960_v1 }
  0xef   : > { %6409 = vmatpush3.msra.mxu1 %v9358_v27  ;;  %6372 = vmatpush3.msra.mxu0 %v9467_v48 }
  0xf0   : > { %6410 = vmatprep.subr.mxu1 %v8960_v1  ;;  %6373 = vmatprep.subr.mxu0 %v8960_v1 }
  0xf1   : > { %6411 = vmatpush3.msra.mxu1 %v9363_v29  ;;  %6374 = vmatpush3.msra.mxu0 %v9471_v49 }
  0xf2   : > { %6450 = vmatprep.subr.mxu1 %v8960_v1  ;;  %6375 = vmatprep.subr.mxu0 %v8960_v1 }
  0xf3   : > { %6376 = vmatpush3.msra.mxu0 %v9475_v50 }
  0xf4   : > { %6415 = vmatprep.subr.mxu0 %v8960_v1 }
 0x190   : > { %v792_v52 = vpop.f32.mrf.mxu1 }
 0x191   : > { %v793_v53 = vadd.f32 %v9484_v51, %v792_v52 }
 0x192   : > { %v6344_v54 = vpop.f32.mrf.mxu1 }
 0x193   : > { %8461 = vtanh.f32 %v793_v53  ;;  %v9487_v55 = vpop.f32.mrf.mxu0 }
 0x195   : > { %v6309_v56 = vpop.f32.mrf.mxu0 }
 0x1a0   : > { %v8462_v57 = vpop.eup %8461 }
 0x1a1   : > { %6378 = vmatmul.mubr.f32.vlgmr.msra.gmra.mxu0 %v8462_v57 }
 0x1a2   : > { %6416 = vmatpush3.msra.mxu0 %v9380_v35  ;;  %6447 = vmatprep.mubr.msk.f32.mxu0 %vm8961_vm0, %v8960_v1 }
 0x1a3   : > { %6417 = vmatprep.subr.mxu0 %v8960_v1 }
 0x1a4   : > { %6418 = vmatpush3.msra.mxu0 %v9385_v36 }
 0x1a5   : > { %6419 = vmatprep.subr.mxu0 %v8960_v1 }
 0x1a6   : > { %6420 = vmatpush3.msra.mxu0 %v9391_v37 }
 0x1a7   : > { %6421 = vmatprep.subr.mxu0 %v8960_v1 }
 0x1a8   : > { %6422 = vmatpush3.msra.mxu0 %v9397_v38 }
 0x1a9   : > { %6423 = vmatprep.subr.mxu0 %v8960_v1 }
 0x1aa   : > { %6424 = vmatpush3.msra.mxu0 %v9403_v39 }
 0x1ab   : > { %6425 = vmatprep.subr.mxu0 %v8960_v1 }
 0x1ac   : > { %6426 = vmatpush3.msra.mxu0 %v9409_v40 }
 0x1ad   : > { %6427 = vmatprep.subr.mxu0 %v8960_v1 }
 0x1ae   : > { %6428 = vmatpush3.msra.mxu0 %v9415_v41 }
 0x1af   : > { %6429 = vmatprep.subr.mxu0 %v8960_v1 }
 0x1b0   : > { %6430 = vmatpush3.msra.mxu0 %v9445_v42 }
 0x1b1   : > { %6431 = vmatprep.subr.mxu0 %v8960_v1 }
 0x1b2   : > { %6432 = vmatpush3.msra.mxu0 %v9449_v43 }
 0x1b3   : > { %6433 = vmatprep.subr.mxu0 %v8960_v1 }
 0x1b4   : > { %6434 = vmatpush3.msra.mxu0 %v9453_v44 }
 0x1b5   : > { %6435 = vmatprep.subr.mxu0 %v8960_v1 }
 0x1b6   : > { %6436 = vmatpush3.msra.mxu0 %v9455_v45 }
 0x1b7   : > { %6437 = vmatprep.subr.mxu0 %v8960_v1 }
 0x1b8   : > { %6438 = vmatpush3.msra.mxu0 %v9459_v46 }
 0x1b9   : > { %6439 = vmatprep.subr.mxu0 %v8960_v1 }
 0x1ba   : > { %6440 = vmatpush3.msra.mxu0 %v9463_v47 }
 0x1bb   : > { %6441 = vmatprep.subr.mxu0 %v8960_v1 }
 0x1bc   : > { %6442 = vmatpush3.msra.mxu0 %v9467_v48 }
 0x1bd   : > { %6443 = vmatprep.subr.mxu0 %v8960_v1 }
 0x1be   : > { %6444 = vmatpush3.msra.mxu0 %v9471_v49 }
 0x1bf   : > { %6445 = vmatprep.subr.mxu0 %v8960_v1 }
 0x1c0   : > { %6446 = vmatpush3.msra.mxu0 %v9475_v50 }
 0x1c1   : > { %6485 = vmatprep.subr.mxu0 %v8960_v1 }
 0x261   : > { %v869_v59 = vpop.f32.mrf.mxu0 }
 0x262   : > { %v9537_v61 = vadd.f32 %v9532_v58, %v869_v59 }
 0x263   : > { %v6379_v62 = vpop.f32.mrf.mxu0 }
 0x264   : > { %v875_v63 = vmul.f32 %v9534_v60, %v9537_v61 }
 0x266   : > { %v876_v5 = vadd.f32 %v875_v63, %v9369_v31 }
 0x268   : > { %6413 = vmatmul.mubr.f32.vlgmr.msra.gmra.mxu1 %v876_v5 }
 0x269   : > { %6451 = vmatpush3.msra.mxu1 %v9288_v0  ;;  %6482 = vmatprep.mubr.msk.f32.mxu1 %vm8961_vm0, %v8960_v1 }
 0x26a   : > { %6452 = vmatprep.subr.mxu1 %v8960_v1 }
 0x26b   : > { %6453 = vmatpush3.msra.mxu1 %v9291_v2 }
 0x26c   : > { %6454 = vmatprep.subr.mxu1 %v8960_v1 }
 0x26d   : > { %6455 = vmatpush3.msra.mxu1 %v9298_v3 }
 0x26e   : > { %6456 = vmatprep.subr.mxu1 %v8960_v1 }
 0x26f   : > { %6457 = vmatpush3.msra.mxu1 %v9304_v4 }
 0x270   : > { %6458 = vmatprep.subr.mxu1 %v8960_v1 }
 0x271   : > { %6459 = vmatpush3.msra.mxu1 %v9308_v7 }
 0x272   : > { %6460 = vmatprep.subr.mxu1 %v8960_v1 }
 0x273   : > { %6461 = vmatpush3.msra.mxu1 %v9313_v9 }
 0x274   : > { %6462 = vmatprep.subr.mxu1 %v8960_v1 }
 0x275   : > { %6463 = vmatpush3.msra.mxu1 %v9318_v11 }
 0x276   : > { %6464 = vmatprep.subr.mxu1 %v8960_v1 }
 0x277   : > { %6465 = vmatpush3.msra.mxu1 %v9323_v13 }
 0x278   : > { %6466 = vmatprep.subr.mxu1 %v8960_v1 }
 0x279   : > { %6467 = vmatpush3.msra.mxu1 %v9328_v15 }
 0x27a   : > { %6468 = vmatprep.subr.mxu1 %v8960_v1 }
 0x27b   : > { %6469 = vmatpush3.msra.mxu1 %v9333_v17 }
 0x27c   : > { %6470 = vmatprep.subr.mxu1 %v8960_v1 }
 0x27d   : > { %6471 = vmatpush3.msra.mxu1 %v9338_v19 }
 0x27e   : > { %6472 = vmatprep.subr.mxu1 %v8960_v1 }
 0x27f   : > { %6473 = vmatpush3.msra.mxu1 %v9343_v21 }
 0x280   : > { %6474 = vmatprep.subr.mxu1 %v8960_v1 }
 0x281   : > { %6475 = vmatpush3.msra.mxu1 %v9348_v23 }
 0x282   : > { %6476 = vmatprep.subr.mxu1 %v8960_v1 }
 0x283   : > { %6477 = vmatpush3.msra.mxu1 %v9353_v25 }
 0x284   : > { %6478 = vmatprep.subr.mxu1 %v8960_v1 }
 0x285   : > { %6479 = vmatpush3.msra.mxu1 %v9358_v27 }
 0x286   : > { %6480 = vmatprep.subr.mxu1 %v8960_v1 }
 0x287   : > { %6481 = vmatpush3.msra.mxu1 %v9363_v29 }
 0x288   : > { %6520 = vmatprep.subr.mxu1 %v8960_v1 }
 0x328   : > { %v943_v6 = vpop.f32.mrf.mxu1 }
 0x329   : > { %v944_v8 = vadd.f32 %v9484_v51, %v943_v6 }
 0x32a   : > { %v6414_v10 = vpop.f32.mrf.mxu1 }
 0x32b   : > { %8463 = vtanh.f32 %v944_v8  ;;  %v1313_v10 = vstv %s1307_s20 }
 0x338   : > { %v8464_v12 = vpop.eup %8463 }
 0x339   : > { %6448 = vmatmul.mubr.f32.vlgmr.msra.gmra.mxu0 %v8464_v12 }
 0x33a   : > { %6486 = vmatpush3.msra.mxu0 %v9380_v35  ;;  %6517 = vmatprep.mubr.msk.f32.mxu0 %vm8961_vm0, %v8960_v1 }
 0x33b   : > { %6487 = vmatprep.subr.mxu0 %v8960_v1 }
 0x33c   : > { %6488 = vmatpush3.msra.mxu0 %v9385_v36 }
 0x33d   : > { %6489 = vmatprep.subr.mxu0 %v8960_v1 }
 0x33e   : > { %6490 = vmatpush3.msra.mxu0 %v9391_v37 }
 0x33f   : > { %6491 = vmatprep.subr.mxu0 %v8960_v1 }
 0x340   : > { %6492 = vmatpush3.msra.mxu0 %v9397_v38 }
 0x341   : > { %6493 = vmatprep.subr.mxu0 %v8960_v1 }
 0x342   : > { %6494 = vmatpush3.msra.mxu0 %v9403_v39 }
 0x343   : > { %6495 = vmatprep.subr.mxu0 %v8960_v1 }
 0x344   : > { %6496 = vmatpush3.msra.mxu0 %v9409_v40 }
 0x345   : > { %6497 = vmatprep.subr.mxu0 %v8960_v1 }
 0x346   : > { %6498 = vmatpush3.msra.mxu0 %v9415_v41 }
 0x347   : > { %6499 = vmatprep.subr.mxu0 %v8960_v1 }
 0x348   : > { %6500 = vmatpush3.msra.mxu0 %v9445_v42 }
 0x349   : > { %6501 = vmatprep.subr.mxu0 %v8960_v1 }
 0x34a   : > { %6502 = vmatpush3.msra.mxu0 %v9449_v43 }
 0x34b   : > { %6503 = vmatprep.subr.mxu0 %v8960_v1 }
 0x34c   : > { %6504 = vmatpush3.msra.mxu0 %v9453_v44 }
 0x34d   : > { %6505 = vmatprep.subr.mxu0 %v8960_v1 }
 0x34e   : > { %6506 = vmatpush3.msra.mxu0 %v9455_v45 }
 0x34f   : > { %6507 = vmatprep.subr.mxu0 %v8960_v1 }
 0x350   : > { %6508 = vmatpush3.msra.mxu0 %v9459_v46 }
 0x351   : > { %6509 = vmatprep.subr.mxu0 %v8960_v1 }
 0x352   : > { %6510 = vmatpush3.msra.mxu0 %v9463_v47 }
 0x353   : > { %6511 = vmatprep.subr.mxu0 %v8960_v1 }
 0x354   : > { %6512 = vmatpush3.msra.mxu0 %v9467_v48 }
 0x355   : > { %6513 = vmatprep.subr.mxu0 %v8960_v1 }
 0x356   : > { %6514 = vmatpush3.msra.mxu0 %v9471_v49 }
 0x357   : > { %6515 = vmatprep.subr.mxu0 %v8960_v1 }
 0x358   : > { %6516 = vmatpush3.msra.mxu0 %v9475_v50 }
 0x359   : > { %6555 = vmatprep.subr.mxu0 %v8960_v1 }
 0x3f9   : > { %v1014_v14 = vpop.f32.mrf.mxu0 }
 0x3fa   : > { %v9612_v16 = vadd.f32 %v9532_v58, %v1014_v14 }
 0x3fb   : > { %v6449_v18 = vpop.f32.mrf.mxu0 }
 0x3fc   : > { %v1018_v20 = vmul.f32 %v9612_v16, %v9534_v60  ;;  %v1308_v32 = vmul.f32 2.0, %v9612_v16 }
 0x3fe   : > { %v1019_v22 = vadd.f32 %v1018_v20, %v9369_v31  ;;  %v1309_v54 = vadd.f32 %v1308_v32, %v9537_v61  ;;  %v9883_v20 = vld [vmem:[#allocation9 + $0x40] sm:$0xff]  ;;  %v9907_v32 = vld [vmem:[#allocation9 + $0x10] sm:$0xff] }
 0x400   : > { %6483 = vmatmul.mubr.f32.vlgmr.msra.gmra.mxu1 %v1019_v22  ;;  %v9887_v22 = vld [vmem:[#allocation9 + $0x38] sm:$0xff] }
 0x401   : > { %6521 = vmatpush3.msra.mxu1 %v9288_v0  ;;  %6552 = vmatprep.mubr.msk.f32.mxu1 %vm8961_vm0, %v8960_v1 }
 0x402   : > { %6522 = vmatprep.subr.mxu1 %v8960_v1 }
 0x403   : > { %6523 = vmatpush3.msra.mxu1 %v9291_v2 }
 0x404   : > { %6524 = vmatprep.subr.mxu1 %v8960_v1 }
 0x405   : > { %6525 = vmatpush3.msra.mxu1 %v9298_v3 }
 0x406   : > { %6526 = vmatprep.subr.mxu1 %v8960_v1 }
 0x407   : > { %6527 = vmatpush3.msra.mxu1 %v9304_v4 }
 0x408   : > { %6528 = vmatprep.subr.mxu1 %v8960_v1 }
 0x409   : > { %6529 = vmatpush3.msra.mxu1 %v9308_v7 }
 0x40a   : > { %6530 = vmatprep.subr.mxu1 %v8960_v1 }
 0x40b   : > { %6531 = vmatpush3.msra.mxu1 %v9313_v9 }
 0x40c   : > { %6532 = vmatprep.subr.mxu1 %v8960_v1 }
 0x40d   : > { %6533 = vmatpush3.msra.mxu1 %v9318_v11 }
 0x40e   : > { %6534 = vmatprep.subr.mxu1 %v8960_v1 }
 0x40f   : > { %6535 = vmatpush3.msra.mxu1 %v9323_v13 }
 0x410   : > { %6536 = vmatprep.subr.mxu1 %v8960_v1 }
 0x411   : > { %6537 = vmatpush3.msra.mxu1 %v9328_v15 }
 0x412   : > { %6538 = vmatprep.subr.mxu1 %v8960_v1 }
 0x413   : > { %6539 = vmatpush3.msra.mxu1 %v9333_v17 }
 0x414   : > { %6540 = vmatprep.subr.mxu1 %v8960_v1 }
 0x415   : > { %6541 = vmatpush3.msra.mxu1 %v9338_v19 }
 0x416   : > { %6542 = vmatprep.subr.mxu1 %v8960_v1 }
 0x417   : > { %6543 = vmatpush3.msra.mxu1 %v9343_v21 }
 0x418   : > { %6544 = vmatprep.subr.mxu1 %v8960_v1 }
 0x419   : > { %6545 = vmatpush3.msra.mxu1 %v9348_v23 }
 0x41a   : > { %6546 = vmatprep.subr.mxu1 %v8960_v1 }
 0x41b   : > { %6547 = vmatpush3.msra.mxu1 %v9353_v25 }
 0x41c   : > { %6548 = vmatprep.subr.mxu1 %v8960_v1 }
 0x41d   : > { %6549 = vmatpush3.msra.mxu1 %v9358_v27 }
 0x41e   : > { %6550 = vmatprep.subr.mxu1 %v8960_v1 }
 0x41f   : > { %6551 = vmatpush3.msra.mxu1 %v9363_v29 }
 0x420   : > { %6590 = vmatprep.subr.mxu1 %v8960_v1 }
 0x4c0   : > { %v1086_v24 = vpop.f32.mrf.mxu1 }
 0x4c1   : > { %v1087_v26 = vadd.f32 %v9484_v51, %v1086_v24  ;;  %v9891_v24 = vld [vmem:[#allocation9 + $0x30] sm:$0xff] }
 0x4c2   : > { %v6484_v28 = vpop.f32.mrf.mxu1 }
 0x4c3   : > { %8465 = vtanh.f32 %v1087_v26  ;;  %v9895_v26 = vld [vmem:[#allocation9 + $0x28] sm:$0xff]  ;;  %v9899_v28 = vld [vmem:[#allocation9 + $0x20] sm:$0xff] }
 0x4d0   : > { %v8466_v30 = vpop.eup %8465 }
 0x4d1   : > { %6518 = vmatmul.mubr.f32.vlgmr.msra.gmra.mxu0 %v8466_v30  ;;  %v9903_v30 = vld [vmem:[#allocation9 + $0x18] sm:$0xff] }
 0x4d2   : > { %6556 = vmatpush3.msra.mxu0 %v9380_v35  ;;  %6587 = vmatprep.mubr.msk.f32.mxu0 %vm8961_vm0, %v8960_v1 }
 0x4d3   : > { %6557 = vmatprep.subr.mxu0 %v8960_v1 }
 0x4d4   : > { %6558 = vmatpush3.msra.mxu0 %v9385_v36 }
 0x4d5   : > { %6559 = vmatprep.subr.mxu0 %v8960_v1 }
 0x4d6   : > { %6560 = vmatpush3.msra.mxu0 %v9391_v37 }
 0x4d7   : > { %6561 = vmatprep.subr.mxu0 %v8960_v1 }
 0x4d8   : > { %6562 = vmatpush3.msra.mxu0 %v9397_v38 }
 0x4d9   : > { %6563 = vmatprep.subr.mxu0 %v8960_v1 }
 0x4da   : > { %6564 = vmatpush3.msra.mxu0 %v9403_v39 }
 0x4db   : > { %6565 = vmatprep.subr.mxu0 %v8960_v1 }
 0x4dc   : > { %6566 = vmatpush3.msra.mxu0 %v9409_v40 }
 0x4dd   : > { %6567 = vmatprep.subr.mxu0 %v8960_v1 }
 0x4de   : > { %6568 = vmatpush3.msra.mxu0 %v9415_v41 }
 0x4df   : > { %6569 = vmatprep.subr.mxu0 %v8960_v1 }
 0x4e0   : > { %6570 = vmatpush3.msra.mxu0 %v9445_v42 }
 0x4e1   : > { %6571 = vmatprep.subr.mxu0 %v8960_v1 }
 0x4e2   : > { %6572 = vmatpush3.msra.mxu0 %v9449_v43 }
 0x4e3   : > { %6573 = vmatprep.subr.mxu0 %v8960_v1 }
 0x4e4   : > { %6574 = vmatpush3.msra.mxu0 %v9453_v44 }
 0x4e5   : > { %6575 = vmatprep.subr.mxu0 %v8960_v1 }
 0x4e6   : > { %6576 = vmatpush3.msra.mxu0 %v9455_v45 }
 0x4e7   : > { %6577 = vmatprep.subr.mxu0 %v8960_v1 }
 0x4e8   : > { %6578 = vmatpush3.msra.mxu0 %v9459_v46 }
 0x4e9   : > { %6579 = vmatprep.subr.mxu0 %v8960_v1 }
 0x4ea   : > { %6580 = vmatpush3.msra.mxu0 %v9463_v47 }
 0x4eb   : > { %6581 = vmatprep.subr.mxu0 %v8960_v1 }
 0x4ec   : > { %6582 = vmatpush3.msra.mxu0 %v9467_v48 }
 0x4ed   : > { %6583 = vmatprep.subr.mxu0 %v8960_v1 }
 0x4ee   : > { %6584 = vmatpush3.msra.mxu0 %v9471_v49 }
 0x4ef   : > { %6585 = vmatprep.subr.mxu0 %v8960_v1 }
 0x4f0   : > { %6586 = vmatpush3.msra.mxu0 %v9475_v50 }
 0x4f1   : > { %6625 = vmatprep.subr.mxu0 %v8960_v1 }
 0x591   : > { %v1157_v33 = vpop.f32.mrf.mxu0 }
 0x592   : > { %v1158_v52 = vadd.f32 %v9532_v58, %v1157_v33  ;;  %v9911_v33 = vld [vmem:[#allocation9 + $0x8] sm:$0xff] }
 0x593   : > { %v6519_v53 = vpop.f32.mrf.mxu0 }
 0x594   : > { %v1162_v56 = vmul.f32 %v1161_v34, %v1158_v52  ;;  %v1310_v57 = vmul.f32 2.0, %v1158_v52  ;;  %v9915_v34 = vld [vmem:[#allocation9] sm:$0xff] }
 0x596   : > { %v1163_v59 = vadd.f32 %v1162_v56, %v9369_v31  ;;  %v9691_v60 = vadd.f32 %v1310_v57, %v1309_v54  ;;  %v10029_v57 = vld [vmem:[#allocation10 + $0x38] sm:$0xff] }
 0x598   : > { %6553 = vmatmul.mubr.f32.vlgmr.msra.gmra.mxu1 %v1163_v59  ;;  %v10033_v59 = vld [vmem:[#allocation10 + $0x30] sm:$0xff] }
 0x599   : > { %6591 = vmatpush3.msra.mxu1 %v9288_v0  ;;  %6622 = vmatprep.mubr.msk.f32.mxu1 %vm8961_vm0, %v8960_v1 }
 0x59a   : > { %6592 = vmatprep.subr.mxu1 %v8960_v1 }
 0x59b   : > { %6593 = vmatpush3.msra.mxu1 %v9291_v2 }
 0x59c   : > { %6594 = vmatprep.subr.mxu1 %v8960_v1 }
 0x59d   : > { %6595 = vmatpush3.msra.mxu1 %v9298_v3 }
 0x59e   : > { %6596 = vmatprep.subr.mxu1 %v8960_v1 }
 0x59f   : > { %6597 = vmatpush3.msra.mxu1 %v9304_v4 }
 0x5a0   : > { %6598 = vmatprep.subr.mxu1 %v8960_v1 }
 0x5a1   : > { %6599 = vmatpush3.msra.mxu1 %v9308_v7 }
 0x5a2   : > { %6600 = vmatprep.subr.mxu1 %v8960_v1 }
 0x5a3   : > { %6601 = vmatpush3.msra.mxu1 %v9313_v9 }
 0x5a4   : > { %6602 = vmatprep.subr.mxu1 %v8960_v1 }
 0x5a5   : > { %6603 = vmatpush3.msra.mxu1 %v9318_v11 }
 0x5a6   : > { %6604 = vmatprep.subr.mxu1 %v8960_v1 }
 0x5a7   : > { %6605 = vmatpush3.msra.mxu1 %v9323_v13 }
 0x5a8   : > { %6606 = vmatprep.subr.mxu1 %v8960_v1 }
 0x5a9   : > { %6607 = vmatpush3.msra.mxu1 %v9328_v15 }
 0x5aa   : > { %6608 = vmatprep.subr.mxu1 %v8960_v1 }
 0x5ab   : > { %6609 = vmatpush3.msra.mxu1 %v9333_v17 }
 0x5ac   : > { %6610 = vmatprep.subr.mxu1 %v8960_v1 }
 0x5ad   : > { %6611 = vmatpush3.msra.mxu1 %v9338_v19 }
 0x5ae   : > { %6612 = vmatprep.subr.mxu1 %v8960_v1 }
 0x5af   : > { %6613 = vmatpush3.msra.mxu1 %v9343_v21 }
 0x5b0   : > { %6614 = vmatprep.subr.mxu1 %v8960_v1 }
 0x5b1   : > { %6615 = vmatpush3.msra.mxu1 %v9348_v23 }
 0x5b2   : > { %6616 = vmatprep.subr.mxu1 %v8960_v1 }
 0x5b3   : > { %6617 = vmatpush3.msra.mxu1 %v9353_v25 }
 0x5b4   : > { %6618 = vmatprep.subr.mxu1 %v8960_v1 }
 0x5b5   : > { %6619 = vmatpush3.msra.mxu1 %v9358_v27 }
 0x5b6   : > { %6620 = vmatprep.subr.mxu1 %v8960_v1 }
 0x5b7   : > { %6621 = vmatpush3.msra.mxu1 %v9363_v29 }
 0x5b8   : > { %6660 = vmatprep.subr.mxu1 %v8960_v1 }
 0x658   : > { %v1230_v61 = vpop.f32.mrf.mxu1 }
 0x659   : > { %v1231_v62 = vadd.f32 %v9484_v51, %v1230_v61  ;;  %v10041_v61 = vld [vmem:[#allocation10 + $0x20] sm:$0xff] }
 0x65a   : > { %v6554_v63 = vpop.f32.mrf.mxu1 }
 0x65b   : > { %8467 = vtanh.f32 %v1231_v62  ;;  %v10045_v62 = vld [vmem:[#allocation10 + $0x18] sm:$0xff]  ;;  %v10049_v63 = vld [vmem:[#allocation10 + $0x10] sm:$0xff] }
 0x668   : > { %v8468_v5 = vpop.eup %8467 }
 0x669   : > { %6588 = vmatmul.mubr.f32.vlgmr.msra.gmra.mxu0 %v8468_v5  ;;  %v10053_v5 = vld [vmem:[#allocation10 + $0x8] sm:$0xff] }
 0x66a   : > { %6626 = vmatpush3.msra.mxu0 %v9380_v35  ;;  %6657 = vmatprep.mubr.msk.f32.mxu0 %vm8961_vm0, %v8960_v1 }
 0x66b   : > { %6627 = vmatprep.subr.mxu0 %v8960_v1 }
 0x66c   : > { %6628 = vmatpush3.msra.mxu0 %v9385_v36 }
 0x66d   : > { %6629 = vmatprep.subr.mxu0 %v8960_v1 }
 0x66e   : > { %6630 = vmatpush3.msra.mxu0 %v9391_v37 }
 0x66f   : > { %6631 = vmatprep.subr.mxu0 %v8960_v1 }
 0x670   : > { %6632 = vmatpush3.msra.mxu0 %v9397_v38 }
 0x671   : > { %6633 = vmatprep.subr.mxu0 %v8960_v1 }
 0x672   : > { %6634 = vmatpush3.msra.mxu0 %v9403_v39 }
 0x673   : > { %6635 = vmatprep.subr.mxu0 %v8960_v1 }
 0x674   : > { %6636 = vmatpush3.msra.mxu0 %v9409_v40 }
 0x675   : > { %6637 = vmatprep.subr.mxu0 %v8960_v1 }
 0x676   : > { %6638 = vmatpush3.msra.mxu0 %v9415_v41 }
 0x677   : > { %6639 = vmatprep.subr.mxu0 %v8960_v1 }
 0x678   : > { %6640 = vmatpush3.msra.mxu0 %v9445_v42 }
 0x679   : > { %6641 = vmatprep.subr.mxu0 %v8960_v1 }
 0x67a   : > { %6642 = vmatpush3.msra.mxu0 %v9449_v43 }
 0x67b   : > { %6643 = vmatprep.subr.mxu0 %v8960_v1 }
 0x67c   : > { %6644 = vmatpush3.msra.mxu0 %v9453_v44 }
 0x67d   : > { %6645 = vmatprep.subr.mxu0 %v8960_v1 }
 0x67e   : > { %6646 = vmatpush3.msra.mxu0 %v9455_v45 }
 0x67f   : > { %6647 = vmatprep.subr.mxu0 %v8960_v1 }
 0x680   : > { %6648 = vmatpush3.msra.mxu0 %v9459_v46 }
 0x681   : > { %6649 = vmatprep.subr.mxu0 %v8960_v1 }
 0x682   : > { %6650 = vmatpush3.msra.mxu0 %v9463_v47 }
 0x683   : > { %6651 = vmatprep.subr.mxu0 %v8960_v1 }
 0x684   : > { %6652 = vmatpush3.msra.mxu0 %v9467_v48 }
 0x685   : > { %6653 = vmatprep.subr.mxu0 %v8960_v1 }
 0x686   : > { %6654 = vmatpush3.msra.mxu0 %v9471_v49 }
 0x687   : > { %6655 = vmatprep.subr.mxu0 %v8960_v1 }
 0x688   : > { %6656 = vmatpush3.msra.mxu0 %v9475_v50 }
 0x689   : > { %6695 = vmatprep.subr.mxu0 %v8960_v1 }
 0x729   : > { %v1301_v6 = vpop.f32.mrf.mxu0 }
 0x72a   : > { %v1302_v8 = vadd.f32 %v9532_v58, %v1301_v6  ;;  %v10057_v6 = vld [vmem:[#allocation10] sm:$0xff] }
 0x72b   : > { %v6589_v12 = vpop.f32.mrf.mxu0 }
 0x72c   : > { %v1312_v14 = vadd.f32 %v9691_v60, %v1302_v8  ;;  %v10037_v60 = vld [vmem:[#allocation10 + $0x28] sm:$0xff]  ;;  %v1747_v12 = vstv %s9842_s21  ;;  %s11616_s21 = ssub.f32 %s5264_s19, %s11294_s3 }
 0x72e   : > { %v1314_v16 = vmul.f32 %v1313_v10, %v1312_v14 }
 0x730   : > { %v9766_v18 = vadd.f32 %v1314_v16, %v9369_v31  ;;  %v9879_v31 = vld [vmem:[#allocation9 + $0x48] sm:$0xff] }
 0x732   : > { %6623 = vmatmul.mubr.f32.vlgmr.msra.gmra.mxu1 %v9766_v18 }
 0x733   : > { %6661 = vmatpush3.msra.mxu1 %v9288_v0  ;;  %6692 = vmatprep.mubr.msk.f32.mxu1 %vm8961_vm0, %v8960_v1 }
 0x734   : > { %6662 = vmatprep.subr.mxu1 %v8960_v1 }
 0x735   : > { %6663 = vmatpush3.msra.mxu1 %v9291_v2 }
 0x736   : > { %6664 = vmatprep.subr.mxu1 %v8960_v1 }
 0x737   : > { %6665 = vmatpush3.msra.mxu1 %v9298_v3 }
 0x738   : > { %6666 = vmatprep.subr.mxu1 %v8960_v1 }
 0x739   : > { %6667 = vmatpush3.msra.mxu1 %v9304_v4 }
 0x73a   : > { %6668 = vmatprep.subr.mxu1 %v8960_v1 }
 0x73b   : > { %6669 = vmatpush3.msra.mxu1 %v9308_v7 }
 0x73c   : > { %6670 = vmatprep.subr.mxu1 %v8960_v1 }
 0x73d   : > { %6671 = vmatpush3.msra.mxu1 %v9313_v9  ;;  %v9845_v9 = vstv %s1459_s17  ;;  %s4389_s17 = smul.f32 0.5, %s11616_s21 }
 0x73e   : > { %6672 = vmatprep.subr.mxu1 %v8960_v1 }
 0x73f   : > { %6673 = vmatpush3.msra.mxu1 %v9318_v11 }
 0x740   : > { %6674 = vmatprep.subr.mxu1 %v8960_v1 }
 0x741   : > { %6675 = vmatpush3.msra.mxu1 %v9323_v13 }
 0x742   : > { %6676 = vmatprep.subr.mxu1 %v8960_v1 }
 0x743   : > { %6677 = vmatpush3.msra.mxu1 %v9328_v15 }
 0x744   : > { %6678 = vmatprep.subr.mxu1 %v8960_v1 }
 0x745   : > { %6679 = vmatpush3.msra.mxu1 %v9333_v17 }
 0x746   : > { %6680 = vmatprep.subr.mxu1 %v8960_v1 }
 0x747   : > { %6681 = vmatpush3.msra.mxu1 %v9338_v19  ;;  %v9853_v19 = vld [vmem:[#allocation9 + $0x78] sm:$0xff] }
 0x748   : > { %6682 = vmatprep.subr.mxu1 %v8960_v1 }
 0x749   : > { %6683 = vmatpush3.msra.mxu1 %v9343_v21  ;;  %v9859_v21 = vld [vmem:[#allocation9 + $0x70] sm:$0xff] }
 0x74a   : > { %6684 = vmatprep.subr.mxu1 %v8960_v1 }
 0x74b   : > { %6685 = vmatpush3.msra.mxu1 %v9348_v23  ;;  %v9863_v23 = vld [vmem:[#allocation9 + $0x68] sm:$0xff] }
 0x74c   : > { %6686 = vmatprep.subr.mxu1 %v8960_v1 }
 0x74d   : > { %6687 = vmatpush3.msra.mxu1 %v9353_v25  ;;  %v9867_v25 = vld [vmem:[#allocation9 + $0x60] sm:$0xff] }
 0x74e   : > { %6688 = vmatprep.subr.mxu1 %v8960_v1 }
 0x74f   : > { %6689 = vmatpush3.msra.mxu1 %v9358_v27  ;;  %v9871_v27 = vld [vmem:[#allocation9 + $0x58] sm:$0xff] }
 0x750   : > { %6690 = vmatprep.subr.mxu1 %v8960_v1 }
 0x751   : > { %6691 = vmatpush3.msra.mxu1 %v9363_v29  ;;  %v9875_v29 = vld [vmem:[#allocation9 + $0x50] sm:$0xff] }
 0x752   : > { %6730 = vmatprep.subr.mxu1 %v8960_v1 }
 0x7f2   : > { %v1384_v0 = vpop.f32.mrf.mxu1 }
 0x7f3   : > { %v1385_v2 = vadd.f32 %v9484_v51, %v1384_v0 }
 0x7f4   : > { %v6624_v3 = vpop.f32.mrf.mxu1 }
 0x7f5   : > { %8469 = vtanh.f32 %v1385_v2 }
 0x802   : > { %v8470_v4 = vpop.eup %8469 }
 0x803   : > { %6658 = vmatmul.mubr.f32.vlgmr.msra.gmra.mxu0 %v8470_v4 }
 0x804   : > { %6696 = vmatpush3.msra.mxu0 %v9380_v35  ;;  %6727 = vmatprep.mubr.msk.f32.mxu0 %vm8961_vm0, %v8960_v1 }
 0x805   : > { %6697 = vmatprep.subr.mxu0 %v8960_v1 }
 0x806   : > { %6698 = vmatpush3.msra.mxu0 %v9385_v36 }
 0x807   : > { %6699 = vmatprep.subr.mxu0 %v8960_v1 }
 0x808   : > { %6700 = vmatpush3.msra.mxu0 %v9391_v37 }
 0x809   : > { %6701 = vmatprep.subr.mxu0 %v8960_v1 }
 0x80a   : > { %6702 = vmatpush3.msra.mxu0 %v9397_v38 }
 0x80b   : > { %6703 = vmatprep.subr.mxu0 %v8960_v1 }
 0x80c   : > { %6704 = vmatpush3.msra.mxu0 %v9403_v39 }
 0x80d   : > { %6705 = vmatprep.subr.mxu0 %v8960_v1 }
 0x80e   : > { %6706 = vmatpush3.msra.mxu0 %v9409_v40 }
 0x80f   : > { %6707 = vmatprep.subr.mxu0 %v8960_v1 }
 0x810   : > { %6708 = vmatpush3.msra.mxu0 %v9415_v41 }
 0x811   : > { %6709 = vmatprep.subr.mxu0 %v8960_v1 }
 0x812   : > { %6710 = vmatpush3.msra.mxu0 %v9445_v42 }
 0x813   : > { %6711 = vmatprep.subr.mxu0 %v8960_v1 }
 0x814   : > { %6712 = vmatpush3.msra.mxu0 %v9449_v43 }
 0x815   : > { %6713 = vmatprep.subr.mxu0 %v8960_v1 }
 0x816   : > { %6714 = vmatpush3.msra.mxu0 %v9453_v44 }
 0x817   : > { %6715 = vmatprep.subr.mxu0 %v8960_v1 }
 0x818   : > { %6716 = vmatpush3.msra.mxu0 %v9455_v45 }
 0x819   : > { %6717 = vmatprep.subr.mxu0 %v8960_v1 }
 0x81a   : > { %6718 = vmatpush3.msra.mxu0 %v9459_v46 }
 0x81b   : > { %6719 = vmatprep.subr.mxu0 %v8960_v1 }
 0x81c   : > { %6720 = vmatpush3.msra.mxu0 %v9463_v47 }
 0x81d   : > { %6721 = vmatprep.subr.mxu0 %v8960_v1 }
 0x81e   : > { %6722 = vmatpush3.msra.mxu0 %v9467_v48 }
 0x81f   : > { %6723 = vmatprep.subr.mxu0 %v8960_v1 }
 0x820   : > { %6724 = vmatpush3.msra.mxu0 %v9471_v49 }
 0x821   : > { %6725 = vmatprep.subr.mxu0 %v8960_v1 }
 0x822   : > { %6726 = vmatpush3.msra.mxu0 %v9475_v50 }
 0x823   : > { %6765 = vmatprep.subr.mxu0 %v8960_v1 }
 0x8c3   : > { %v1455_v7 = vpop.f32.mrf.mxu0 }
 0x8c4   : > { %v9848_v11 = vadd.f32 %v9532_v58, %v1455_v7 }
 0x8c5   : > { %v6659_v13 = vpop.f32.mrf.mxu0 }
 0x8c6   : > { %v1461_v15 = vmul.f32 %v9845_v9, %v9848_v11 }
 0x8c8   : > { %v1462_v17 = vadd.f32 %v1461_v15, %v9766_v18 }
 0x8ca   : > { %6693 = vmatmul.mubr.f32.vlgmr.msra.gmra.mxu1 %v1462_v17 }
 0x8cb   : > { %6731 = vmatpush3.msra.mxu1 %v9853_v19  ;;  %6762 = vmatprep.mubr.msk.f32.mxu1 %vm8961_vm0, %v8960_v1 }
 0x8cc   : > { %6732 = vmatprep.subr.mxu1 %v8960_v1 }
 0x8cd   : > { %6733 = vmatpush3.msra.mxu1 %v9859_v21 }
 0x8ce   : > { %6734 = vmatprep.subr.mxu1 %v8960_v1 }
 0x8cf   : > { %6735 = vmatpush3.msra.mxu1 %v9863_v23 }
 0x8d0   : > { %6736 = vmatprep.subr.mxu1 %v8960_v1 }
 0x8d1   : > { %6737 = vmatpush3.msra.mxu1 %v9867_v25 }
 0x8d2   : > { %6738 = vmatprep.subr.mxu1 %v8960_v1 }
 0x8d3   : > { %6739 = vmatpush3.msra.mxu1 %v9871_v27 }
 0x8d4   : > { %6740 = vmatprep.subr.mxu1 %v8960_v1 }
 0x8d5   : > { %6741 = vmatpush3.msra.mxu1 %v9875_v29 }
 0x8d6   : > { %6742 = vmatprep.subr.mxu1 %v8960_v1 }
 0x8d7   : > { %6743 = vmatpush3.msra.mxu1 %v9879_v31 }
 0x8d8   : > { %6744 = vmatprep.subr.mxu1 %v8960_v1 }
 0x8d9   : > { %6745 = vmatpush3.msra.mxu1 %v9883_v20 }
 0x8da   : > { %6746 = vmatprep.subr.mxu1 %v8960_v1 }
 0x8db   : > { %6747 = vmatpush3.msra.mxu1 %v9887_v22 }
 0x8dc   : > { %6748 = vmatprep.subr.mxu1 %v8960_v1 }
 0x8dd   : > { %6749 = vmatpush3.msra.mxu1 %v9891_v24 }
 0x8de   : > { %6750 = vmatprep.subr.mxu1 %v8960_v1 }
 0x8df   : > { %6751 = vmatpush3.msra.mxu1 %v9895_v26 }
 0x8e0   : > { %6752 = vmatprep.subr.mxu1 %v8960_v1 }
 0x8e1   : > { %6753 = vmatpush3.msra.mxu1 %v9899_v28 }
 0x8e2   : > { %6754 = vmatprep.subr.mxu1 %v8960_v1 }
 0x8e3   : > { %6755 = vmatpush3.msra.mxu1 %v9903_v30 }
 0x8e4   : > { %6756 = vmatprep.subr.mxu1 %v8960_v1 }
 0x8e5   : > { %6757 = vmatpush3.msra.mxu1 %v9907_v32 }
 0x8e6   : > { %6758 = vmatprep.subr.mxu1 %v8960_v1 }
 0x8e7   : > { %6759 = vmatpush3.msra.mxu1 %v9911_v33 }
 0x8e8   : > { %6760 = vmatprep.subr.mxu1 %v8960_v1 }
 0x8e9   : > { %6761 = vmatpush3.msra.mxu1 %v9915_v34 }
 0x8ea   : > { %6800 = vmatprep.subr.mxu1 %v8960_v1 }
 0x98a   : > { %v1529_v52 = vpop.f32.mrf.mxu1 }
 0x98b   : > { %v1530_v53 = vadd.f32 %v9484_v51, %v1529_v52  ;;  %v10146_v52 = vld [vmem:[%s11877_s6] ss:$0 sm:$0xff] }
 0x98c   : > { %v6694_v54 = vpop.f32.mrf.mxu1 }
 0x98d   : > { %8471 = vtanh.f32 %v1530_v53  ;;  %v1899_v54 = vstv %s1893_s27  ;;  %s10923_s27 = ssub.f32 %s10919_s15, %s10566_s16  ;;  %s5021_s16 = scalar_lea.sflag [#allocation18], %s9259_s11 }
 0x98f   : > { %s3217_s22 = smul.f32 0.5, %s10923_s27 }
 0x990   : > { %s3651_s12 = smul.f32 0.16666667, %s10923_s27 }
 0x99a   : > { %v8472_v56 = vpop.eup %8471 }
 0x99b   : > { %6728 = vmatmul.mubr.f32.vlgmr.msra.gmra.mxu0 %v8472_v56 }
 0x99c   : > { %6766 = vmatpush3.msra.mxu0 %v9380_v35  ;;  %6797 = vmatprep.mubr.msk.f32.mxu0 %vm8961_vm0, %v8960_v1 }
 0x99d   : > { %6767 = vmatprep.subr.mxu0 %v8960_v1 }
 0x99e   : > { %6768 = vmatpush3.msra.mxu0 %v9385_v36 }
 0x99f   : > { %6769 = vmatprep.subr.mxu0 %v8960_v1 }
 0x9a0   : > { %6770 = vmatpush3.msra.mxu0 %v9391_v37 }
 0x9a1   : > { %6771 = vmatprep.subr.mxu0 %v8960_v1 }
 0x9a2   : > { %6772 = vmatpush3.msra.mxu0 %v9397_v38 }
 0x9a3   : > { %6773 = vmatprep.subr.mxu0 %v8960_v1 }
 0x9a4   : > { %6774 = vmatpush3.msra.mxu0 %v9403_v39 }
 0x9a5   : > { %6775 = vmatprep.subr.mxu0 %v8960_v1 }
 0x9a6   : > { %6776 = vmatpush3.msra.mxu0 %v9409_v40 }
 0x9a7   : > { %6777 = vmatprep.subr.mxu0 %v8960_v1 }
 0x9a8   : > { %6778 = vmatpush3.msra.mxu0 %v9415_v41 }
 0x9a9   : > { %6779 = vmatprep.subr.mxu0 %v8960_v1 }
 0x9aa   : > { %6780 = vmatpush3.msra.mxu0 %v9445_v42 }
 0x9ab   : > { %6781 = vmatprep.subr.mxu0 %v8960_v1 }
 0x9ac   : > { %6782 = vmatpush3.msra.mxu0 %v9449_v43 }
 0x9ad   : > { %6783 = vmatprep.subr.mxu0 %v8960_v1 }
 0x9ae   : > { %6784 = vmatpush3.msra.mxu0 %v9453_v44  ;;  %v9995_v44 = vld [vmem:[#allocation10 + $0x78] sm:$0xff] }
 0x9af   : > { %6785 = vmatprep.subr.mxu0 %v8960_v1 }
 0x9b0   : > { %6786 = vmatpush3.msra.mxu0 %v9455_v45  ;;  %v10001_v45 = vld [vmem:[#allocation10 + $0x70] sm:$0xff] }
 0x9b1   : > { %6787 = vmatprep.subr.mxu0 %v8960_v1 }
 0x9b2   : > { %6788 = vmatpush3.msra.mxu0 %v9459_v46  ;;  %v10005_v46 = vld [vmem:[#allocation10 + $0x68] sm:$0xff] }
 0x9b3   : > { %6789 = vmatprep.subr.mxu0 %v8960_v1 }
 0x9b4   : > { %6790 = vmatpush3.msra.mxu0 %v9463_v47  ;;  %v10009_v47 = vld [vmem:[#allocation10 + $0x60] sm:$0xff] }
 0x9b5   : > { %6791 = vmatprep.subr.mxu0 %v8960_v1 }
 0x9b6   : > { %6792 = vmatpush3.msra.mxu0 %v9467_v48  ;;  %v10013_v48 = vld [vmem:[#allocation10 + $0x58] sm:$0xff] }
 0x9b7   : > { %6793 = vmatprep.subr.mxu0 %v8960_v1 }
 0x9b8   : > { %6794 = vmatpush3.msra.mxu0 %v9471_v49  ;;  %v10017_v49 = vld [vmem:[#allocation10 + $0x50] sm:$0xff] }
 0x9b9   : > { %6795 = vmatprep.subr.mxu0 %v8960_v1 }
 0x9ba   : > { %6796 = vmatpush3.msra.mxu0 %v9475_v50  ;;  %v10021_v50 = vld [vmem:[#allocation10 + $0x48] sm:$0xff] }
 0x9bb   : > { %6835 = vmatprep.subr.mxu0 %v8960_v1 }
 0xa5b   : > { %v1600_v35 = vpop.f32.mrf.mxu0 }
 0xa5c   : > { %v9955_v36 = vadd.f32 %v9532_v58, %v1600_v35 }
 0xa5d   : > { %v6729_v37 = vpop.f32.mrf.mxu0 }
 0xa5e   : > { %v1604_v38 = vmul.f32 %v9955_v36, %v9845_v9  ;;  %v1894_v8 = vmul.f32 2.0, %v9955_v36  ;;  %v10105_v9 = vld [vmem:[%s11875_s4] ss:$0 sm:$0xff] }
 0xa60   : > { %v1605_v39 = vadd.f32 %v1604_v38, %v9766_v18  ;;  %v1895_v0 = vadd.f32 %v1894_v8, %v9848_v11 }
 0xa62   : > { %6763 = vmatmul.mubr.f32.vlgmr.msra.gmra.mxu1 %v1605_v39 }
 0xa63   : > { %6801 = vmatpush3.msra.mxu1 %v9853_v19  ;;  %6832 = vmatprep.mubr.msk.f32.mxu1 %vm8961_vm0, %v8960_v1 }
 0xa64   : > { %6802 = vmatprep.subr.mxu1 %v8960_v1 }
 0xa65   : > { %6803 = vmatpush3.msra.mxu1 %v9859_v21 }
 0xa66   : > { %6804 = vmatprep.subr.mxu1 %v8960_v1 }
 0xa67   : > { %6805 = vmatpush3.msra.mxu1 %v9863_v23 }
 0xa68   : > { %6806 = vmatprep.subr.mxu1 %v8960_v1 }
 0xa69   : > { %6807 = vmatpush3.msra.mxu1 %v9867_v25 }
 0xa6a   : > { %6808 = vmatprep.subr.mxu1 %v8960_v1 }
 0xa6b   : > { %6809 = vmatpush3.msra.mxu1 %v9871_v27 }
 0xa6c   : > { %6810 = vmatprep.subr.mxu1 %v8960_v1 }
 0xa6d   : > { %6811 = vmatpush3.msra.mxu1 %v9875_v29 }
 0xa6e   : > { %6812 = vmatprep.subr.mxu1 %v8960_v1 }
 0xa6f   : > { %6813 = vmatpush3.msra.mxu1 %v9879_v31 }
 0xa70   : > { %6814 = vmatprep.subr.mxu1 %v8960_v1 }
 0xa71   : > { %6815 = vmatpush3.msra.mxu1 %v9883_v20 }
 0xa72   : > { %6816 = vmatprep.subr.mxu1 %v8960_v1 }
 0xa73   : > { %6817 = vmatpush3.msra.mxu1 %v9887_v22 }
 0xa74   : > { %6818 = vmatprep.subr.mxu1 %v8960_v1 }
 0xa75   : > { %6819 = vmatpush3.msra.mxu1 %v9891_v24 }
 0xa76   : > { %6820 = vmatprep.subr.mxu1 %v8960_v1 }
 0xa77   : > { %6821 = vmatpush3.msra.mxu1 %v9895_v26 }
 0xa78   : > { %6822 = vmatprep.subr.mxu1 %v8960_v1 }
 0xa79   : > { %6823 = vmatpush3.msra.mxu1 %v9899_v28 }
 0xa7a   : > { %6824 = vmatprep.subr.mxu1 %v8960_v1 }
 0xa7b   : > { %6825 = vmatpush3.msra.mxu1 %v9903_v30 }
 0xa7c   : > { %6826 = vmatprep.subr.mxu1 %v8960_v1 }
 0xa7d   : > { %6827 = vmatpush3.msra.mxu1 %v9907_v32 }
 0xa7e   : > { %6828 = vmatprep.subr.mxu1 %v8960_v1 }
 0xa7f   : > { %6829 = vmatpush3.msra.mxu1 %v9911_v33 }
 0xa80   : > { %6830 = vmatprep.subr.mxu1 %v8960_v1 }
 0xa81   : > { %6831 = vmatpush3.msra.mxu1 %v9915_v34 }
 0xa82   : > { %6870 = vmatprep.subr.mxu1 %v8960_v1 }
 0xb22   : > { %v1672_v40 = vpop.f32.mrf.mxu1 }
 0xb23   : > { %v1673_v41 = vadd.f32 %v9484_v51, %v1672_v40  ;;  %v10025_v51 = vld [vmem:[#allocation10 + $0x40] sm:$0xff] }
 0xb24   : > { %v6764_v42 = vpop.f32.mrf.mxu1 }
 0xb25   : > { %8473 = vtanh.f32 %v1673_v41  ;;  %v10230_v42 = vstv %s2045_s7 }
 0xb32   : > { %v8474_v43 = vpop.eup %8473 }
 0xb33   : > { %6798 = vmatmul.mubr.f32.vlgmr.msra.gmra.mxu0 %v8474_v43 }
 0xb34   : > { %6836 = vmatpush3.msra.mxu0 %v9995_v44  ;;  %6867 = vmatprep.mubr.msk.f32.mxu0 %vm8961_vm0, %v8960_v1 }
 0xb35   : > { %6837 = vmatprep.subr.mxu0 %v8960_v1 }
 0xb36   : > { %6838 = vmatpush3.msra.mxu0 %v10001_v45 }
 0xb37   : > { %6839 = vmatprep.subr.mxu0 %v8960_v1 }
 0xb38   : > { %6840 = vmatpush3.msra.mxu0 %v10005_v46 }
 0xb39   : > { %6841 = vmatprep.subr.mxu0 %v8960_v1 }
 0xb3a   : > { %6842 = vmatpush3.msra.mxu0 %v10009_v47 }
 0xb3b   : > { %6843 = vmatprep.subr.mxu0 %v8960_v1 }
 0xb3c   : > { %6844 = vmatpush3.msra.mxu0 %v10013_v48 }
 0xb3d   : > { %6845 = vmatprep.subr.mxu0 %v8960_v1 }
 0xb3e   : > { %6846 = vmatpush3.msra.mxu0 %v10017_v49 }
 0xb3f   : > { %6847 = vmatprep.subr.mxu0 %v8960_v1 }
 0xb40   : > { %6848 = vmatpush3.msra.mxu0 %v10021_v50 }
 0xb41   : > { %6849 = vmatprep.subr.mxu0 %v8960_v1 }
 0xb42   : > { %6850 = vmatpush3.msra.mxu0 %v10025_v51 }
 0xb43   : > { %6851 = vmatprep.subr.mxu0 %v8960_v1 }
 0xb44   : > { %6852 = vmatpush3.msra.mxu0 %v10029_v57 }
 0xb45   : > { %6853 = vmatprep.subr.mxu0 %v8960_v1 }
 0xb46   : > { %6854 = vmatpush3.msra.mxu0 %v10033_v59 }
 0xb47   : > { %6855 = vmatprep.subr.mxu0 %v8960_v1 }
 0xb48   : > { %6856 = vmatpush3.msra.mxu0 %v10037_v60 }
 0xb49   : > { %6857 = vmatprep.subr.mxu0 %v8960_v1 }
 0xb4a   : > { %6858 = vmatpush3.msra.mxu0 %v10041_v61 }
 0xb4b   : > { %6859 = vmatprep.subr.mxu0 %v8960_v1 }
 0xb4c   : > { %6860 = vmatpush3.msra.mxu0 %v10045_v62 }
 0xb4d   : > { %6861 = vmatprep.subr.mxu0 %v8960_v1 }
 0xb4e   : > { %6862 = vmatpush3.msra.mxu0 %v10049_v63 }
 0xb4f   : > { %6863 = vmatprep.subr.mxu0 %v8960_v1 }
 0xb50   : > { %6864 = vmatpush3.msra.mxu0 %v10053_v5 }
 0xb51   : > { %6865 = vmatprep.subr.mxu0 %v8960_v1 }
 0xb52   : > { %6866 = vmatpush3.msra.mxu0 %v10057_v6 }
 0xb53   : > { %6905 = vmatprep.subr.mxu0 %v8960_v1 }
 0xbf3   : > { %v1743_v10 = vpop.f32.mrf.mxu0 }
 0xbf4   : > { %v1744_v14 = vadd.f32 %v9532_v58, %v1743_v10 }
 0xbf5   : > { %v6799_v16 = vpop.f32.mrf.mxu0 }
 0xbf6   : > { %v1748_v2 = vmul.f32 %v1747_v12, %v1744_v14  ;;  %v1896_v3 = vmul.f32 2.0, %v1744_v14 }
 0xbf8   : > { %v1749_v4 = vadd.f32 %v1748_v2, %v9766_v18  ;;  %v10066_v7 = vadd.f32 %v1896_v3, %v1895_v0 }
 0xbfa   : > { %6833 = vmatmul.mubr.f32.vlgmr.msra.gmra.mxu1 %v1749_v4 }
 0xbfb   : > { %6871 = vmatpush3.msra.mxu1 %v9853_v19  ;;  %6902 = vmatprep.mubr.msk.f32.mxu1 %vm8961_vm0, %v8960_v1 }
 0xbfc   : > { %6872 = vmatprep.subr.mxu1 %v8960_v1 }
 0xbfd   : > { %6873 = vmatpush3.msra.mxu1 %v9859_v21 }
 0xbfe   : > { %6874 = vmatprep.subr.mxu1 %v8960_v1 }
 0xbff   : > { %6875 = vmatpush3.msra.mxu1 %v9863_v23 }
 0xc00   : > { %6876 = vmatprep.subr.mxu1 %v8960_v1 }
 0xc01   : > { %6877 = vmatpush3.msra.mxu1 %v9867_v25 }
 0xc02   : > { %6878 = vmatprep.subr.mxu1 %v8960_v1 }
 0xc03   : > { %6879 = vmatpush3.msra.mxu1 %v9871_v27 }
 0xc04   : > { %6880 = vmatprep.subr.mxu1 %v8960_v1 }
 0xc05   : > { %6881 = vmatpush3.msra.mxu1 %v9875_v29 }
 0xc06   : > { %6882 = vmatprep.subr.mxu1 %v8960_v1 }
 0xc07   : > { %6883 = vmatpush3.msra.mxu1 %v9879_v31 }
 0xc08   : > { %6884 = vmatprep.subr.mxu1 %v8960_v1 }
 0xc09   : > { %6885 = vmatpush3.msra.mxu1 %v9883_v20 }
 0xc0a   : > { %6886 = vmatprep.subr.mxu1 %v8960_v1 }
 0xc0b   : > { %6887 = vmatpush3.msra.mxu1 %v9887_v22 }
 0xc0c   : > { %6888 = vmatprep.subr.mxu1 %v8960_v1 }
 0xc0d   : > { %6889 = vmatpush3.msra.mxu1 %v9891_v24 }
 0xc0e   : > { %6890 = vmatprep.subr.mxu1 %v8960_v1 }
 0xc0f   : > { %6891 = vmatpush3.msra.mxu1 %v9895_v26 }
 0xc10   : > { %6892 = vmatprep.subr.mxu1 %v8960_v1 }
 0xc11   : > { %6893 = vmatpush3.msra.mxu1 %v9899_v28 }
 0xc12   : > { %6894 = vmatprep.subr.mxu1 %v8960_v1 }
 0xc13   : > { %6895 = vmatpush3.msra.mxu1 %v9903_v30 }
 0xc14   : > { %6896 = vmatprep.subr.mxu1 %v8960_v1 }
 0xc15   : > { %6897 = vmatpush3.msra.mxu1 %v9907_v32 }
 0xc16   : > { %6898 = vmatprep.subr.mxu1 %v8960_v1 }
 0xc17   : > { %6899 = vmatpush3.msra.mxu1 %v9911_v33 }
 0xc18   : > { %6900 = vmatprep.subr.mxu1 %v8960_v1 }
 0xc19   : > { %6901 = vmatpush3.msra.mxu1 %v9915_v34 }
 0xc1a   : > { %6940 = vmatprep.subr.mxu1 %v8960_v1 }
 0xcba   : > { %v1816_v58 = vpop.f32.mrf.mxu1 }
 0xcbb   : > { %v1817_v11 = vadd.f32 %v10105_v9, %v1816_v58 }
 0xcbc   : > { %v6834_v13 = vpop.f32.mrf.mxu1 }
 0xcbd   : > { %8475 = vtanh.f32 %v1817_v11 }
 0xcca   : > { %v8476_v15 = vpop.eup %8475 }
 0xccb   : > { %6868 = vmatmul.mubr.f32.vlgmr.msra.gmra.mxu0 %v8476_v15 }
 0xccc   : > { %6906 = vmatpush3.msra.mxu0 %v9995_v44  ;;  %6937 = vmatprep.mubr.msk.f32.mxu0 %vm8961_vm0, %v8960_v1 }
 0xccd   : > { %6907 = vmatprep.subr.mxu0 %v8960_v1 }
 0xcce   : > { %6908 = vmatpush3.msra.mxu0 %v10001_v45 }
 0xccf   : > { %6909 = vmatprep.subr.mxu0 %v8960_v1 }
 0xcd0   : > { %6910 = vmatpush3.msra.mxu0 %v10005_v46 }
 0xcd1   : > { %6911 = vmatprep.subr.mxu0 %v8960_v1 }
 0xcd2   : > { %6912 = vmatpush3.msra.mxu0 %v10009_v47 }
 0xcd3   : > { %6913 = vmatprep.subr.mxu0 %v8960_v1 }
 0xcd4   : > { %6914 = vmatpush3.msra.mxu0 %v10013_v48 }
 0xcd5   : > { %6915 = vmatprep.subr.mxu0 %v8960_v1 }
 0xcd6   : > { %6916 = vmatpush3.msra.mxu0 %v10017_v49 }
 0xcd7   : > { %6917 = vmatprep.subr.mxu0 %v8960_v1 }
 0xcd8   : > { %6918 = vmatpush3.msra.mxu0 %v10021_v50 }
 0xcd9   : > { %6919 = vmatprep.subr.mxu0 %v8960_v1 }
 0xcda   : > { %6920 = vmatpush3.msra.mxu0 %v10025_v51 }
 0xcdb   : > { %6921 = vmatprep.subr.mxu0 %v8960_v1 }
 0xcdc   : > { %6922 = vmatpush3.msra.mxu0 %v10029_v57 }
 0xcdd   : > { %6923 = vmatprep.subr.mxu0 %v8960_v1 }
 0xcde   : > { %6924 = vmatpush3.msra.mxu0 %v10033_v59 }
 0xcdf   : > { %6925 = vmatprep.subr.mxu0 %v8960_v1 }
 0xce0   : > { %6926 = vmatpush3.msra.mxu0 %v10037_v60 }
 0xce1   : > { %6927 = vmatprep.subr.mxu0 %v8960_v1 }
 0xce2   : > { %6928 = vmatpush3.msra.mxu0 %v10041_v61 }
 0xce3   : > { %6929 = vmatprep.subr.mxu0 %v8960_v1 }
 0xce4   : > { %6930 = vmatpush3.msra.mxu0 %v10045_v62 }
 0xce5   : > { %6931 = vmatprep.subr.mxu0 %v8960_v1 }
 0xce6   : > { %6932 = vmatpush3.msra.mxu0 %v10049_v63 }
 0xce7   : > { %6933 = vmatprep.subr.mxu0 %v8960_v1 }
 0xce8   : > { %6934 = vmatpush3.msra.mxu0 %v10053_v5 }
 0xce9   : > { %6935 = vmatprep.subr.mxu0 %v8960_v1 }
 0xcea   : > { %6936 = vmatpush3.msra.mxu0 %v10057_v6 }
 0xceb   : > { %6975 = vmatprep.subr.mxu0 %v8960_v1 }
 0xd8b   : > { %v1887_v17 = vpop.f32.mrf.mxu0 }
 0xd8c   : > { %v1888_v53 = vadd.f32 %v10146_v52, %v1887_v17 }
 0xd8d   : > { %v6869_v56 = vpop.f32.mrf.mxu0 }
 0xd8e   : > { %v1898_v35 = vadd.f32 %v10066_v7, %v1888_v53 }
 0xd90   : > { %v1900_v36 = vmul.f32 %v1899_v54, %v1898_v35  ;;  %v2333_v35 = vstv %s10227_s0  ;;  %s11298_s0 = ssub.f32 %s11294_s3, %s10919_s15 }
 0xd92   : > { %v10151_v37 = vadd.f32 %v1900_v36, %v9766_v18  ;;  %s3803_s7 = smul.f32 0.5, %s11298_s0 }
 0xd93   : > { %s4237_s20 = smul.f32 0.16666667, %s11298_s0 }
 0xd94   : > { %6903 = vmatmul.mubr.f32.vlgmr.msra.gmra.mxu1 %v10151_v37 }
 0xd95   : > { %6941 = vmatpush3.msra.mxu1 %v9853_v19  ;;  %6972 = vmatprep.mubr.msk.f32.mxu1 %vm8961_vm0, %v8960_v1 }
 0xd96   : > { %6942 = vmatprep.subr.mxu1 %v8960_v1 }
 0xd97   : > { %6943 = vmatpush3.msra.mxu1 %v9859_v21 }
 0xd98   : > { %6944 = vmatprep.subr.mxu1 %v8960_v1 }
 0xd99   : > { %6945 = vmatpush3.msra.mxu1 %v9863_v23 }
 0xd9a   : > { %6946 = vmatprep.subr.mxu1 %v8960_v1 }
 0xd9b   : > { %6947 = vmatpush3.msra.mxu1 %v9867_v25 }
 0xd9c   : > { %6948 = vmatprep.subr.mxu1 %v8960_v1 }
 0xd9d   : > { %6949 = vmatpush3.msra.mxu1 %v9871_v27 }
 0xd9e   : > { %6950 = vmatprep.subr.mxu1 %v8960_v1 }
 0xd9f   : > { %6951 = vmatpush3.msra.mxu1 %v9875_v29 }
 0xda0   : > { %6952 = vmatprep.subr.mxu1 %v8960_v1 }
 0xda1   : > { %6953 = vmatpush3.msra.mxu1 %v9879_v31 }
 0xda2   : > { %6954 = vmatprep.subr.mxu1 %v8960_v1 }
 0xda3   : > { %6955 = vmatpush3.msra.mxu1 %v9883_v20 }
 0xda4   : > { %6956 = vmatprep.subr.mxu1 %v8960_v1 }
 0xda5   : > { %6957 = vmatpush3.msra.mxu1 %v9887_v22 }
 0xda6   : > { %6958 = vmatprep.subr.mxu1 %v8960_v1 }
 0xda7   : > { %6959 = vmatpush3.msra.mxu1 %v9891_v24 }
 0xda8   : > { %6960 = vmatprep.subr.mxu1 %v8960_v1 }
 0xda9   : > { %6961 = vmatpush3.msra.mxu1 %v9895_v26 }
 0xdaa   : > { %6962 = vmatprep.subr.mxu1 %v8960_v1 }
 0xdab   : > { %6963 = vmatpush3.msra.mxu1 %v9899_v28 }
 0xdac   : > { %6964 = vmatprep.subr.mxu1 %v8960_v1 }
 0xdad   : > { %6965 = vmatpush3.msra.mxu1 %v9903_v30 }
 0xdae   : > { %6966 = vmatprep.subr.mxu1 %v8960_v1 }
 0xdaf   : > { %6967 = vmatpush3.msra.mxu1 %v9907_v32 }
 0xdb0   : > { %6968 = vmatprep.subr.mxu1 %v8960_v1 }
 0xdb1   : > { %6969 = vmatpush3.msra.mxu1 %v9911_v33 }
 0xdb2   : > { %6970 = vmatprep.subr.mxu1 %v8960_v1 }
 0xdb3   : > { %6971 = vmatpush3.msra.mxu1 %v9915_v34 }
 0xdb4   : > { %7010 = vmatprep.subr.mxu1 %v8960_v1 }
 0xe54   : > { %v1970_v18 = vpop.f32.mrf.mxu1 }
 0xe55   : > { %v1971_v38 = vadd.f32 %v10105_v9, %v1970_v18 }
 0xe56   : > { %v6904_v39 = vpop.f32.mrf.mxu1 }
 0xe57   : > { %8477 = vtanh.f32 %v1971_v38 }
 0xe64   : > { %v8478_v40 = vpop.eup %8477 }
 0xe65   : > { %6938 = vmatmul.mubr.f32.vlgmr.msra.gmra.mxu0 %v8478_v40 }
 0xe66   : > { %6976 = vmatpush3.msra.mxu0 %v9995_v44  ;;  %7007 = vmatprep.mubr.msk.f32.mxu0 %vm8961_vm0, %v8960_v1 }
 0xe67   : > { %6977 = vmatprep.subr.mxu0 %v8960_v1 }
 0xe68   : > { %6978 = vmatpush3.msra.mxu0 %v10001_v45 }
 0xe69   : > { %6979 = vmatprep.subr.mxu0 %v8960_v1 }
 0xe6a   : > { %6980 = vmatpush3.msra.mxu0 %v10005_v46 }
 0xe6b   : > { %6981 = vmatprep.subr.mxu0 %v8960_v1 }
 0xe6c   : > { %6982 = vmatpush3.msra.mxu0 %v10009_v47 }
 0xe6d   : > { %6983 = vmatprep.subr.mxu0 %v8960_v1 }
 0xe6e   : > { %6984 = vmatpush3.msra.mxu0 %v10013_v48 }
 0xe6f   : > { %6985 = vmatprep.subr.mxu0 %v8960_v1 }
 0xe70   : > { %6986 = vmatpush3.msra.mxu0 %v10017_v49 }
 0xe71   : > { %6987 = vmatprep.subr.mxu0 %v8960_v1 }
 0xe72   : > { %6988 = vmatpush3.msra.mxu0 %v10021_v50 }
 0xe73   : > { %6989 = vmatprep.subr.mxu0 %v8960_v1 }
 0xe74   : > { %6990 = vmatpush3.msra.mxu0 %v10025_v51 }
 0xe75   : > { %6991 = vmatprep.subr.mxu0 %v8960_v1 }
 0xe76   : > { %6992 = vmatpush3.msra.mxu0 %v10029_v57 }
 0xe77   : > { %6993 = vmatprep.subr.mxu0 %v8960_v1 }
 0xe78   : > { %6994 = vmatpush3.msra.mxu0 %v10033_v59 }
 0xe79   : > { %6995 = vmatprep.subr.mxu0 %v8960_v1 }
 0xe7a   : > { %6996 = vmatpush3.msra.mxu0 %v10037_v60 }
 0xe7b   : > { %6997 = vmatprep.subr.mxu0 %v8960_v1 }
 0xe7c   : > { %6998 = vmatpush3.msra.mxu0 %v10041_v61 }
 0xe7d   : > { %6999 = vmatprep.subr.mxu0 %v8960_v1 }
 0xe7e   : > { %7000 = vmatpush3.msra.mxu0 %v10045_v62 }
 0xe7f   : > { %7001 = vmatprep.subr.mxu0 %v8960_v1 }
 0xe80   : > { %7002 = vmatpush3.msra.mxu0 %v10049_v63 }
 0xe81   : > { %7003 = vmatprep.subr.mxu0 %v8960_v1 }
 0xe82   : > { %7004 = vmatpush3.msra.mxu0 %v10053_v5 }
 0xe83   : > { %7005 = vmatprep.subr.mxu0 %v8960_v1 }
 0xe84   : > { %7006 = vmatpush3.msra.mxu0 %v10057_v6 }
 0xe85   : > { %7045 = vmatprep.subr.mxu0 %v8960_v1 }
 0xf25   : > { %v2041_v41 = vpop.f32.mrf.mxu0 }
 0xf26   : > { %v10233_v43 = vadd.f32 %v10146_v52, %v2041_v41 }
 0xf27   : > { %v6939_v8 = vpop.f32.mrf.mxu0 }
 0xf28   : > { %v2047_v10 = vmul.f32 %v10230_v42, %v10233_v43  ;;  %v10495_v8 = vld [vmem:[#allocation9 + $0x40] sm:$0xff] }
 0xf2a   : > { %v2048_v12 = vadd.f32 %v2047_v10, %v10151_v37  ;;  %v10499_v10 = vld [vmem:[#allocation9 + $0x38] sm:$0xff] }
 0xf2c   : > { %6973 = vmatmul.mubr.f32.vlgmr.msra.gmra.mxu1 %v2048_v12  ;;  %v10503_v12 = vld [vmem:[#allocation9 + $0x30] sm:$0xff] }
 0xf2d   : > { %7011 = vmatpush3.msra.mxu1 %v9853_v19  ;;  %7042 = vmatprep.mubr.msk.f32.mxu1 %vm8961_vm0, %v8960_v1 }
 0xf2e   : > { %7012 = vmatprep.subr.mxu1 %v8960_v1 }
 0xf2f   : > { %7013 = vmatpush3.msra.mxu1 %v9859_v21 }
 0xf30   : > { %7014 = vmatprep.subr.mxu1 %v8960_v1 }
 0xf31   : > { %7015 = vmatpush3.msra.mxu1 %v9863_v23 }
 0xf32   : > { %7016 = vmatprep.subr.mxu1 %v8960_v1 }
 0xf33   : > { %7017 = vmatpush3.msra.mxu1 %v9867_v25 }
 0xf34   : > { %7018 = vmatprep.subr.mxu1 %v8960_v1 }
 0xf35   : > { %7019 = vmatpush3.msra.mxu1 %v9871_v27 }
 0xf36   : > { %7020 = vmatprep.subr.mxu1 %v8960_v1 }
 0xf37   : > { %7021 = vmatpush3.msra.mxu1 %v9875_v29 }
 0xf38   : > { %7022 = vmatprep.subr.mxu1 %v8960_v1 }
 0xf39   : > { %7023 = vmatpush3.msra.mxu1 %v9879_v31 }
 0xf3a   : > { %7024 = vmatprep.subr.mxu1 %v8960_v1 }
 0xf3b   : > { %7025 = vmatpush3.msra.mxu1 %v9883_v20 }
 0xf3c   : > { %7026 = vmatprep.subr.mxu1 %v8960_v1 }
 0xf3d   : > { %7027 = vmatpush3.msra.mxu1 %v9887_v22 }
 0xf3e   : > { %7028 = vmatprep.subr.mxu1 %v8960_v1 }
 0xf3f   : > { %7029 = vmatpush3.msra.mxu1 %v9891_v24 }
 0xf40   : > { %7030 = vmatprep.subr.mxu1 %v8960_v1 }
 0xf41   : > { %7031 = vmatpush3.msra.mxu1 %v9895_v26 }
 0xf42   : > { %7032 = vmatprep.subr.mxu1 %v8960_v1 }
 0xf43   : > { %7033 = vmatpush3.msra.mxu1 %v9899_v28 }
 0xf44   : > { %7034 = vmatprep.subr.mxu1 %v8960_v1 }
 0xf45   : > { %7035 = vmatpush3.msra.mxu1 %v9903_v30 }
 0xf46   : > { %7036 = vmatprep.subr.mxu1 %v8960_v1 }
 0xf47   : > { %7037 = vmatpush3.msra.mxu1 %v9907_v32 }
 0xf48   : > { %7038 = vmatprep.subr.mxu1 %v8960_v1 }
 0xf49   : > { %7039 = vmatpush3.msra.mxu1 %v9911_v33 }
 0xf4a   : > { %7040 = vmatprep.subr.mxu1 %v8960_v1 }
 0xf4b   : > { %7041 = vmatpush3.msra.mxu1 %v9915_v34 }
 0xf4c   : > { %7080 = vmatprep.subr.mxu1 %v8960_v1 }
 0xfec   : > { %v2115_v14 = vpop.f32.mrf.mxu1 }
 0xfed   : > { %v2116_v16 = vadd.f32 %v10105_v9, %v2115_v14  ;;  %v10507_v14 = vld [vmem:[#allocation9 + $0x28] sm:$0xff] }
 0xfee   : > { %v6974_v0 = vpop.f32.mrf.mxu1 }
 0xfef   : > { %8479 = vtanh.f32 %v2116_v16  ;;  %v10511_v16 = vld [vmem:[#allocation9 + $0x20] sm:$0xff]  ;;  %v10515_v0 = vld [vmem:[#allocation9 + $0x18] sm:$0xff] }
 0xffc   : > { %v8480_v2 = vpop.eup %8479 }
 0xffd   : > { %7008 = vmatmul.mubr.f32.vlgmr.msra.gmra.mxu0 %v8480_v2  ;;  %v10519_v2 = vld [vmem:[#allocation9 + $0x10] sm:$0xff] }
 0xffe   : > { %7046 = vmatpush3.msra.mxu0 %v9995_v44  ;;  %7077 = vmatprep.mubr.msk.f32.mxu0 %vm8961_vm0, %v8960_v1 }
 0xfff   : > { %7047 = vmatprep.subr.mxu0 %v8960_v1 }
0x1000   : > { %7048 = vmatpush3.msra.mxu0 %v10001_v45 }
0x1001   : > { %7049 = vmatprep.subr.mxu0 %v8960_v1 }
0x1002   : > { %7050 = vmatpush3.msra.mxu0 %v10005_v46 }
0x1003   : > { %7051 = vmatprep.subr.mxu0 %v8960_v1 }
0x1004   : > { %7052 = vmatpush3.msra.mxu0 %v10009_v47 }
0x1005   : > { %7053 = vmatprep.subr.mxu0 %v8960_v1 }
0x1006   : > { %7054 = vmatpush3.msra.mxu0 %v10013_v48 }
0x1007   : > { %7055 = vmatprep.subr.mxu0 %v8960_v1 }
0x1008   : > { %7056 = vmatpush3.msra.mxu0 %v10017_v49 }
0x1009   : > { %7057 = vmatprep.subr.mxu0 %v8960_v1 }
0x100a   : > { %7058 = vmatpush3.msra.mxu0 %v10021_v50 }
0x100b   : > { %7059 = vmatprep.subr.mxu0 %v8960_v1 }
0x100c   : > { %7060 = vmatpush3.msra.mxu0 %v10025_v51 }
0x100d   : > { %7061 = vmatprep.subr.mxu0 %v8960_v1 }
0x100e   : > { %7062 = vmatpush3.msra.mxu0 %v10029_v57 }
0x100f   : > { %7063 = vmatprep.subr.mxu0 %v8960_v1 }
0x1010   : > { %7064 = vmatpush3.msra.mxu0 %v10033_v59 }
0x1011   : > { %7065 = vmatprep.subr.mxu0 %v8960_v1 }
0x1012   : > { %7066 = vmatpush3.msra.mxu0 %v10037_v60 }
0x1013   : > { %7067 = vmatprep.subr.mxu0 %v8960_v1 }
0x1014   : > { %7068 = vmatpush3.msra.mxu0 %v10041_v61 }
0x1015   : > { %7069 = vmatprep.subr.mxu0 %v8960_v1 }
0x1016   : > { %7070 = vmatpush3.msra.mxu0 %v10045_v62 }
0x1017   : > { %7071 = vmatprep.subr.mxu0 %v8960_v1 }
0x1018   : > { %7072 = vmatpush3.msra.mxu0 %v10049_v63 }
0x1019   : > { %7073 = vmatprep.subr.mxu0 %v8960_v1 }
0x101a   : > { %7074 = vmatpush3.msra.mxu0 %v10053_v5 }
0x101b   : > { %7075 = vmatprep.subr.mxu0 %v8960_v1 }
0x101c   : > { %7076 = vmatpush3.msra.mxu0 %v10057_v6 }
0x101d   : > { %7115 = vmatprep.subr.mxu0 %v8960_v1 }
0x10bd   : > { %v2186_v3 = vpop.f32.mrf.mxu0 }
0x10be   : > { %v10308_v4 = vadd.f32 %v10146_v52, %v2186_v3  ;;  %v10523_v3 = vld [vmem:[#allocation9 + $0x8] sm:$0xff] }
0x10bf   : > { %v7009_v7 = vpop.f32.mrf.mxu0 }
0x10c0   : > { %v2190_v58 = vmul.f32 %v10308_v4, %v10230_v42  ;;  %v2480_v54 = vmul.f32 2.0, %v10308_v4  ;;  %v10527_v4 = vld [vmem:[#allocation9] sm:$0xff] }
0x10c2   : > { %v2191_v11 = vadd.f32 %v2190_v58, %v10151_v37  ;;  %v2481_v38 = vadd.f32 %v2480_v54, %v10233_v43  ;;  %v10491_v43 = vld [vmem:[#allocation9 + $0x48] sm:$0xff] }
0x10c3   : > { %v10658_v54 = vld [vmem:[#allocation10 + $0x28] sm:$0xff] }
0x10c4   : > { %7043 = vmatmul.mubr.f32.vlgmr.msra.gmra.mxu1 %v2191_v11 }
0x10c5   : > { %7081 = vmatpush3.msra.mxu1 %v9853_v19  ;;  %7112 = vmatprep.mubr.msk.f32.mxu1 %vm8961_vm0, %v8960_v1 }
0x10c6   : > { %7082 = vmatprep.subr.mxu1 %v8960_v1 }
0x10c7   : > { %7083 = vmatpush3.msra.mxu1 %v9859_v21 }
0x10c8   : > { %7084 = vmatprep.subr.mxu1 %v8960_v1 }
0x10c9   : > { %7085 = vmatpush3.msra.mxu1 %v9863_v23 }
0x10ca   : > { %7086 = vmatprep.subr.mxu1 %v8960_v1 }
0x10cb   : > { %7087 = vmatpush3.msra.mxu1 %v9867_v25 }
0x10cc   : > { %7088 = vmatprep.subr.mxu1 %v8960_v1 }
0x10cd   : > { %7089 = vmatpush3.msra.mxu1 %v9871_v27 }
0x10ce   : > { %7090 = vmatprep.subr.mxu1 %v8960_v1 }
0x10cf   : > { %7091 = vmatpush3.msra.mxu1 %v9875_v29 }
0x10d0   : > { %7092 = vmatprep.subr.mxu1 %v8960_v1 }
0x10d1   : > { %7093 = vmatpush3.msra.mxu1 %v9879_v31 }
0x10d2   : > { %7094 = vmatprep.subr.mxu1 %v8960_v1 }
0x10d3   : > { %7095 = vmatpush3.msra.mxu1 %v9883_v20 }
0x10d4   : > { %7096 = vmatprep.subr.mxu1 %v8960_v1 }
0x10d5   : > { %7097 = vmatpush3.msra.mxu1 %v9887_v22 }
0x10d6   : > { %7098 = vmatprep.subr.mxu1 %v8960_v1 }
0x10d7   : > { %7099 = vmatpush3.msra.mxu1 %v9891_v24 }
0x10d8   : > { %7100 = vmatprep.subr.mxu1 %v8960_v1 }
0x10d9   : > { %7101 = vmatpush3.msra.mxu1 %v9895_v26 }
0x10da   : > { %7102 = vmatprep.subr.mxu1 %v8960_v1 }
0x10db   : > { %7103 = vmatpush3.msra.mxu1 %v9899_v28 }
0x10dc   : > { %7104 = vmatprep.subr.mxu1 %v8960_v1 }
0x10dd   : > { %7105 = vmatpush3.msra.mxu1 %v9903_v30 }
0x10de   : > { %7106 = vmatprep.subr.mxu1 %v8960_v1 }
0x10df   : > { %7107 = vmatpush3.msra.mxu1 %v9907_v32 }
0x10e0   : > { %7108 = vmatprep.subr.mxu1 %v8960_v1 }
0x10e1   : > { %7109 = vmatpush3.msra.mxu1 %v9911_v33 }
0x10e2   : > { %7110 = vmatprep.subr.mxu1 %v8960_v1 }
0x10e3   : > { %7111 = vmatpush3.msra.mxu1 %v9915_v34 }
0x10e4   : > { %7150 = vmatprep.subr.mxu1 %v8960_v1 }
0x1184   : > { %v2258_v13 = vpop.f32.mrf.mxu1 }
0x1185   : > { %v2259_v15 = vadd.f32 %v10105_v9, %v2258_v13 }
0x1186   : > { %v7044_v17 = vpop.f32.mrf.mxu1 }
0x1187   : > { %8481 = vtanh.f32 %v2259_v15  ;;  %v10646_v15 = vld [vmem:[#allocation10 + $0x40] sm:$0xff]  ;;  %v10650_v17 = vld [vmem:[#allocation10 + $0x38] sm:$0xff] }
0x1194   : > { %v8482_v53 = vpop.eup %8481 }
0x1195   : > { %7078 = vmatmul.mubr.f32.vlgmr.msra.gmra.mxu0 %v8482_v53  ;;  %v10654_v53 = vld [vmem:[#allocation10 + $0x30] sm:$0xff] }
0x1196   : > { %7116 = vmatpush3.msra.mxu0 %v9995_v44  ;;  %7147 = vmatprep.mubr.msk.f32.mxu0 %vm8961_vm0, %v8960_v1 }
0x1197   : > { %7117 = vmatprep.subr.mxu0 %v8960_v1 }
0x1198   : > { %7118 = vmatpush3.msra.mxu0 %v10001_v45 }
0x1199   : > { %7119 = vmatprep.subr.mxu0 %v8960_v1 }
0x119a   : > { %7120 = vmatpush3.msra.mxu0 %v10005_v46 }
0x119b   : > { %7121 = vmatprep.subr.mxu0 %v8960_v1 }
0x119c   : > { %7122 = vmatpush3.msra.mxu0 %v10009_v47 }
0x119d   : > { %7123 = vmatprep.subr.mxu0 %v8960_v1 }
0x119e   : > { %7124 = vmatpush3.msra.mxu0 %v10013_v48 }
0x119f   : > { %7125 = vmatprep.subr.mxu0 %v8960_v1 }
0x11a0   : > { %7126 = vmatpush3.msra.mxu0 %v10017_v49 }
0x11a1   : > { %7127 = vmatprep.subr.mxu0 %v8960_v1 }
0x11a2   : > { %7128 = vmatpush3.msra.mxu0 %v10021_v50 }
0x11a3   : > { %7129 = vmatprep.subr.mxu0 %v8960_v1 }
0x11a4   : > { %7130 = vmatpush3.msra.mxu0 %v10025_v51 }
0x11a5   : > { %7131 = vmatprep.subr.mxu0 %v8960_v1 }
0x11a6   : > { %7132 = vmatpush3.msra.mxu0 %v10029_v57 }
0x11a7   : > { %7133 = vmatprep.subr.mxu0 %v8960_v1 }
0x11a8   : > { %7134 = vmatpush3.msra.mxu0 %v10033_v59 }
0x11a9   : > { %7135 = vmatprep.subr.mxu0 %v8960_v1 }
0x11aa   : > { %7136 = vmatpush3.msra.mxu0 %v10037_v60 }
0x11ab   : > { %7137 = vmatprep.subr.mxu0 %v8960_v1 }
0x11ac   : > { %7138 = vmatpush3.msra.mxu0 %v10041_v61 }
0x11ad   : > { %7139 = vmatprep.subr.mxu0 %v8960_v1 }
0x11ae   : > { %7140 = vmatpush3.msra.mxu0 %v10045_v62 }
0x11af   : > { %7141 = vmatprep.subr.mxu0 %v8960_v1 }
0x11b0   : > { %7142 = vmatpush3.msra.mxu0 %v10049_v63 }
0x11b1   : > { %7143 = vmatprep.subr.mxu0 %v8960_v1 }
0x11b2   : > { %7144 = vmatpush3.msra.mxu0 %v10053_v5 }
0x11b3   : > { %7145 = vmatprep.subr.mxu0 %v8960_v1 }
0x11b4   : > { %7146 = vmatpush3.msra.mxu0 %v10057_v6 }
0x11b5   : > { %7185 = vmatprep.subr.mxu0 %v8960_v1 }
0x1255   : > { %v2329_v56 = vpop.f32.mrf.mxu0 }
0x1256   : > { %v2330_v36 = vadd.f32 %v10146_v52, %v2329_v56  ;;  %v10662_v56 = vld [vmem:[#allocation10 + $0x20] sm:$0xff] }
0x1257   : > { %v7079_v18 = vpop.f32.mrf.mxu0 }
0x1258   : > { %v2334_v39 = vmul.f32 %v2333_v35, %v2330_v36  ;;  %v2482_v40 = vmul.f32 2.0, %v2330_v36  ;;  %v10666_v35 = vld [vmem:[#allocation10 + $0x18] sm:$0xff]  ;;  %v10670_v36 = vld [vmem:[#allocation10 + $0x10] sm:$0xff]  ;;  %v10674_v18 = vld [vmem:[#allocation10 + $0x8] sm:$0xff] }
0x125a   : > { %v2335_v41 = vadd.f32 %v2334_v39, %v10151_v37  ;;  %v10387_v42 = vadd.f32 %v2482_v40, %v2481_v38  ;;  %v10678_v38 = vld [vmem:[#allocation10] sm:$0xff] }
0x125c   : > { %7113 = vmatmul.mubr.f32.vlgmr.msra.gmra.mxu1 %v2335_v41 }
0x125d   : > { %7151 = vmatpush3.msra.mxu1 %v9853_v19  ;;  %7182 = vmatprep.mubr.msk.f32.mxu1 %vm8961_vm0, %v8960_v1 }
0x125e   : > { %7152 = vmatprep.subr.mxu1 %v8960_v1 }
0x125f   : > { %7153 = vmatpush3.msra.mxu1 %v9859_v21 }
0x1260   : > { %7154 = vmatprep.subr.mxu1 %v8960_v1 }
0x1261   : > { %7155 = vmatpush3.msra.mxu1 %v9863_v23 }
0x1262   : > { %7156 = vmatprep.subr.mxu1 %v8960_v1 }
0x1263   : > { %7157 = vmatpush3.msra.mxu1 %v9867_v25 }
0x1264   : > { %7158 = vmatprep.subr.mxu1 %v8960_v1 }
0x1265   : > { %7159 = vmatpush3.msra.mxu1 %v9871_v27 }
0x1266   : > { %7160 = vmatprep.subr.mxu1 %v8960_v1 }
0x1267   : > { %7161 = vmatpush3.msra.mxu1 %v9875_v29 }
0x1268   : > { %7162 = vmatprep.subr.mxu1 %v8960_v1 }
0x1269   : > { %7163 = vmatpush3.msra.mxu1 %v9879_v31  ;;  %v2485_v31 = vstv %s2479_s23 }
0x126a   : > { %7164 = vmatprep.subr.mxu1 %v8960_v1 }
0x126b   : > { %7165 = vmatpush3.msra.mxu1 %v9883_v20 }
0x126c   : > { %7166 = vmatprep.subr.mxu1 %v8960_v1 }
0x126d   : > { %7167 = vmatpush3.msra.mxu1 %v9887_v22 }
0x126e   : > { %7168 = vmatprep.subr.mxu1 %v8960_v1 }
0x126f   : > { %7169 = vmatpush3.msra.mxu1 %v9891_v24 }
0x1270   : > { %7170 = vmatprep.subr.mxu1 %v8960_v1 }
0x1271   : > { %7171 = vmatpush3.msra.mxu1 %v9895_v26 }
0x1272   : > { %7172 = vmatprep.subr.mxu1 %v8960_v1 }
0x1273   : > { %7173 = vmatpush3.msra.mxu1 %v9899_v28  ;;  %v10465_v28 = vld [vmem:[#allocation9 + $0x78] sm:$0xff] }
0x1274   : > { %7174 = vmatprep.subr.mxu1 %v8960_v1 }
0x1275   : > { %7175 = vmatpush3.msra.mxu1 %v9903_v30  ;;  %v10471_v30 = vld [vmem:[#allocation9 + $0x70] sm:$0xff] }
0x1276   : > { %7176 = vmatprep.subr.mxu1 %v8960_v1 }
0x1277   : > { %7177 = vmatpush3.msra.mxu1 %v9907_v32  ;;  %v10475_v32 = vld [vmem:[#allocation9 + $0x68] sm:$0xff] }
0x1278   : > { %7178 = vmatprep.subr.mxu1 %v8960_v1 }
0x1279   : > { %7179 = vmatpush3.msra.mxu1 %v9911_v33  ;;  %v10479_v33 = vld [vmem:[#allocation9 + $0x60] sm:$0xff] }
0x127a   : > { %7180 = vmatprep.subr.mxu1 %v8960_v1 }
0x127b   : > { %7181 = vmatpush3.msra.mxu1 %v9915_v34  ;;  %v10483_v34 = vld [vmem:[#allocation9 + $0x58] sm:$0xff] }
0x127c   : > { %7220 = vmatprep.subr.mxu1 %v8960_v1 }
0x131c   : > { %v2402_v19 = vpop.f32.mrf.mxu1 }
0x131d   : > { %v2403_v21 = vadd.f32 %v10105_v9, %v2402_v19 }
0x131e   : > { %v7114_v23 = vpop.f32.mrf.mxu1 }
0x131f   : > { %8483 = vtanh.f32 %v2403_v21  ;;  %v10725_v21 = vld [vmem:[%s11875_s4] ss:$0 sm:$0xff] }
0x132c   : > { %v8484_v25 = vpop.eup %8483 }
0x132d   : > { %7148 = vmatmul.mubr.f32.vlgmr.msra.gmra.mxu0 %v8484_v25 }
0x132e   : > { %7186 = vmatpush3.msra.mxu0 %v9995_v44  ;;  %7217 = vmatprep.mubr.msk.f32.mxu0 %vm8961_vm0, %v8960_v1 }
0x132f   : > { %7187 = vmatprep.subr.mxu0 %v8960_v1 }
0x1330   : > { %7188 = vmatpush3.msra.mxu0 %v10001_v45 }
0x1331   : > { %7189 = vmatprep.subr.mxu0 %v8960_v1 }
0x1332   : > { %7190 = vmatpush3.msra.mxu0 %v10005_v46 }
0x1333   : > { %7191 = vmatprep.subr.mxu0 %v8960_v1 }
0x1334   : > { %7192 = vmatpush3.msra.mxu0 %v10009_v47 }
0x1335   : > { %7193 = vmatprep.subr.mxu0 %v8960_v1 }
0x1336   : > { %7194 = vmatpush3.msra.mxu0 %v10013_v48 }
0x1337   : > { %7195 = vmatprep.subr.mxu0 %v8960_v1 }
0x1338   : > { %7196 = vmatpush3.msra.mxu0 %v10017_v49 }
0x1339   : > { %7197 = vmatprep.subr.mxu0 %v8960_v1 }
0x133a   : > { %7198 = vmatpush3.msra.mxu0 %v10021_v50 }
0x133b   : > { %7199 = vmatprep.subr.mxu0 %v8960_v1 }
0x133c   : > { %7200 = vmatpush3.msra.mxu0 %v10025_v51 }
0x133d   : > { %7201 = vmatprep.subr.mxu0 %v8960_v1 }
0x133e   : > { %7202 = vmatpush3.msra.mxu0 %v10029_v57 }
0x133f   : > { %7203 = vmatprep.subr.mxu0 %v8960_v1 }
0x1340   : > { %7204 = vmatpush3.msra.mxu0 %v10033_v59 }
0x1341   : > { %7205 = vmatprep.subr.mxu0 %v8960_v1 }
0x1342   : > { %7206 = vmatpush3.msra.mxu0 %v10037_v60 }
0x1343   : > { %7207 = vmatprep.subr.mxu0 %v8960_v1 }
0x1344   : > { %7208 = vmatpush3.msra.mxu0 %v10041_v61 }
0x1345   : > { %7209 = vmatprep.subr.mxu0 %v8960_v1 }
0x1346   : > { %7210 = vmatpush3.msra.mxu0 %v10045_v62 }
0x1347   : > { %7211 = vmatprep.subr.mxu0 %v8960_v1 }
0x1348   : > { %7212 = vmatpush3.msra.mxu0 %v10049_v63 }
0x1349   : > { %7213 = vmatprep.subr.mxu0 %v8960_v1 }
0x134a   : > { %7214 = vmatpush3.msra.mxu0 %v10053_v5 }
0x134b   : > { %7215 = vmatprep.subr.mxu0 %v8960_v1 }
0x134c   : > { %7216 = vmatpush3.msra.mxu0 %v10057_v6 }
0x134d   : > { %7255 = vmatprep.subr.mxu0 %v8960_v1 }
0x13ed   : > { %v2473_v27 = vpop.f32.mrf.mxu0 }
0x13ee   : > { %v2474_v29 = vadd.f32 %v10146_v52, %v2473_v27 }
0x13ef   : > { %v7149_v20 = vpop.f32.mrf.mxu0 }
0x13f0   : > { %v2484_v22 = vadd.f32 %v10387_v42, %v2474_v29  ;;  %v2919_v20 = vstv %s10570_s29 }
0x13f2   : > { %v2486_v24 = vmul.f32 %v2485_v31, %v2484_v22  ;;  %v10767_v22 = vld [vmem:[%s11877_s6] ss:$0 sm:$0xff] }
0x13f4   : > { %v10462_v26 = vadd.f32 %v2486_v24, %v10151_v37  ;;  %v10487_v37 = vld [vmem:[#allocation9 + $0x50] sm:$0xff] }
0x13f6   : > { %7183 = vmatmul.mubr.f32.vlgmr.msra.gmra.mxu1 %v10462_v26 }
0x13f7   : > { %7221 = vmatpush3.msra.mxu1 %v10465_v28  ;;  %7252 = vmatprep.mubr.msk.f32.mxu1 %vm8961_vm0, %v8960_v1 }
0x13f8   : > { %7222 = vmatprep.subr.mxu1 %v8960_v1 }
0x13f9   : > { %7223 = vmatpush3.msra.mxu1 %v10471_v30 }
0x13fa   : > { %7224 = vmatprep.subr.mxu1 %v8960_v1 }
0x13fb   : > { %7225 = vmatpush3.msra.mxu1 %v10475_v32 }
0x13fc   : > { %7226 = vmatprep.subr.mxu1 %v8960_v1 }
0x13fd   : > { %7227 = vmatpush3.msra.mxu1 %v10479_v33 }
0x13fe   : > { %7228 = vmatprep.subr.mxu1 %v8960_v1 }
0x13ff   : > { %7229 = vmatpush3.msra.mxu1 %v10483_v34 }
0x1400   : > { %7230 = vmatprep.subr.mxu1 %v8960_v1 }
0x1401   : > { %7231 = vmatpush3.msra.mxu1 %v10487_v37 }
0x1402   : > { %7232 = vmatprep.subr.mxu1 %v8960_v1 }
0x1403   : > { %7233 = vmatpush3.msra.mxu1 %v10491_v43 }
0x1404   : > { %7234 = vmatprep.subr.mxu1 %v8960_v1 }
0x1405   : > { %7235 = vmatpush3.msra.mxu1 %v10495_v8 }
0x1406   : > { %7236 = vmatprep.subr.mxu1 %v8960_v1 }
0x1407   : > { %7237 = vmatpush3.msra.mxu1 %v10499_v10 }
0x1408   : > { %7238 = vmatprep.subr.mxu1 %v8960_v1 }
0x1409   : > { %7239 = vmatpush3.msra.mxu1 %v10503_v12 }
0x140a   : > { %7240 = vmatprep.subr.mxu1 %v8960_v1 }
0x140b   : > { %7241 = vmatpush3.msra.mxu1 %v10507_v14 }
0x140c   : > { %7242 = vmatprep.subr.mxu1 %v8960_v1 }
0x140d   : > { %7243 = vmatpush3.msra.mxu1 %v10511_v16 }
0x140e   : > { %7244 = vmatprep.subr.mxu1 %v8960_v1 }
0x140f   : > { %7245 = vmatpush3.msra.mxu1 %v10515_v0 }
0x1410   : > { %7246 = vmatprep.subr.mxu1 %v8960_v1 }
0x1411   : > { %7247 = vmatpush3.msra.mxu1 %v10519_v2 }
0x1412   : > { %7248 = vmatprep.subr.mxu1 %v8960_v1 }
0x1413   : > { %7249 = vmatpush3.msra.mxu1 %v10523_v3 }
0x1414   : > { %7250 = vmatprep.subr.mxu1 %v8960_v1 }
0x1415   : > { %7251 = vmatpush3.msra.mxu1 %v10527_v4 }
0x1416   : > { %7290 = vmatprep.subr.mxu1 %v8960_v1 }
0x14b6   : > { %v2556_v7 = vpop.f32.mrf.mxu1 }
0x14b7   : > { %v2557_v58 = vadd.f32 %v10105_v9, %v2556_v7 }
0x14b8   : > { %v7184_v11 = vpop.f32.mrf.mxu1 }
0x14b9   : > { %8485 = vtanh.f32 %v2557_v58 }
0x14c6   : > { %v8486_v13 = vpop.eup %8485 }
0x14c7   : > { %7218 = vmatmul.mubr.f32.vlgmr.msra.gmra.mxu0 %v8486_v13 }
0x14c8   : > { %7256 = vmatpush3.msra.mxu0 %v9995_v44  ;;  %7287 = vmatprep.mubr.msk.f32.mxu0 %vm8961_vm0, %v8960_v1 }
0x14c9   : > { %7257 = vmatprep.subr.mxu0 %v8960_v1 }
0x14ca   : > { %7258 = vmatpush3.msra.mxu0 %v10001_v45  ;;  %v10573_v45 = vstv %s2631_s8  ;;  %s8962_s8 = smov [#allocation17]  }
0x14cb   : > { %7259 = vmatprep.subr.mxu0 %v8960_v1 }
0x14cc   : > { %7260 = vmatpush3.msra.mxu0 %v10005_v46 }
0x14cd   : > { %7261 = vmatprep.subr.mxu0 %v8960_v1 }
0x14ce   : > { %7262 = vmatpush3.msra.mxu0 %v10009_v47 }
0x14cf   : > { %7263 = vmatprep.subr.mxu0 %v8960_v1 }
0x14d0   : > { %7264 = vmatpush3.msra.mxu0 %v10013_v48 }
0x14d1   : > { %7265 = vmatprep.subr.mxu0 %v8960_v1 }
0x14d2   : > { %7266 = vmatpush3.msra.mxu0 %v10017_v49 }
0x14d3   : > { %7267 = vmatprep.subr.mxu0 %v8960_v1 }
0x14d4   : > { %7268 = vmatpush3.msra.mxu0 %v10021_v50 }
0x14d5   : > { %7269 = vmatprep.subr.mxu0 %v8960_v1 }
0x14d6   : > { %7270 = vmatpush3.msra.mxu0 %v10025_v51 }
0x14d7   : > { %7271 = vmatprep.subr.mxu0 %v8960_v1 }
0x14d8   : > { %7272 = vmatpush3.msra.mxu0 %v10029_v57 }
0x14d9   : > { %7273 = vmatprep.subr.mxu0 %v8960_v1 }
0x14da   : > { %7274 = vmatpush3.msra.mxu0 %v10033_v59 }
0x14db   : > { %7275 = vmatprep.subr.mxu0 %v8960_v1 }
0x14dc   : > { %7276 = vmatpush3.msra.mxu0 %v10037_v60  ;;  %v10616_v60 = vld [vmem:[#allocation10 + $0x78] sm:$0xff] }
0x14dd   : > { %7277 = vmatprep.subr.mxu0 %v8960_v1 }
0x14de   : > { %7278 = vmatpush3.msra.mxu0 %v10041_v61  ;;  %v10622_v61 = vld [vmem:[#allocation10 + $0x70] sm:$0xff] }
0x14df   : > { %7279 = vmatprep.subr.mxu0 %v8960_v1 }
0x14e0   : > { %7280 = vmatpush3.msra.mxu0 %v10045_v62  ;;  %v10626_v62 = vld [vmem:[#allocation10 + $0x68] sm:$0xff] }
0x14e1   : > { %7281 = vmatprep.subr.mxu0 %v8960_v1 }
0x14e2   : > { %7282 = vmatpush3.msra.mxu0 %v10049_v63  ;;  %v10630_v63 = vld [vmem:[#allocation10 + $0x60] sm:$0xff] }
0x14e3   : > { %7283 = vmatprep.subr.mxu0 %v8960_v1 }
0x14e4   : > { %7284 = vmatpush3.msra.mxu0 %v10053_v5  ;;  %v10634_v5 = vld [vmem:[#allocation10 + $0x58] sm:$0xff] }
0x14e5   : > { %7285 = vmatprep.subr.mxu0 %v8960_v1 }
0x14e6   : > { %7286 = vmatpush3.msra.mxu0 %v10057_v6  ;;  %v10638_v6 = vld [vmem:[#allocation10 + $0x50] sm:$0xff] }
0x14e7   : > { %7325 = vmatprep.subr.mxu0 %v8960_v1 }
0x1587   : > { %v2627_v44 = vpop.f32.mrf.mxu0 }
0x1588   : > { %v10576_v46 = vadd.f32 %v10146_v52, %v2627_v44 }
0x1589   : > { %v7219_v47 = vpop.f32.mrf.mxu0 }
0x158a   : > { %v2633_v48 = vmul.f32 %v10573_v45, %v10576_v46 }
0x158c   : > { %v2634_v49 = vadd.f32 %v2633_v48, %v10462_v26 }
0x158e   : > { %7253 = vmatmul.mubr.f32.vlgmr.msra.gmra.mxu1 %v2634_v49 }
0x158f   : > { %7291 = vmatpush3.msra.mxu1 %v10465_v28  ;;  %7322 = vmatprep.mubr.msk.f32.mxu1 %vm8961_vm0, %v8960_v1 }
0x1590   : > { %7292 = vmatprep.subr.mxu1 %v8960_v1 }
0x1591   : > { %7293 = vmatpush3.msra.mxu1 %v10471_v30 }
0x1592   : > { %7294 = vmatprep.subr.mxu1 %v8960_v1 }
0x1593   : > { %7295 = vmatpush3.msra.mxu1 %v10475_v32 }
0x1594   : > { %7296 = vmatprep.subr.mxu1 %v8960_v1 }
0x1595   : > { %7297 = vmatpush3.msra.mxu1 %v10479_v33 }
0x1596   : > { %7298 = vmatprep.subr.mxu1 %v8960_v1 }
0x1597   : > { %7299 = vmatpush3.msra.mxu1 %v10483_v34 }
0x1598   : > { %7300 = vmatprep.subr.mxu1 %v8960_v1 }
0x1599   : > { %7301 = vmatpush3.msra.mxu1 %v10487_v37 }
0x159a   : > { %7302 = vmatprep.subr.mxu1 %v8960_v1 }
0x159b   : > { %7303 = vmatpush3.msra.mxu1 %v10491_v43 }
0x159c   : > { %7304 = vmatprep.subr.mxu1 %v8960_v1 }
0x159d   : > { %7305 = vmatpush3.msra.mxu1 %v10495_v8 }
0x159e   : > { %7306 = vmatprep.subr.mxu1 %v8960_v1 }
0x159f   : > { %7307 = vmatpush3.msra.mxu1 %v10499_v10 }
0x15a0   : > { %7308 = vmatprep.subr.mxu1 %v8960_v1 }
0x15a1   : > { %7309 = vmatpush3.msra.mxu1 %v10503_v12 }
0x15a2   : > { %7310 = vmatprep.subr.mxu1 %v8960_v1 }
0x15a3   : > { %7311 = vmatpush3.msra.mxu1 %v10507_v14 }
0x15a4   : > { %7312 = vmatprep.subr.mxu1 %v8960_v1 }
0x15a5   : > { %7313 = vmatpush3.msra.mxu1 %v10511_v16 }
0x15a6   : > { %7314 = vmatprep.subr.mxu1 %v8960_v1 }
0x15a7   : > { %7315 = vmatpush3.msra.mxu1 %v10515_v0 }
0x15a8   : > { %7316 = vmatprep.subr.mxu1 %v8960_v1 }
0x15a9   : > { %7317 = vmatpush3.msra.mxu1 %v10519_v2 }
0x15aa   : > { %7318 = vmatprep.subr.mxu1 %v8960_v1 }
0x15ab   : > { %7319 = vmatpush3.msra.mxu1 %v10523_v3 }
0x15ac   : > { %7320 = vmatprep.subr.mxu1 %v8960_v1 }
0x15ad   : > { %7321 = vmatpush3.msra.mxu1 %v10527_v4 }
0x15ae   : > { %7360 = vmatprep.subr.mxu1 %v8960_v1 }
0x164e   : > { %v2701_v50 = vpop.f32.mrf.mxu1 }
0x164f   : > { %v2702_v51 = vadd.f32 %v10105_v9, %v2701_v50  ;;  %v10642_v9 = vld [vmem:[#allocation10 + $0x48] sm:$0xff] }
0x1650   : > { %v7254_v57 = vpop.f32.mrf.mxu1 }
0x1651   : > { %8487 = vtanh.f32 %v2702_v51  ;;  %v3071_v57 = vstv %s3065_s5  ;;  %s4823_s5 = smul.f32 0.16666667, %s11616_s21 }
0x165e   : > { %v8488_v59 = vpop.eup %8487 }
0x165f   : > { %7288 = vmatmul.mubr.f32.vlgmr.msra.gmra.mxu0 %v8488_v59 }
0x1660   : > { %7326 = vmatpush3.msra.mxu0 %v10616_v60  ;;  %7357 = vmatprep.mubr.msk.f32.mxu0 %vm8961_vm0, %v8960_v1 }
0x1661   : > { %7327 = vmatprep.subr.mxu0 %v8960_v1 }
0x1662   : > { %7328 = vmatpush3.msra.mxu0 %v10622_v61 }
0x1663   : > { %7329 = vmatprep.subr.mxu0 %v8960_v1 }
0x1664   : > { %7330 = vmatpush3.msra.mxu0 %v10626_v62 }
0x1665   : > { %7331 = vmatprep.subr.mxu0 %v8960_v1 }
0x1666   : > { %7332 = vmatpush3.msra.mxu0 %v10630_v63 }
0x1667   : > { %7333 = vmatprep.subr.mxu0 %v8960_v1 }
0x1668   : > { %7334 = vmatpush3.msra.mxu0 %v10634_v5 }
0x1669   : > { %7335 = vmatprep.subr.mxu0 %v8960_v1 }
0x166a   : > { %7336 = vmatpush3.msra.mxu0 %v10638_v6 }
0x166b   : > { %7337 = vmatprep.subr.mxu0 %v8960_v1 }
0x166c   : > { %7338 = vmatpush3.msra.mxu0 %v10642_v9 }
0x166d   : > { %7339 = vmatprep.subr.mxu0 %v8960_v1 }
0x166e   : > { %7340 = vmatpush3.msra.mxu0 %v10646_v15 }
0x166f   : > { %7341 = vmatprep.subr.mxu0 %v8960_v1 }
0x1670   : > { %7342 = vmatpush3.msra.mxu0 %v10650_v17 }
0x1671   : > { %7343 = vmatprep.subr.mxu0 %v8960_v1 }
0x1672   : > { %7344 = vmatpush3.msra.mxu0 %v10654_v53 }
0x1673   : > { %7345 = vmatprep.subr.mxu0 %v8960_v1 }
0x1674   : > { %7346 = vmatpush3.msra.mxu0 %v10658_v54 }
0x1675   : > { %7347 = vmatprep.subr.mxu0 %v8960_v1 }
0x1676   : > { %7348 = vmatpush3.msra.mxu0 %v10662_v56 }
0x1677   : > { %7349 = vmatprep.subr.mxu0 %v8960_v1 }
0x1678   : > { %7350 = vmatpush3.msra.mxu0 %v10666_v35 }
0x1679   : > { %7351 = vmatprep.subr.mxu0 %v8960_v1 }
0x167a   : > { %7352 = vmatpush3.msra.mxu0 %v10670_v36 }
0x167b   : > { %7353 = vmatprep.subr.mxu0 %v8960_v1 }
0x167c   : > { %7354 = vmatpush3.msra.mxu0 %v10674_v18 }
0x167d   : > { %7355 = vmatprep.subr.mxu0 %v8960_v1 }
0x167e   : > { %7356 = vmatpush3.msra.mxu0 %v10678_v38 }
0x167f   : > { %7395 = vmatprep.subr.mxu0 %v8960_v1 }
0x171f   : > { %v2772_v39 = vpop.f32.mrf.mxu0 }
0x1720   : > { %v10683_v40 = vadd.f32 %v10146_v52, %v2772_v39 }
0x1721   : > { %v7289_v41 = vpop.f32.mrf.mxu0 }
0x1722   : > { %v2776_v42 = vmul.f32 %v10683_v40, %v10573_v45  ;;  %v3066_v29 = vmul.f32 2.0, %v10683_v40 }
0x1724   : > { %v2777_v19 = vadd.f32 %v2776_v42, %v10462_v26  ;;  %v3067_v58 = vadd.f32 %v3066_v29, %v10576_v46 }
0x1726   : > { %7323 = vmatmul.mubr.f32.vlgmr.msra.gmra.mxu1 %v2777_v19 }
0x1727   : > { %7361 = vmatpush3.msra.mxu1 %v10465_v28  ;;  %7392 = vmatprep.mubr.msk.f32.mxu1 %vm8961_vm0, %v8960_v1 }
0x1728   : > { %7362 = vmatprep.subr.mxu1 %v8960_v1 }
0x1729   : > { %7363 = vmatpush3.msra.mxu1 %v10471_v30 }
0x172a   : > { %7364 = vmatprep.subr.mxu1 %v8960_v1 }
0x172b   : > { %7365 = vmatpush3.msra.mxu1 %v10475_v32 }
0x172c   : > { %7366 = vmatprep.subr.mxu1 %v8960_v1 }
0x172d   : > { %7367 = vmatpush3.msra.mxu1 %v10479_v33 }
0x172e   : > { %7368 = vmatprep.subr.mxu1 %v8960_v1 }
0x172f   : > { %7369 = vmatpush3.msra.mxu1 %v10483_v34 }
0x1730   : > { %7370 = vmatprep.subr.mxu1 %v8960_v1 }
0x1731   : > { %7371 = vmatpush3.msra.mxu1 %v10487_v37 }
0x1732   : > { %7372 = vmatprep.subr.mxu1 %v8960_v1 }
0x1733   : > { %7373 = vmatpush3.msra.mxu1 %v10491_v43 }
0x1734   : > { %7374 = vmatprep.subr.mxu1 %v8960_v1 }
0x1735   : > { %7375 = vmatpush3.msra.mxu1 %v10495_v8 }
0x1736   : > { %7376 = vmatprep.subr.mxu1 %v8960_v1 }
0x1737   : > { %7377 = vmatpush3.msra.mxu1 %v10499_v10 }
0x1738   : > { %7378 = vmatprep.subr.mxu1 %v8960_v1 }
0x1739   : > { %7379 = vmatpush3.msra.mxu1 %v10503_v12 }
0x173a   : > { %7380 = vmatprep.subr.mxu1 %v8960_v1 }
0x173b   : > { %7381 = vmatpush3.msra.mxu1 %v10507_v14 }
0x173c   : > { %7382 = vmatprep.subr.mxu1 %v8960_v1 }
0x173d   : > { %7383 = vmatpush3.msra.mxu1 %v10511_v16 }
0x173e   : > { %7384 = vmatprep.subr.mxu1 %v8960_v1 }
0x173f   : > { %7385 = vmatpush3.msra.mxu1 %v10515_v0 }
0x1740   : > { %7386 = vmatprep.subr.mxu1 %v8960_v1 }
0x1741   : > { %7387 = vmatpush3.msra.mxu1 %v10519_v2 }
0x1742   : > { %7388 = vmatprep.subr.mxu1 %v8960_v1 }
0x1743   : > { %7389 = vmatpush3.msra.mxu1 %v10523_v3 }
0x1744   : > { %7390 = vmatprep.subr.mxu1 %v8960_v1 }
0x1745   : > { %7391 = vmatpush3.msra.mxu1 %v10527_v4 }
0x1746   : > { %7430 = vmatprep.subr.mxu1 %v8960_v1 }
0x17e6   : > { %v2844_v52 = vpop.f32.mrf.mxu1 }
0x17e7   : > { %v2845_v23 = vadd.f32 %v10725_v21, %v2844_v52 }
0x17e8   : > { %v7324_v25 = vpop.f32.mrf.mxu1 }
0x17e9   : > { %8489 = vtanh.f32 %v2845_v23  ;;  %v10926_v25 = vstv %s3217_s22  ;;  %s587_s22 = scalar_lea.vmem [#allocation17], %s9262_s10 }
0x17ea   : > { %s5047_s23 = sshll.u32 %s587_s22, 4  ;;  %s5048_s23 = int_to_ptr.vmem [resolvable:$true] %s5047_s23 }
0x17eb   : > { %s8834_s29 = scalar_lea.vmem %s5048_s23, 128 }
0x17ec   : > { %p8835_p2 = scmp.ne.s32.totalorder %s5048_s23, %s8834_s29 }
0x17ee   : > { %p8836_p1 = pnand %p8835_p2, %p11925_p8 }
0x17f0   : > { %p8837_p6 = pneg %p8836_p1 }
0x17f6   : > { %v8490_v27 = vpop.eup %8489 }
0x17f7   : > { %7358 = vmatmul.mubr.f32.vlgmr.msra.gmra.mxu0 %v8490_v27 }
0x17f8   : > { %7396 = vmatpush3.msra.mxu0 %v10616_v60  ;;  %7427 = vmatprep.mubr.msk.f32.mxu0 %vm8961_vm0, %v8960_v1 }
0x17f9   : > { %7397 = vmatprep.subr.mxu0 %v8960_v1 }
0x17fa   : > { %7398 = vmatpush3.msra.mxu0 %v10622_v61 }
0x17fb   : > { %7399 = vmatprep.subr.mxu0 %v8960_v1 }
0x17fc   : > { %7400 = vmatpush3.msra.mxu0 %v10626_v62 }
0x17fd   : > { %7401 = vmatprep.subr.mxu0 %v8960_v1 }
0x17fe   : > { %7402 = vmatpush3.msra.mxu0 %v10630_v63 }
0x17ff   : > { %7403 = vmatprep.subr.mxu0 %v8960_v1 }
0x1800   : > { %7404 = vmatpush3.msra.mxu0 %v10634_v5 }
0x1801   : > { %7405 = vmatprep.subr.mxu0 %v8960_v1 }
0x1802   : > { %7406 = vmatpush3.msra.mxu0 %v10638_v6 }
0x1803   : > { %7407 = vmatprep.subr.mxu0 %v8960_v1 }
0x1804   : > { %7408 = vmatpush3.msra.mxu0 %v10642_v9 }
0x1805   : > { %7409 = vmatprep.subr.mxu0 %v8960_v1 }
0x1806   : > { %7410 = vmatpush3.msra.mxu0 %v10646_v15 }
0x1807   : > { %7411 = vmatprep.subr.mxu0 %v8960_v1 }
0x1808   : > { %7412 = vmatpush3.msra.mxu0 %v10650_v17 }
0x1809   : > { %7413 = vmatprep.subr.mxu0 %v8960_v1 }
0x180a   : > { %7414 = vmatpush3.msra.mxu0 %v10654_v53 }
0x180b   : > { %7415 = vmatprep.subr.mxu0 %v8960_v1 }
0x180c   : > { %7416 = vmatpush3.msra.mxu0 %v10658_v54 }
0x180d   : > { %7417 = vmatprep.subr.mxu0 %v8960_v1 }
0x180e   : > { %7418 = vmatpush3.msra.mxu0 %v10662_v56 }
0x180f   : > { %7419 = vmatprep.subr.mxu0 %v8960_v1 }
0x1810   : > { %7420 = vmatpush3.msra.mxu0 %v10666_v35 }
0x1811   : > { %7421 = vmatprep.subr.mxu0 %v8960_v1 }
0x1812   : > { %7422 = vmatpush3.msra.mxu0 %v10670_v36 }
0x1813   : > { %7423 = vmatprep.subr.mxu0 %v8960_v1 }
0x1814   : > { %7424 = vmatpush3.msra.mxu0 %v10674_v18 }
0x1815   : > { %7425 = vmatprep.subr.mxu0 %v8960_v1 }
0x1816   : > { %7426 = vmatpush3.msra.mxu0 %v10678_v38 }
0x1817   : > { %7465 = vmatprep.subr.mxu0 %v8960_v1 }
0x18b7   : > { %v2915_v31 = vpop.f32.mrf.mxu0 }
0x18b8   : > { %v2916_v24 = vadd.f32 %v10767_v22, %v2915_v31 }
0x18b9   : > { %v7359_v7 = vpop.f32.mrf.mxu0 }
0x18ba   : > { %v2920_v11 = vmul.f32 %v2919_v20, %v2916_v24  ;;  %v3068_v13 = vmul.f32 2.0, %v2916_v24 }
0x18bc   : > { %v2921_v44 = vadd.f32 %v2920_v11, %v10462_v26  ;;  %v10772_v45 = vadd.f32 %v3068_v13, %v3067_v58 }
0x18be   : > { %7393 = vmatmul.mubr.f32.vlgmr.msra.gmra.mxu1 %v2921_v44 }
0x18bf   : > { %7431 = vmatpush3.msra.mxu1 %v10465_v28  ;;  %7462 = vmatprep.mubr.msk.f32.mxu1 %vm8961_vm0, %v8960_v1 }
0x18c0   : > { %7432 = vmatprep.subr.mxu1 %v8960_v1 }
0x18c1   : > { %7433 = vmatpush3.msra.mxu1 %v10471_v30 }
0x18c2   : > { %7434 = vmatprep.subr.mxu1 %v8960_v1 }
0x18c3   : > { %7435 = vmatpush3.msra.mxu1 %v10475_v32 }
0x18c4   : > { %7436 = vmatprep.subr.mxu1 %v8960_v1 }
0x18c5   : > { %7437 = vmatpush3.msra.mxu1 %v10479_v33 }
0x18c6   : > { %7438 = vmatprep.subr.mxu1 %v8960_v1 }
0x18c7   : > { %7439 = vmatpush3.msra.mxu1 %v10483_v34 }
0x18c8   : > { %7440 = vmatprep.subr.mxu1 %v8960_v1 }
0x18c9   : > { %7441 = vmatpush3.msra.mxu1 %v10487_v37 }
0x18ca   : > { %7442 = vmatprep.subr.mxu1 %v8960_v1 }
0x18cb   : > { %7443 = vmatpush3.msra.mxu1 %v10491_v43 }
0x18cc   : > { %7444 = vmatprep.subr.mxu1 %v8960_v1 }
0x18cd   : > { %7445 = vmatpush3.msra.mxu1 %v10495_v8 }
0x18ce   : > { %7446 = vmatprep.subr.mxu1 %v8960_v1 }
0x18cf   : > { %7447 = vmatpush3.msra.mxu1 %v10499_v10 }
0x18d0   : > { %7448 = vmatprep.subr.mxu1 %v8960_v1 }
0x18d1   : > { %7449 = vmatpush3.msra.mxu1 %v10503_v12 }
0x18d2   : > { %7450 = vmatprep.subr.mxu1 %v8960_v1 }
0x18d3   : > { %7451 = vmatpush3.msra.mxu1 %v10507_v14 }
0x18d4   : > { %7452 = vmatprep.subr.mxu1 %v8960_v1 }
0x18d5   : > { %7453 = vmatpush3.msra.mxu1 %v10511_v16 }
0x18d6   : > { %7454 = vmatprep.subr.mxu1 %v8960_v1 }
0x18d7   : > { %7455 = vmatpush3.msra.mxu1 %v10515_v0 }
0x18d8   : > { %7456 = vmatprep.subr.mxu1 %v8960_v1 }
0x18d9   : > { %7457 = vmatpush3.msra.mxu1 %v10519_v2 }
0x18da   : > { %7458 = vmatprep.subr.mxu1 %v8960_v1 }
0x18db   : > { %7459 = vmatpush3.msra.mxu1 %v10523_v3 }
0x18dc   : > { %7460 = vmatprep.subr.mxu1 %v8960_v1 }
0x18dd   : > { %7461 = vmatpush3.msra.mxu1 %v10527_v4 }
0x18de   : > { %7500 = vmatprep.subr.mxu1 %v8960_v1 }
0x197e   : > { %v2988_v46 = vpop.f32.mrf.mxu1 }
0x197f   : > { %v2989_v47 = vadd.f32 %v10725_v21, %v2988_v46 }
0x1980   : > { %v7394_v48 = vpop.f32.mrf.mxu1 }
0x1981   : > { %8491 = vtanh.f32 %v2989_v47  ;;  %v11095_v48 = vld [vmem:[#allocation9 + $0x68] sm:$0xff] }
0x198e   : > { %v8492_v49 = vpop.eup %8491 }
0x198f   : > { %7428 = vmatmul.mubr.f32.vlgmr.msra.gmra.mxu0 %v8492_v49  ;;  %v11099_v49 = vld [vmem:[#allocation9 + $0x60] sm:$0xff] }
0x1990   : > { %7466 = vmatpush3.msra.mxu0 %v10616_v60  ;;  %7497 = vmatprep.mubr.msk.f32.mxu0 %vm8961_vm0, %v8960_v1 }
0x1991   : > { %7467 = vmatprep.subr.mxu0 %v8960_v1 }
0x1992   : > { %7468 = vmatpush3.msra.mxu0 %v10622_v61 }
0x1993   : > { %7469 = vmatprep.subr.mxu0 %v8960_v1 }
0x1994   : > { %7470 = vmatpush3.msra.mxu0 %v10626_v62 }
0x1995   : > { %7471 = vmatprep.subr.mxu0 %v8960_v1 }
0x1996   : > { %7472 = vmatpush3.msra.mxu0 %v10630_v63 }
0x1997   : > { %7473 = vmatprep.subr.mxu0 %v8960_v1 }
0x1998   : > { %7474 = vmatpush3.msra.mxu0 %v10634_v5 }
0x1999   : > { %7475 = vmatprep.subr.mxu0 %v8960_v1 }
0x199a   : > { %7476 = vmatpush3.msra.mxu0 %v10638_v6 }
0x199b   : > { %7477 = vmatprep.subr.mxu0 %v8960_v1 }
0x199c   : > { %7478 = vmatpush3.msra.mxu0 %v10642_v9 }
0x199d   : > { %7479 = vmatprep.subr.mxu0 %v8960_v1 }
0x199e   : > { %7480 = vmatpush3.msra.mxu0 %v10646_v15 }
0x199f   : > { %7481 = vmatprep.subr.mxu0 %v8960_v1 }
0x19a0   : > { %7482 = vmatpush3.msra.mxu0 %v10650_v17 }
0x19a1   : > { %7483 = vmatprep.subr.mxu0 %v8960_v1 }
0x19a2   : > { %7484 = vmatpush3.msra.mxu0 %v10654_v53 }
0x19a3   : > { %7485 = vmatprep.subr.mxu0 %v8960_v1 }
0x19a4   : > { %7486 = vmatpush3.msra.mxu0 %v10658_v54 }
0x19a5   : > { %7487 = vmatprep.subr.mxu0 %v8960_v1 }
0x19a6   : > { %7488 = vmatpush3.msra.mxu0 %v10662_v56 }
0x19a7   : > { %7489 = vmatprep.subr.mxu0 %v8960_v1 }
0x19a8   : > { %7490 = vmatpush3.msra.mxu0 %v10666_v35 }
0x19a9   : > { %7491 = vmatprep.subr.mxu0 %v8960_v1 }
0x19aa   : > { %7492 = vmatpush3.msra.mxu0 %v10670_v36 }
0x19ab   : > { %7493 = vmatprep.subr.mxu0 %v8960_v1 }
0x19ac   : > { %7494 = vmatpush3.msra.mxu0 %v10674_v18 }
0x19ad   : > { %7495 = vmatprep.subr.mxu0 %v8960_v1 }
0x19ae   : > { %7496 = vmatpush3.msra.mxu0 %v10678_v38 }
0x19af   : > { %7535 = vmatprep.subr.mxu0 %v8960_v1 }
0x1a4f   : > { %v3059_v50 = vpop.f32.mrf.mxu0 }
0x1a50   : > { %v3060_v51 = vadd.f32 %v10767_v22, %v3059_v50  ;;  %v11103_v50 = vld [vmem:[#allocation9 + $0x58] sm:$0xff] }
0x1a51   : > { %v7429_v59 = vpop.f32.mrf.mxu0 }
0x1a52   : > { %v3070_v39 = vadd.f32 %v10772_v45, %v3060_v51  ;;  %v11107_v51 = vld [vmem:[#allocation9 + $0x50] sm:$0xff]  ;;  %v11115_v59 = vld [vmem:[#allocation9 + $0x40] sm:$0xff] }
0x1a54   : > { %v3072_v40 = vmul.f32 %v3071_v57, %v3070_v39  ;;  %v11111_v57 = vld [vmem:[#allocation9 + $0x48] sm:$0xff]  ;;  %v11119_v39 = vld [vmem:[#allocation9 + $0x38] sm:$0xff] }
0x1a56   : > { %v10847_v41 = vadd.f32 %v3072_v40, %v10462_v26  ;;  %v11123_v40 = vld [vmem:[#allocation9 + $0x30] sm:$0xff] }
0x1a58   : > { %7463 = vmatmul.mubr.f32.vlgmr.msra.gmra.mxu1 %v10847_v41 }
0x1a59   : > { %7501 = vmatpush3.msra.mxu1 %v10465_v28  ;;  %7532 = vmatprep.mubr.msk.f32.mxu1 %vm8961_vm0, %v8960_v1 }
0x1a5a   : > { %7502 = vmatprep.subr.mxu1 %v8960_v1 }
0x1a5b   : > { %7503 = vmatpush3.msra.mxu1 %v10471_v30 }
0x1a5c   : > { %7504 = vmatprep.subr.mxu1 %v8960_v1 }
0x1a5d   : > { %7505 = vmatpush3.msra.mxu1 %v10475_v32 }
0x1a5e   : > { %7506 = vmatprep.subr.mxu1 %v8960_v1 }
0x1a5f   : > { %7507 = vmatpush3.msra.mxu1 %v10479_v33 }
0x1a60   : > { %7508 = vmatprep.subr.mxu1 %v8960_v1 }
0x1a61   : > { %7509 = vmatpush3.msra.mxu1 %v10483_v34 }
0x1a62   : > { %7510 = vmatprep.subr.mxu1 %v8960_v1 }
0x1a63   : > { %7511 = vmatpush3.msra.mxu1 %v10487_v37 }
0x1a64   : > { %7512 = vmatprep.subr.mxu1 %v8960_v1 }
0x1a65   : > { %7513 = vmatpush3.msra.mxu1 %v10491_v43 }
0x1a66   : > { %7514 = vmatprep.subr.mxu1 %v8960_v1 }
0x1a67   : > { %7515 = vmatpush3.msra.mxu1 %v10495_v8 }
0x1a68   : > { %7516 = vmatprep.subr.mxu1 %v8960_v1 }
0x1a69   : > { %7517 = vmatpush3.msra.mxu1 %v10499_v10 }
0x1a6a   : > { %7518 = vmatprep.subr.mxu1 %v8960_v1 }
0x1a6b   : > { %7519 = vmatpush3.msra.mxu1 %v10503_v12 }
0x1a6c   : > { %7520 = vmatprep.subr.mxu1 %v8960_v1 }
0x1a6d   : > { %7521 = vmatpush3.msra.mxu1 %v10507_v14 }
0x1a6e   : > { %7522 = vmatprep.subr.mxu1 %v8960_v1 }
0x1a6f   : > { %7523 = vmatpush3.msra.mxu1 %v10511_v16 }
0x1a70   : > { %7524 = vmatprep.subr.mxu1 %v8960_v1 }
0x1a71   : > { %7525 = vmatpush3.msra.mxu1 %v10515_v0 }
0x1a72   : > { %7526 = vmatprep.subr.mxu1 %v8960_v1 }
0x1a73   : > { %7527 = vmatpush3.msra.mxu1 %v10519_v2 }
0x1a74   : > { %7528 = vmatprep.subr.mxu1 %v8960_v1 }
0x1a75   : > { %7529 = vmatpush3.msra.mxu1 %v10523_v3 }
0x1a76   : > { %7530 = vmatprep.subr.mxu1 %v8960_v1 }
0x1a77   : > { %7531 = vmatpush3.msra.mxu1 %v10527_v4 }
0x1a78   : > { %7570 = vmatprep.subr.mxu1 %v8960_v1 }
0x1b18   : > { %v3142_v26 = vpop.f32.mrf.mxu1 }
0x1b19   : > { %v3143_v42 = vadd.f32 %v10725_v21, %v3142_v26  ;;  %v11127_v26 = vld [vmem:[#allocation9 + $0x28] sm:$0xff] }
0x1b1a   : > { %v7464_v19 = vpop.f32.mrf.mxu1 }
0x1b1b   : > { %8493 = vtanh.f32 %v3143_v42  ;;  %v11131_v42 = vld [vmem:[#allocation9 + $0x20] sm:$0xff]  ;;  %v11135_v19 = vld [vmem:[#allocation9 + $0x18] sm:$0xff] }
0x1b28   : > { %v8494_v52 = vpop.eup %8493 }
0x1b29   : > { %7498 = vmatmul.mubr.f32.vlgmr.msra.gmra.mxu0 %v8494_v52  ;;  %v11139_v52 = vld [vmem:[#allocation9 + $0x10] sm:$0xff] }
0x1b2a   : > { %7536 = vmatpush3.msra.mxu0 %v10616_v60  ;;  %7567 = vmatprep.mubr.msk.f32.mxu0 %vm8961_vm0, %v8960_v1 }
0x1b2b   : > { %7537 = vmatprep.subr.mxu0 %v8960_v1 }
0x1b2c   : > { %7538 = vmatpush3.msra.mxu0 %v10622_v61 }
0x1b2d   : > { %7539 = vmatprep.subr.mxu0 %v8960_v1 }
0x1b2e   : > { %7540 = vmatpush3.msra.mxu0 %v10626_v62 }
0x1b2f   : > { %7541 = vmatprep.subr.mxu0 %v8960_v1 }
0x1b30   : > { %7542 = vmatpush3.msra.mxu0 %v10630_v63 }
0x1b31   : > { %7543 = vmatprep.subr.mxu0 %v8960_v1 }
0x1b32   : > { %7544 = vmatpush3.msra.mxu0 %v10634_v5 }
0x1b33   : > { %7545 = vmatprep.subr.mxu0 %v8960_v1 }
0x1b34   : > { %7546 = vmatpush3.msra.mxu0 %v10638_v6 }
0x1b35   : > { %7547 = vmatprep.subr.mxu0 %v8960_v1 }
0x1b36   : > { %7548 = vmatpush3.msra.mxu0 %v10642_v9 }
0x1b37   : > { %7549 = vmatprep.subr.mxu0 %v8960_v1 }
0x1b38   : > { %7550 = vmatpush3.msra.mxu0 %v10646_v15 }
0x1b39   : > { %7551 = vmatprep.subr.mxu0 %v8960_v1 }
0x1b3a   : > { %7552 = vmatpush3.msra.mxu0 %v10650_v17 }
0x1b3b   : > { %7553 = vmatprep.subr.mxu0 %v8960_v1 }
0x1b3c   : > { %7554 = vmatpush3.msra.mxu0 %v10654_v53 }
0x1b3d   : > { %7555 = vmatprep.subr.mxu0 %v8960_v1 }
0x1b3e   : > { %7556 = vmatpush3.msra.mxu0 %v10658_v54 }
0x1b3f   : > { %7557 = vmatprep.subr.mxu0 %v8960_v1 }
0x1b40   : > { %7558 = vmatpush3.msra.mxu0 %v10662_v56 }
0x1b41   : > { %7559 = vmatprep.subr.mxu0 %v8960_v1 }
0x1b42   : > { %7560 = vmatpush3.msra.mxu0 %v10666_v35 }
0x1b43   : > { %7561 = vmatprep.subr.mxu0 %v8960_v1 }
0x1b44   : > { %7562 = vmatpush3.msra.mxu0 %v10670_v36 }
0x1b45   : > { %7563 = vmatprep.subr.mxu0 %v8960_v1 }
0x1b46   : > { %7564 = vmatpush3.msra.mxu0 %v10674_v18 }
0x1b47   : > { %7565 = vmatprep.subr.mxu0 %v8960_v1 }
0x1b48   : > { %7566 = vmatpush3.msra.mxu0 %v10678_v38 }
0x1b49   : > { %7605 = vmatprep.subr.mxu0 %v8960_v1 }
0x1be9   : > { %v3213_v23 = vpop.f32.mrf.mxu0 }
0x1bea   : > { %v10929_v27 = vadd.f32 %v10767_v22, %v3213_v23  ;;  %v11143_v23 = vld [vmem:[#allocation9 + $0x8] sm:$0xff] }
0x1beb   : > { %v7499_v29 = vpop.f32.mrf.mxu0 }
0x1bec   : > { %v3219_v31 = vmul.f32 %v10926_v25, %v10929_v27 }
0x1bee   : > { %v3220_v20 = vadd.f32 %v3219_v31, %v10847_v41 }
0x1bf0   : > { %7533 = vmatmul.mubr.f32.vlgmr.msra.gmra.mxu1 %v3220_v20 }
0x1bf1   : > { %7571 = vmatpush3.msra.mxu1 %v10465_v28  ;;  %7602 = vmatprep.mubr.msk.f32.mxu1 %vm8961_vm0, %v8960_v1 }
0x1bf2   : > { %7572 = vmatprep.subr.mxu1 %v8960_v1 }
0x1bf3   : > { %7573 = vmatpush3.msra.mxu1 %v10471_v30 }
0x1bf4   : > { %7574 = vmatprep.subr.mxu1 %v8960_v1 }
0x1bf5   : > { %7575 = vmatpush3.msra.mxu1 %v10475_v32 }
0x1bf6   : > { %7576 = vmatprep.subr.mxu1 %v8960_v1 }
0x1bf7   : > { %7577 = vmatpush3.msra.mxu1 %v10479_v33 }
0x1bf8   : > { %7578 = vmatprep.subr.mxu1 %v8960_v1 }
0x1bf9   : > { %7579 = vmatpush3.msra.mxu1 %v10483_v34 }
0x1bfa   : > { %7580 = vmatprep.subr.mxu1 %v8960_v1 }
0x1bfb   : > { %7581 = vmatpush3.msra.mxu1 %v10487_v37 }
0x1bfc   : > { %7582 = vmatprep.subr.mxu1 %v8960_v1 }
0x1bfd   : > { %7583 = vmatpush3.msra.mxu1 %v10491_v43 }
0x1bfe   : > { %7584 = vmatprep.subr.mxu1 %v8960_v1 }
0x1bff   : > { %7585 = vmatpush3.msra.mxu1 %v10495_v8 }
0x1c00   : > { %7586 = vmatprep.subr.mxu1 %v8960_v1 }
0x1c01   : > { %7587 = vmatpush3.msra.mxu1 %v10499_v10 }
0x1c02   : > { %7588 = vmatprep.subr.mxu1 %v8960_v1 }
0x1c03   : > { %7589 = vmatpush3.msra.mxu1 %v10503_v12 }
0x1c04   : > { %7590 = vmatprep.subr.mxu1 %v8960_v1 }
0x1c05   : > { %7591 = vmatpush3.msra.mxu1 %v10507_v14 }
0x1c06   : > { %7592 = vmatprep.subr.mxu1 %v8960_v1 }
0x1c07   : > { %7593 = vmatpush3.msra.mxu1 %v10511_v16 }
0x1c08   : > { %7594 = vmatprep.subr.mxu1 %v8960_v1 }
0x1c09   : > { %7595 = vmatpush3.msra.mxu1 %v10515_v0 }
0x1c0a   : > { %7596 = vmatprep.subr.mxu1 %v8960_v1 }
0x1c0b   : > { %7597 = vmatpush3.msra.mxu1 %v10519_v2 }
0x1c0c   : > { %7598 = vmatprep.subr.mxu1 %v8960_v1 }
0x1c0d   : > { %7599 = vmatpush3.msra.mxu1 %v10523_v3 }
0x1c0e   : > { %7600 = vmatprep.subr.mxu1 %v8960_v1 }
0x1c0f   : > { %7601 = vmatpush3.msra.mxu1 %v10527_v4 }
0x1c10   : > { %7640 = vmatprep.subr.mxu1 %v8960_v1 }
0x1cb0   : > { %v3287_v24 = vpop.f32.mrf.mxu1 }
0x1cb1   : > { %v3288_v7 = vadd.f32 %v10725_v21, %v3287_v24  ;;  %v11258_v24 = vld [vmem:[#allocation10 + $0x40] sm:$0xff] }
0x1cb2   : > { %v7534_v58 = vpop.f32.mrf.mxu1 }
0x1cb3   : > { %8495 = vtanh.f32 %v3288_v7  ;;  %v11262_v7 = vld [vmem:[#allocation10 + $0x38] sm:$0xff]  ;;  %v11266_v58 = vld [vmem:[#allocation10 + $0x30] sm:$0xff] }
0x1cc0   : > { %v8496_v11 = vpop.eup %8495 }
0x1cc1   : > { %7568 = vmatmul.mubr.f32.vlgmr.msra.gmra.mxu0 %v8496_v11  ;;  %v11270_v11 = vld [vmem:[#allocation10 + $0x28] sm:$0xff] }
0x1cc2   : > { %7606 = vmatpush3.msra.mxu0 %v10616_v60  ;;  %7637 = vmatprep.mubr.msk.f32.mxu0 %vm8961_vm0, %v8960_v1 }
0x1cc3   : > { %7607 = vmatprep.subr.mxu0 %v8960_v1 }
0x1cc4   : > { %7608 = vmatpush3.msra.mxu0 %v10622_v61 }
0x1cc5   : > { %7609 = vmatprep.subr.mxu0 %v8960_v1 }
0x1cc6   : > { %7610 = vmatpush3.msra.mxu0 %v10626_v62 }
0x1cc7   : > { %7611 = vmatprep.subr.mxu0 %v8960_v1 }
0x1cc8   : > { %7612 = vmatpush3.msra.mxu0 %v10630_v63 }
0x1cc9   : > { %7613 = vmatprep.subr.mxu0 %v8960_v1 }
0x1cca   : > { %7614 = vmatpush3.msra.mxu0 %v10634_v5 }
0x1ccb   : > { %7615 = vmatprep.subr.mxu0 %v8960_v1 }
0x1ccc   : > { %7616 = vmatpush3.msra.mxu0 %v10638_v6 }
0x1ccd   : > { %7617 = vmatprep.subr.mxu0 %v8960_v1 }
0x1cce   : > { %7618 = vmatpush3.msra.mxu0 %v10642_v9 }
0x1ccf   : > { %7619 = vmatprep.subr.mxu0 %v8960_v1 }
0x1cd0   : > { %7620 = vmatpush3.msra.mxu0 %v10646_v15 }
0x1cd1   : > { %7621 = vmatprep.subr.mxu0 %v8960_v1 }
0x1cd2   : > { %7622 = vmatpush3.msra.mxu0 %v10650_v17 }
0x1cd3   : > { %7623 = vmatprep.subr.mxu0 %v8960_v1 }
0x1cd4   : > { %7624 = vmatpush3.msra.mxu0 %v10654_v53 }
0x1cd5   : > { %7625 = vmatprep.subr.mxu0 %v8960_v1 }
0x1cd6   : > { %7626 = vmatpush3.msra.mxu0 %v10658_v54 }
0x1cd7   : > { %7627 = vmatprep.subr.mxu0 %v8960_v1 }
0x1cd8   : > { %7628 = vmatpush3.msra.mxu0 %v10662_v56 }
0x1cd9   : > { %7629 = vmatprep.subr.mxu0 %v8960_v1 }
0x1cda   : > { %7630 = vmatpush3.msra.mxu0 %v10666_v35 }
0x1cdb   : > { %7631 = vmatprep.subr.mxu0 %v8960_v1 }
0x1cdc   : > { %7632 = vmatpush3.msra.mxu0 %v10670_v36 }
0x1cdd   : > { %7633 = vmatprep.subr.mxu0 %v8960_v1 }
0x1cde   : > { %7634 = vmatpush3.msra.mxu0 %v10674_v18 }
0x1cdf   : > { %7635 = vmatprep.subr.mxu0 %v8960_v1 }
0x1ce0   : > { %7636 = vmatpush3.msra.mxu0 %v10678_v38 }
0x1ce1   : > { %7675 = vmatprep.subr.mxu0 %v8960_v1 }
0x1d81   : > { %v3358_v13 = vpop.f32.mrf.mxu0 }
0x1d82   : > { %v11004_v44 = vadd.f32 %v10767_v22, %v3358_v13  ;;  %v11274_v13 = vld [vmem:[#allocation10 + $0x20] sm:$0xff] }
0x1d83   : > { %v7569_v45 = vpop.f32.mrf.mxu0 }
0x1d84   : > { %v3362_v46 = vmul.f32 %v11004_v44, %v10926_v25  ;;  %v11147_v25 = vld [vmem:[#allocation9] sm:$0xff]  ;;  %v11282_v45 = vld [vmem:[#allocation10 + $0x10] sm:$0xff] }
0x1d86   : > { %v3363_v47 = vadd.f32 %v3362_v46, %v10847_v41  ;;  %v11286_v46 = vld [vmem:[#allocation10 + $0x8] sm:$0xff] }
0x1d88   : > { %7603 = vmatmul.mubr.f32.vlgmr.msra.gmra.mxu1 %v3363_v47  ;;  %v11290_v47 = vld [vmem:[#allocation10] sm:$0xff] }
0x1d89   : > { %7641 = vmatpush3.msra.mxu1 %v10465_v28  ;;  %7672 = vmatprep.mubr.msk.f32.mxu1 %vm8961_vm0, %v8960_v1 }
0x1d8a   : > { %7642 = vmatprep.subr.mxu1 %v8960_v1 }
0x1d8b   : > { %7643 = vmatpush3.msra.mxu1 %v10471_v30 }
0x1d8c   : > { %7644 = vmatprep.subr.mxu1 %v8960_v1 }
0x1d8d   : > { %7645 = vmatpush3.msra.mxu1 %v10475_v32 }
0x1d8e   : > { %7646 = vmatprep.subr.mxu1 %v8960_v1 }
0x1d8f   : > { %7647 = vmatpush3.msra.mxu1 %v10479_v33 }
0x1d90   : > { %7648 = vmatprep.subr.mxu1 %v8960_v1 }
0x1d91   : > { %7649 = vmatpush3.msra.mxu1 %v10483_v34  ;;  %v3652_v34 = vmul.f32 2.0, %v11004_v44  ;;  %v11278_v44 = vld [vmem:[#allocation10 + $0x18] sm:$0xff] }
0x1d92   : > { %7650 = vmatprep.subr.mxu1 %v8960_v1 }
0x1d93   : > { %7651 = vmatpush3.msra.mxu1 %v10487_v37 }
0x1d94   : > { %7652 = vmatprep.subr.mxu1 %v8960_v1 }
0x1d95   : > { %7653 = vmatpush3.msra.mxu1 %v10491_v43  ;;  %v3505_v43 = vstv %s10923_s27 }
0x1d96   : > { %7654 = vmatprep.subr.mxu1 %v8960_v1 }
0x1d97   : > { %7655 = vmatpush3.msra.mxu1 %v10495_v8 }
0x1d98   : > { %7656 = vmatprep.subr.mxu1 %v8960_v1 }
0x1d99   : > { %7657 = vmatpush3.msra.mxu1 %v10499_v10 }
0x1d9a   : > { %7658 = vmatprep.subr.mxu1 %v8960_v1 }
0x1d9b   : > { %7659 = vmatpush3.msra.mxu1 %v10503_v12  ;;  %v3653_v12 = vadd.f32 %v3652_v34, %v10929_v27 }
0x1d9c   : > { %7660 = vmatprep.subr.mxu1 %v8960_v1 }
0x1d9d   : > { %7661 = vmatpush3.msra.mxu1 %v10507_v14 }
0x1d9e   : > { %7662 = vmatprep.subr.mxu1 %v8960_v1 }
0x1d9f   : > { %7663 = vmatpush3.msra.mxu1 %v10511_v16 }
0x1da0   : > { %7664 = vmatprep.subr.mxu1 %v8960_v1 }
0x1da1   : > { %7665 = vmatpush3.msra.mxu1 %v10515_v0 }
0x1da2   : > { %7666 = vmatprep.subr.mxu1 %v8960_v1 }
0x1da3   : > { %7667 = vmatpush3.msra.mxu1 %v10519_v2 }
0x1da4   : > { %7668 = vmatprep.subr.mxu1 %v8960_v1 }
0x1da5   : > { %7669 = vmatpush3.msra.mxu1 %v10523_v3  ;;  %v11085_v3 = vld [vmem:[#allocation9 + $0x78] sm:$0xff] }
0x1da6   : > { %7670 = vmatprep.subr.mxu1 %v8960_v1 }
0x1da7   : > { %7671 = vmatpush3.msra.mxu1 %v10527_v4  ;;  %v11091_v4 = vld [vmem:[#allocation9 + $0x70] sm:$0xff] }
0x1da8   : > { %7710 = vmatprep.subr.mxu1 %v8960_v1 }
0x1e48   : > { %v3430_v28 = vpop.f32.mrf.mxu1 }
0x1e49   : > { %v3431_v30 = vadd.f32 %v10725_v21, %v3430_v28 }
0x1e4a   : > { %v7604_v32 = vpop.f32.mrf.mxu1 }
0x1e4b   : > { %8497 = vtanh.f32 %v3431_v30  ;;  %v11301_v30 = vstv %s3803_s7 }
0x1e58   : > { %v8498_v33 = vpop.eup %8497 }
0x1e59   : > { %7638 = vmatmul.mubr.f32.vlgmr.msra.gmra.mxu0 %v8498_v33 }
0x1e5a   : > { %7676 = vmatpush3.msra.mxu0 %v10616_v60  ;;  %7707 = vmatprep.mubr.msk.f32.mxu0 %vm8961_vm0, %v8960_v1 }
0x1e5b   : > { %7677 = vmatprep.subr.mxu0 %v8960_v1 }
0x1e5c   : > { %7678 = vmatpush3.msra.mxu0 %v10622_v61 }
0x1e5d   : > { %7679 = vmatprep.subr.mxu0 %v8960_v1 }
0x1e5e   : > { %7680 = vmatpush3.msra.mxu0 %v10626_v62 }
0x1e5f   : > { %7681 = vmatprep.subr.mxu0 %v8960_v1 }
0x1e60   : > { %7682 = vmatpush3.msra.mxu0 %v10630_v63 }
0x1e61   : > { %7683 = vmatprep.subr.mxu0 %v8960_v1 }
0x1e62   : > { %7684 = vmatpush3.msra.mxu0 %v10634_v5 }
0x1e63   : > { %7685 = vmatprep.subr.mxu0 %v8960_v1 }
0x1e64   : > { %7686 = vmatpush3.msra.mxu0 %v10638_v6 }
0x1e65   : > { %7687 = vmatprep.subr.mxu0 %v8960_v1 }
0x1e66   : > { %7688 = vmatpush3.msra.mxu0 %v10642_v9 }
0x1e67   : > { %7689 = vmatprep.subr.mxu0 %v8960_v1 }
0x1e68   : > { %7690 = vmatpush3.msra.mxu0 %v10646_v15 }
0x1e69   : > { %7691 = vmatprep.subr.mxu0 %v8960_v1 }
0x1e6a   : > { %7692 = vmatpush3.msra.mxu0 %v10650_v17 }
0x1e6b   : > { %7693 = vmatprep.subr.mxu0 %v8960_v1 }
0x1e6c   : > { %7694 = vmatpush3.msra.mxu0 %v10654_v53 }
0x1e6d   : > { %7695 = vmatprep.subr.mxu0 %v8960_v1 }
0x1e6e   : > { %7696 = vmatpush3.msra.mxu0 %v10658_v54 }
0x1e6f   : > { %7697 = vmatprep.subr.mxu0 %v8960_v1 }
0x1e70   : > { %7698 = vmatpush3.msra.mxu0 %v10662_v56 }
0x1e71   : > { %7699 = vmatprep.subr.mxu0 %v8960_v1 }
0x1e72   : > { %7700 = vmatpush3.msra.mxu0 %v10666_v35 }
0x1e73   : > { %7701 = vmatprep.subr.mxu0 %v8960_v1 }
0x1e74   : > { %7702 = vmatpush3.msra.mxu0 %v10670_v36 }
0x1e75   : > { %7703 = vmatprep.subr.mxu0 %v8960_v1 }
0x1e76   : > { %7704 = vmatpush3.msra.mxu0 %v10674_v18 }
0x1e77   : > { %7705 = vmatprep.subr.mxu0 %v8960_v1 }
0x1e78   : > { %7706 = vmatpush3.msra.mxu0 %v10678_v38 }
0x1e79   : > { %7745 = vmatprep.subr.mxu0 %v8960_v1 }
0x1f19   : > { %v3501_v37 = vpop.f32.mrf.mxu0 }
0x1f1a   : > { %v3502_v8 = vadd.f32 %v10767_v22, %v3501_v37 }
0x1f1b   : > { %v7639_v10 = vpop.f32.mrf.mxu0 }
0x1f1c   : > { %v3506_v14 = vmul.f32 %v3505_v43, %v3502_v8  ;;  %v3654_v16 = vmul.f32 2.0, %v3502_v8  ;;  %v11346_v43 = vld [vmem:[%s11875_s4] ss:$0 sm:$0xff] }
0x1f1e   : > { %v3507_v0 = vadd.f32 %v3506_v14, %v10847_v41  ;;  %v11083_v2 = vadd.f32 %v3654_v16, %v3653_v12  ;;  %v11386_v16 = vld [vmem:[%s11877_s6] ss:$0 sm:$0xff] }
0x1f20   : > { %7673 = vmatmul.mubr.f32.vlgmr.msra.gmra.mxu1 %v3507_v0 }
0x1f21   : > { %7711 = vmatpush3.msra.mxu1 %v11085_v3  ;;  %7742 = vmatprep.mubr.msk.f32.mxu1 %vm8961_vm0, %v8960_v1 }
0x1f22   : > { %7712 = vmatprep.subr.mxu1 %v8960_v1 }
0x1f23   : > { %7713 = vmatpush3.msra.mxu1 %v11091_v4 }
0x1f24   : > { %7714 = vmatprep.subr.mxu1 %v8960_v1 }
0x1f25   : > { %7715 = vmatpush3.msra.mxu1 %v11095_v48 }
0x1f26   : > { %7716 = vmatprep.subr.mxu1 %v8960_v1 }
0x1f27   : > { %7717 = vmatpush3.msra.mxu1 %v11099_v49 }
0x1f28   : > { %7718 = vmatprep.subr.mxu1 %v8960_v1 }
0x1f29   : > { %7719 = vmatpush3.msra.mxu1 %v11103_v50 }
0x1f2a   : > { %7720 = vmatprep.subr.mxu1 %v8960_v1 }
0x1f2b   : > { %7721 = vmatpush3.msra.mxu1 %v11107_v51 }
0x1f2c   : > { %7722 = vmatprep.subr.mxu1 %v8960_v1 }
0x1f2d   : > { %7723 = vmatpush3.msra.mxu1 %v11111_v57 }
0x1f2e   : > { %7724 = vmatprep.subr.mxu1 %v8960_v1 }
0x1f2f   : > { %7725 = vmatpush3.msra.mxu1 %v11115_v59 }
0x1f30   : > { %7726 = vmatprep.subr.mxu1 %v8960_v1 }
0x1f31   : > { %7727 = vmatpush3.msra.mxu1 %v11119_v39 }
0x1f32   : > { %7728 = vmatprep.subr.mxu1 %v8960_v1 }
0x1f33   : > { %7729 = vmatpush3.msra.mxu1 %v11123_v40 }
0x1f34   : > { %7730 = vmatprep.subr.mxu1 %v8960_v1 }
0x1f35   : > { %7731 = vmatpush3.msra.mxu1 %v11127_v26 }
0x1f36   : > { %7732 = vmatprep.subr.mxu1 %v8960_v1 }
0x1f37   : > { %7733 = vmatpush3.msra.mxu1 %v11131_v42 }
0x1f38   : > { %7734 = vmatprep.subr.mxu1 %v8960_v1 }
0x1f39   : > { %7735 = vmatpush3.msra.mxu1 %v11135_v19 }
0x1f3a   : > { %7736 = vmatprep.subr.mxu1 %v8960_v1 }
0x1f3b   : > { %7737 = vmatpush3.msra.mxu1 %v11139_v52 }
0x1f3c   : > { %7738 = vmatprep.subr.mxu1 %v8960_v1 }
0x1f3d   : > { %7739 = vmatpush3.msra.mxu1 %v11143_v23 }
0x1f3e   : > { %7740 = vmatprep.subr.mxu1 %v8960_v1 }
0x1f3f   : > { %7741 = vmatpush3.msra.mxu1 %v11147_v25 }
0x1f40   : > { %7780 = vmatprep.subr.mxu1 %v8960_v1 }
0x1fe0   : > { %v3574_v27 = vpop.f32.mrf.mxu1 }
0x1fe1   : > { %v3575_v29 = vadd.f32 %v10725_v21, %v3574_v27 }
0x1fe2   : > { %v7674_v31 = vpop.f32.mrf.mxu1 }
0x1fe3   : > { %8499 = vtanh.f32 %v3575_v29 }
0x1ff0   : > { %v8500_v20 = vpop.eup %8499 }
0x1ff1   : > { %7708 = vmatmul.mubr.f32.vlgmr.msra.gmra.mxu0 %v8500_v20 }
0x1ff2   : > { %7746 = vmatpush3.msra.mxu0 %v10616_v60  ;;  %7777 = vmatprep.mubr.msk.f32.mxu0 %vm8961_vm0, %v8960_v1 }
0x1ff3   : > { %7747 = vmatprep.subr.mxu0 %v8960_v1 }
0x1ff4   : > { %7748 = vmatpush3.msra.mxu0 %v10622_v61 }
0x1ff5   : > { %7749 = vmatprep.subr.mxu0 %v8960_v1 }
0x1ff6   : > { %7750 = vmatpush3.msra.mxu0 %v10626_v62  ;;  %v3657_v62 = vstv %s3651_s12  ;;  %s5268_s12 = sshll.u32 %s9055_s14, 7 }
0x1ff7   : > { %7751 = vmatprep.subr.mxu0 %v8960_v1  ;;  %s5045_s7 = scalar_lea.hbm %s11884_s13, %s5268_s12 }
0x1ff8   : > { %7752 = vmatpush3.msra.mxu0 %v10630_v63 }
0x1ff9   : > { %7753 = vmatprep.subr.mxu0 %v8960_v1 }
0x1ffa   : > { %7754 = vmatpush3.msra.mxu0 %v10634_v5 }
0x1ffb   : > { %7755 = vmatprep.subr.mxu0 %v8960_v1 }
0x1ffc   : > { %7756 = vmatpush3.msra.mxu0 %v10638_v6 }
0x1ffd   : > { %7757 = vmatprep.subr.mxu0 %v8960_v1 }
0x1ffe   : > { %7758 = vmatpush3.msra.mxu0 %v10642_v9 }
0x1fff   : > { %7759 = vmatprep.subr.mxu0 %v8960_v1 }
0x2000   : > { %7760 = vmatpush3.msra.mxu0 %v10646_v15 }
0x2001   : > { %7761 = vmatprep.subr.mxu0 %v8960_v1 }
0x2002   : > { %7762 = vmatpush3.msra.mxu0 %v10650_v17 }
0x2003   : > { %7763 = vmatprep.subr.mxu0 %v8960_v1 }
0x2004   : > { %7764 = vmatpush3.msra.mxu0 %v10654_v53 }
0x2005   : > { %7765 = vmatprep.subr.mxu0 %v8960_v1 }
0x2006   : > { %7766 = vmatpush3.msra.mxu0 %v10658_v54 }
0x2007   : > { %7767 = vmatprep.subr.mxu0 %v8960_v1 }
0x2008   : > { %7768 = vmatpush3.msra.mxu0 %v10662_v56  ;;  %v11228_v56 = vld [vmem:[#allocation10 + $0x78] sm:$0xff] }
0x2009   : > { %7769 = vmatprep.subr.mxu0 %v8960_v1 }
0x200a   : > { %7770 = vmatpush3.msra.mxu0 %v10666_v35  ;;  %v11234_v35 = vld [vmem:[#allocation10 + $0x70] sm:$0xff] }
0x200b   : > { %7771 = vmatprep.subr.mxu0 %v8960_v1 }
0x200c   : > { %7772 = vmatpush3.msra.mxu0 %v10670_v36  ;;  %v11238_v36 = vld [vmem:[#allocation10 + $0x68] sm:$0xff] }
0x200d   : > { %7773 = vmatprep.subr.mxu0 %v8960_v1 }
0x200e   : > { %7774 = vmatpush3.msra.mxu0 %v10674_v18  ;;  %v11242_v18 = vld [vmem:[#allocation10 + $0x60] sm:$0xff] }
0x200f   : > { %7775 = vmatprep.subr.mxu0 %v8960_v1 }
0x2010   : > { %7776 = vmatpush3.msra.mxu0 %v10678_v38  ;;  %v11246_v38 = vld [vmem:[#allocation10 + $0x58] sm:$0xff] }
0x2011   : > { %7815 = vmatprep.subr.mxu0 %v8960_v1 }
0x20b1   : > { %v3645_v60 = vpop.f32.mrf.mxu0 }
0x20b2   : > { %v3646_v61 = vadd.f32 %v10767_v22, %v3645_v60 }
0x20b3   : > { %v7709_v63 = vpop.f32.mrf.mxu0 }
0x20b4   : > { %v3656_v5 = vadd.f32 %v11083_v2, %v3646_v61 }
0x20b6   : > { %v3658_v6 = vmul.f32 %v3657_v62, %v3656_v5  ;;  %v4091_v5 = vstv %s11298_s0 }
0x20b8   : > { %v11190_v9 = vadd.f32 %v3658_v6, %v10847_v41  ;;  %v11254_v41 = vld [vmem:[#allocation10 + $0x48] sm:$0xff] }
0x20ba   : > { %7743 = vmatmul.mubr.f32.vlgmr.msra.gmra.mxu1 %v11190_v9 }
0x20bb   : > { %7781 = vmatpush3.msra.mxu1 %v11085_v3  ;;  %7812 = vmatprep.mubr.msk.f32.mxu1 %vm8961_vm0, %v8960_v1 }
0x20bc   : > { %7782 = vmatprep.subr.mxu1 %v8960_v1 }
0x20bd   : > { %7783 = vmatpush3.msra.mxu1 %v11091_v4 }
0x20be   : > { %7784 = vmatprep.subr.mxu1 %v8960_v1 }
0x20bf   : > { %7785 = vmatpush3.msra.mxu1 %v11095_v48 }
0x20c0   : > { %7786 = vmatprep.subr.mxu1 %v8960_v1 }
0x20c1   : > { %7787 = vmatpush3.msra.mxu1 %v11099_v49 }
0x20c2   : > { %7788 = vmatprep.subr.mxu1 %v8960_v1 }
0x20c3   : > { %7789 = vmatpush3.msra.mxu1 %v11103_v50 }
0x20c4   : > { %7790 = vmatprep.subr.mxu1 %v8960_v1 }
0x20c5   : > { %7791 = vmatpush3.msra.mxu1 %v11107_v51 }
0x20c6   : > { %7792 = vmatprep.subr.mxu1 %v8960_v1 }
0x20c7   : > { %7793 = vmatpush3.msra.mxu1 %v11111_v57 }
0x20c8   : > { %7794 = vmatprep.subr.mxu1 %v8960_v1 }
0x20c9   : > { %7795 = vmatpush3.msra.mxu1 %v11115_v59 }
0x20ca   : > { %7796 = vmatprep.subr.mxu1 %v8960_v1 }
0x20cb   : > { %7797 = vmatpush3.msra.mxu1 %v11119_v39 }
0x20cc   : > { %7798 = vmatprep.subr.mxu1 %v8960_v1 }
0x20cd   : > { %7799 = vmatpush3.msra.mxu1 %v11123_v40 }
0x20ce   : > { %7800 = vmatprep.subr.mxu1 %v8960_v1 }
0x20cf   : > { %7801 = vmatpush3.msra.mxu1 %v11127_v26 }
0x20d0   : > { %7802 = vmatprep.subr.mxu1 %v8960_v1 }
0x20d1   : > { %7803 = vmatpush3.msra.mxu1 %v11131_v42 }
0x20d2   : > { %7804 = vmatprep.subr.mxu1 %v8960_v1 }
0x20d3   : > { %7805 = vmatpush3.msra.mxu1 %v11135_v19 }
0x20d4   : > { %7806 = vmatprep.subr.mxu1 %v8960_v1 }
0x20d5   : > { %7807 = vmatpush3.msra.mxu1 %v11139_v52 }
0x20d6   : > { %7808 = vmatprep.subr.mxu1 %v8960_v1 }
0x20d7   : > { %7809 = vmatpush3.msra.mxu1 %v11143_v23 }
0x20d8   : > { %7810 = vmatprep.subr.mxu1 %v8960_v1 }
0x20d9   : > { %7811 = vmatpush3.msra.mxu1 %v11147_v25 }
0x20da   : > { %7850 = vmatprep.subr.mxu1 %v8960_v1 }
0x217a   : > { %v3728_v15 = vpop.f32.mrf.mxu1 }
0x217b   : > { %v3729_v17 = vadd.f32 %v10725_v21, %v3728_v15  ;;  %v11250_v21 = vld [vmem:[#allocation10 + $0x50] sm:$0xff] }
0x217c   : > { %v7744_v53 = vpop.f32.mrf.mxu1 }
0x217d   : > { %8501 = vtanh.f32 %v3729_v17 }
0x218a   : > { %v8502_v54 = vpop.eup %8501 }
0x218b   : > { %7778 = vmatmul.mubr.f32.vlgmr.msra.gmra.mxu0 %v8502_v54 }
0x218c   : > { %7816 = vmatpush3.msra.mxu0 %v11228_v56  ;;  %7847 = vmatprep.mubr.msk.f32.mxu0 %vm8961_vm0, %v8960_v1 }
0x218d   : > { %7817 = vmatprep.subr.mxu0 %v8960_v1 }
0x218e   : > { %7818 = vmatpush3.msra.mxu0 %v11234_v35 }
0x218f   : > { %7819 = vmatprep.subr.mxu0 %v8960_v1 }
0x2190   : > { %7820 = vmatpush3.msra.mxu0 %v11238_v36 }
0x2191   : > { %7821 = vmatprep.subr.mxu0 %v8960_v1 }
0x2192   : > { %7822 = vmatpush3.msra.mxu0 %v11242_v18 }
0x2193   : > { %7823 = vmatprep.subr.mxu0 %v8960_v1 }
0x2194   : > { %7824 = vmatpush3.msra.mxu0 %v11246_v38 }
0x2195   : > { %7825 = vmatprep.subr.mxu0 %v8960_v1 }
0x2196   : > { %7826 = vmatpush3.msra.mxu0 %v11250_v21 }
0x2197   : > { %7827 = vmatprep.subr.mxu0 %v8960_v1 }
0x2198   : > { %7828 = vmatpush3.msra.mxu0 %v11254_v41 }
0x2199   : > { %7829 = vmatprep.subr.mxu0 %v8960_v1 }
0x219a   : > { %7830 = vmatpush3.msra.mxu0 %v11258_v24 }
0x219b   : > { %7831 = vmatprep.subr.mxu0 %v8960_v1 }
0x219c   : > { %7832 = vmatpush3.msra.mxu0 %v11262_v7 }
0x219d   : > { %7833 = vmatprep.subr.mxu0 %v8960_v1 }
0x219e   : > { %7834 = vmatpush3.msra.mxu0 %v11266_v58 }
0x219f   : > { %7835 = vmatprep.subr.mxu0 %v8960_v1 }
0x21a0   : > { %7836 = vmatpush3.msra.mxu0 %v11270_v11 }
0x21a1   : > { %7837 = vmatprep.subr.mxu0 %v8960_v1 }
0x21a2   : > { %7838 = vmatpush3.msra.mxu0 %v11274_v13 }
0x21a3   : > { %7839 = vmatprep.subr.mxu0 %v8960_v1 }
0x21a4   : > { %7840 = vmatpush3.msra.mxu0 %v11278_v44 }
0x21a5   : > { %7841 = vmatprep.subr.mxu0 %v8960_v1 }
0x21a6   : > { %7842 = vmatpush3.msra.mxu0 %v11282_v45 }
0x21a7   : > { %7843 = vmatprep.subr.mxu0 %v8960_v1 }
0x21a8   : > { %7844 = vmatpush3.msra.mxu0 %v11286_v46 }
0x21a9   : > { %7845 = vmatprep.subr.mxu0 %v8960_v1 }
0x21aa   : > { %7846 = vmatpush3.msra.mxu0 %v11290_v47 }
0x21ab   : > { %7885 = vmatprep.subr.mxu0 %v8960_v1 }
0x224b   : > { %v3799_v28 = vpop.f32.mrf.mxu0 }
0x224c   : > { %v11304_v32 = vadd.f32 %v10767_v22, %v3799_v28 }
0x224d   : > { %v7779_v33 = vpop.f32.mrf.mxu0 }
0x224e   : > { %v3805_v34 = vmul.f32 %v11301_v30, %v11304_v32 }
0x2250   : > { %v3806_v37 = vadd.f32 %v3805_v34, %v11190_v9 }
0x2252   : > { %7813 = vmatmul.mubr.f32.vlgmr.msra.gmra.mxu1 %v3806_v37 }
0x2253   : > { %7851 = vmatpush3.msra.mxu1 %v11085_v3  ;;  %7882 = vmatprep.mubr.msk.f32.mxu1 %vm8961_vm0, %v8960_v1 }
0x2254   : > { %7852 = vmatprep.subr.mxu1 %v8960_v1 }
0x2255   : > { %7853 = vmatpush3.msra.mxu1 %v11091_v4 }
0x2256   : > { %7854 = vmatprep.subr.mxu1 %v8960_v1 }
0x2257   : > { %7855 = vmatpush3.msra.mxu1 %v11095_v48 }
0x2258   : > { %7856 = vmatprep.subr.mxu1 %v8960_v1 }
0x2259   : > { %7857 = vmatpush3.msra.mxu1 %v11099_v49 }
0x225a   : > { %7858 = vmatprep.subr.mxu1 %v8960_v1 }
0x225b   : > { %7859 = vmatpush3.msra.mxu1 %v11103_v50 }
0x225c   : > { %7860 = vmatprep.subr.mxu1 %v8960_v1 }
0x225d   : > { %7861 = vmatpush3.msra.mxu1 %v11107_v51 }
0x225e   : > { %7862 = vmatprep.subr.mxu1 %v8960_v1 }
0x225f   : > { %7863 = vmatpush3.msra.mxu1 %v11111_v57 }
0x2260   : > { %7864 = vmatprep.subr.mxu1 %v8960_v1 }
0x2261   : > { %7865 = vmatpush3.msra.mxu1 %v11115_v59 }
0x2262   : > { %7866 = vmatprep.subr.mxu1 %v8960_v1 }
0x2263   : > { %7867 = vmatpush3.msra.mxu1 %v11119_v39 }
0x2264   : > { %7868 = vmatprep.subr.mxu1 %v8960_v1 }
0x2265   : > { %7869 = vmatpush3.msra.mxu1 %v11123_v40 }
0x2266   : > { %7870 = vmatprep.subr.mxu1 %v8960_v1 }
0x2267   : > { %7871 = vmatpush3.msra.mxu1 %v11127_v26 }
0x2268   : > { %7872 = vmatprep.subr.mxu1 %v8960_v1 }
0x2269   : > { %7873 = vmatpush3.msra.mxu1 %v11131_v42 }
0x226a   : > { %7874 = vmatprep.subr.mxu1 %v8960_v1 }
0x226b   : > { %7875 = vmatpush3.msra.mxu1 %v11135_v19 }
0x226c   : > { %7876 = vmatprep.subr.mxu1 %v8960_v1 }
0x226d   : > { %7877 = vmatpush3.msra.mxu1 %v11139_v52 }
0x226e   : > { %7878 = vmatprep.subr.mxu1 %v8960_v1 }
0x226f   : > { %7879 = vmatpush3.msra.mxu1 %v11143_v23 }
0x2270   : > { %7880 = vmatprep.subr.mxu1 %v8960_v1 }
0x2271   : > { %7881 = vmatpush3.msra.mxu1 %v11147_v25 }
0x2272   : > { %7920 = vmatprep.subr.mxu1 %v8960_v1 }
0x2312   : > { %v3873_v22 = vpop.f32.mrf.mxu1 }
0x2313   : > { %v3874_v8 = vadd.f32 %v11346_v43, %v3873_v22 }
0x2314   : > { %v7814_v10 = vpop.f32.mrf.mxu1 }
0x2315   : > { %8503 = vtanh.f32 %v3874_v8  ;;  %v4243_v10 = vstv %s4237_s20  ;;  %s8838_s20 = sshll.u32 %s8962_s8, 4  ;;  %s8839_s20 = int_to_ptr.vmem [resolvable:$false] %s8838_s20 }
0x2316   : > { %s8840_s19 = scalar_lea.vmem %s8839_s20, 256  ;;  %p8841_p12 = scmp.lt.s32.totalorder %s5048_s23, %s8839_s20 }
0x2317   : > { %p8842_p0 = scmp.lt.s32.totalorder %s8840_s19, %s8834_s29 }
0x2319   : > { %p8843_p7 = por %p8842_p0, %p8841_p12 }
0x231b   : > { %p8844_p3 = pnand %p8843_p7, %p8837_p6 }
0x2322   : > { %v8504_v12 = vpop.eup %8503 }
0x2323   : > { %7848 = vmatmul.mubr.f32.vlgmr.msra.gmra.mxu0 %v8504_v12 }
0x2324   : > { %7886 = vmatpush3.msra.mxu0 %v11228_v56  ;;  %7917 = vmatprep.mubr.msk.f32.mxu0 %vm8961_vm0, %v8960_v1 }
0x2325   : > { %7887 = vmatprep.subr.mxu0 %v8960_v1 }
0x2326   : > { %7888 = vmatpush3.msra.mxu0 %v11234_v35 }
0x2327   : > { %7889 = vmatprep.subr.mxu0 %v8960_v1 }
0x2328   : > { %7890 = vmatpush3.msra.mxu0 %v11238_v36 }
0x2329   : > { %7891 = vmatprep.subr.mxu0 %v8960_v1 }
0x232a   : > { %7892 = vmatpush3.msra.mxu0 %v11242_v18 }
0x232b   : > { %7893 = vmatprep.subr.mxu0 %v8960_v1 }
0x232c   : > { %7894 = vmatpush3.msra.mxu0 %v11246_v38 }
0x232d   : > { %7895 = vmatprep.subr.mxu0 %v8960_v1 }
0x232e   : > { %7896 = vmatpush3.msra.mxu0 %v11250_v21 }
0x232f   : > { %7897 = vmatprep.subr.mxu0 %v8960_v1 }
0x2330   : > { %7898 = vmatpush3.msra.mxu0 %v11254_v41 }
0x2331   : > { %7899 = vmatprep.subr.mxu0 %v8960_v1 }
0x2332   : > { %7900 = vmatpush3.msra.mxu0 %v11258_v24 }
0x2333   : > { %7901 = vmatprep.subr.mxu0 %v8960_v1 }
0x2334   : > { %7902 = vmatpush3.msra.mxu0 %v11262_v7 }
0x2335   : > { %7903 = vmatprep.subr.mxu0 %v8960_v1 }
0x2336   : > { %7904 = vmatpush3.msra.mxu0 %v11266_v58 }
0x2337   : > { %7905 = vmatprep.subr.mxu0 %v8960_v1 }
0x2338   : > { %7906 = vmatpush3.msra.mxu0 %v11270_v11 }
0x2339   : > { %7907 = vmatprep.subr.mxu0 %v8960_v1 }
0x233a   : > { %7908 = vmatpush3.msra.mxu0 %v11274_v13 }
0x233b   : > { %7909 = vmatprep.subr.mxu0 %v8960_v1 }
0x233c   : > { %7910 = vmatpush3.msra.mxu0 %v11278_v44 }
0x233d   : > { %7911 = vmatprep.subr.mxu0 %v8960_v1 }
0x233e   : > { %7912 = vmatpush3.msra.mxu0 %v11282_v45 }
0x233f   : > { %7913 = vmatprep.subr.mxu0 %v8960_v1 }
0x2340   : > { %7914 = vmatpush3.msra.mxu0 %v11286_v46 }
0x2341   : > { %7915 = vmatprep.subr.mxu0 %v8960_v1 }
0x2342   : > { %7916 = vmatpush3.msra.mxu0 %v11290_v47 }
0x2343   : > { %7955 = vmatprep.subr.mxu0 %v8960_v1 }
0x23e3   : > { %v3944_v14 = vpop.f32.mrf.mxu0 }
0x23e4   : > { %v11389_v0 = vadd.f32 %v11386_v16, %v3944_v14 }
0x23e5   : > { %v7849_v2 = vpop.f32.mrf.mxu0 }
0x23e6   : > { %v3948_v27 = vmul.f32 %v11389_v0, %v11301_v30  ;;  %v4238_v62 = vmul.f32 2.0, %v11389_v0 }
0x23e8   : > { %v3949_v29 = vadd.f32 %v3948_v27, %v11190_v9  ;;  %v4239_v17 = vadd.f32 %v4238_v62, %v11304_v32 }
0x23ea   : > { %7883 = vmatmul.mubr.f32.vlgmr.msra.gmra.mxu1 %v3949_v29 }
0x23eb   : > { %7921 = vmatpush3.msra.mxu1 %v11085_v3  ;;  %7952 = vmatprep.mubr.msk.f32.mxu1 %vm8961_vm0, %v8960_v1 }
0x23ec   : > { %7922 = vmatprep.subr.mxu1 %v8960_v1 }
0x23ed   : > { %7923 = vmatpush3.msra.mxu1 %v11091_v4 }
0x23ee   : > { %7924 = vmatprep.subr.mxu1 %v8960_v1 }
0x23ef   : > { %7925 = vmatpush3.msra.mxu1 %v11095_v48 }
0x23f0   : > { %7926 = vmatprep.subr.mxu1 %v8960_v1 }
0x23f1   : > { %7927 = vmatpush3.msra.mxu1 %v11099_v49 }
0x23f2   : > { %7928 = vmatprep.subr.mxu1 %v8960_v1 }
0x23f3   : > { %7929 = vmatpush3.msra.mxu1 %v11103_v50 }
0x23f4   : > { %7930 = vmatprep.subr.mxu1 %v8960_v1 }
0x23f5   : > { %7931 = vmatpush3.msra.mxu1 %v11107_v51 }
0x23f6   : > { %7932 = vmatprep.subr.mxu1 %v8960_v1 }
0x23f7   : > { %7933 = vmatpush3.msra.mxu1 %v11111_v57 }
0x23f8   : > { %7934 = vmatprep.subr.mxu1 %v8960_v1 }
0x23f9   : > { %7935 = vmatpush3.msra.mxu1 %v11115_v59 }
0x23fa   : > { %7936 = vmatprep.subr.mxu1 %v8960_v1 }
0x23fb   : > { %7937 = vmatpush3.msra.mxu1 %v11119_v39 }
0x23fc   : > { %7938 = vmatprep.subr.mxu1 %v8960_v1 }
0x23fd   : > { %7939 = vmatpush3.msra.mxu1 %v11123_v40 }
0x23fe   : > { %7940 = vmatprep.subr.mxu1 %v8960_v1 }
0x23ff   : > { %7941 = vmatpush3.msra.mxu1 %v11127_v26 }
0x2400   : > { %7942 = vmatprep.subr.mxu1 %v8960_v1 }
0x2401   : > { %7943 = vmatpush3.msra.mxu1 %v11131_v42 }
0x2402   : > { %7944 = vmatprep.subr.mxu1 %v8960_v1 }
0x2403   : > { %7945 = vmatpush3.msra.mxu1 %v11135_v19 }
0x2404   : > { %7946 = vmatprep.subr.mxu1 %v8960_v1 }
0x2405   : > { %7947 = vmatpush3.msra.mxu1 %v11139_v52 }
0x2406   : > { %7948 = vmatprep.subr.mxu1 %v8960_v1 }
0x2407   : > { %7949 = vmatpush3.msra.mxu1 %v11143_v23 }
0x2408   : > { %7950 = vmatprep.subr.mxu1 %v8960_v1 }
0x2409   : > { %7951 = vmatpush3.msra.mxu1 %v11147_v25 }
0x240a   : > { %7990 = vmatprep.subr.mxu1 %v8960_v1 }
0x24aa   : > { %v4016_v31 = vpop.f32.mrf.mxu1 }
0x24ab   : > { %v4017_v20 = vadd.f32 %v11346_v43, %v4016_v31 }
0x24ac   : > { %v7884_v60 = vpop.f32.mrf.mxu1 }
0x24ad   : > { %8505 = vtanh.f32 %v4017_v20  ;;  %v11619_v60 = vstv %s4389_s17 }
0x24ba   : > { %v8506_v61 = vpop.eup %8505 }
0x24bb   : > { %7918 = vmatmul.mubr.f32.vlgmr.msra.gmra.mxu0 %v8506_v61 }
0x24bc   : > { %7956 = vmatpush3.msra.mxu0 %v11228_v56  ;;  %7987 = vmatprep.mubr.msk.f32.mxu0 %vm8961_vm0, %v8960_v1 }
0x24bd   : > { %7957 = vmatprep.subr.mxu0 %v8960_v1 }
0x24be   : > { %7958 = vmatpush3.msra.mxu0 %v11234_v35 }
0x24bf   : > { %7959 = vmatprep.subr.mxu0 %v8960_v1 }
0x24c0   : > { %7960 = vmatpush3.msra.mxu0 %v11238_v36 }
0x24c1   : > { %7961 = vmatprep.subr.mxu0 %v8960_v1 }
0x24c2   : > { %7962 = vmatpush3.msra.mxu0 %v11242_v18 }
0x24c3   : > { %7963 = vmatprep.subr.mxu0 %v8960_v1 }
0x24c4   : > { %7964 = vmatpush3.msra.mxu0 %v11246_v38 }
0x24c5   : > { %7965 = vmatprep.subr.mxu0 %v8960_v1 }
0x24c6   : > { %7966 = vmatpush3.msra.mxu0 %v11250_v21 }
0x24c7   : > { %7967 = vmatprep.subr.mxu0 %v8960_v1 }
0x24c8   : > { %7968 = vmatpush3.msra.mxu0 %v11254_v41 }
0x24c9   : > { %7969 = vmatprep.subr.mxu0 %v8960_v1 }
0x24ca   : > { %7970 = vmatpush3.msra.mxu0 %v11258_v24 }
0x24cb   : > { %7971 = vmatprep.subr.mxu0 %v8960_v1 }
0x24cc   : > { %7972 = vmatpush3.msra.mxu0 %v11262_v7 }
0x24cd   : > { %7973 = vmatprep.subr.mxu0 %v8960_v1 }
0x24ce   : > { %7974 = vmatpush3.msra.mxu0 %v11266_v58 }
0x24cf   : > { %7975 = vmatprep.subr.mxu0 %v8960_v1 }
0x24d0   : > { %7976 = vmatpush3.msra.mxu0 %v11270_v11 }
0x24d1   : > { %7977 = vmatprep.subr.mxu0 %v8960_v1 }
0x24d2   : > { %7978 = vmatpush3.msra.mxu0 %v11274_v13 }
0x24d3   : > { %7979 = vmatprep.subr.mxu0 %v8960_v1 }
0x24d4   : > { %7980 = vmatpush3.msra.mxu0 %v11278_v44 }
0x24d5   : > { %7981 = vmatprep.subr.mxu0 %v8960_v1 }
0x24d6   : > { %7982 = vmatpush3.msra.mxu0 %v11282_v45 }
0x24d7   : > { %7983 = vmatprep.subr.mxu0 %v8960_v1 }
0x24d8   : > { %7984 = vmatpush3.msra.mxu0 %v11286_v46 }
0x24d9   : > { %7985 = vmatprep.subr.mxu0 %v8960_v1 }
0x24da   : > { %7986 = vmatpush3.msra.mxu0 %v11290_v47 }
0x24db   : > { %8025 = vmatprep.subr.mxu0 %v8960_v1 }
0x257b   : > { %v4087_v63 = vpop.f32.mrf.mxu0 }
0x257c   : > { %v4088_v6 = vadd.f32 %v11386_v16, %v4087_v63 }
0x257d   : > { %v7919_v15 = vpop.f32.mrf.mxu0 }
0x257e   : > { %v4092_v53 = vmul.f32 %v4091_v5, %v4088_v6  ;;  %v4240_v54 = vmul.f32 2.0, %v4088_v6  ;;  %v8628_v6 = vld [vmem:[#allocation9 + $0x40] sm:$0xff]  ;;  %v8629_v15 = vld [vmem:[#allocation9 + $0x38] sm:$0xff] }
0x2580   : > { %v4093_v28 = vadd.f32 %v4092_v53, %v11190_v9  ;;  %v11468_v30 = vadd.f32 %v4240_v54, %v4239_v17  ;;  %v8630_v17 = vld [vmem:[#allocation9 + $0x30] sm:$0xff]  ;;  %v8631_v53 = vld [vmem:[#allocation9 + $0x28] sm:$0xff]  ;;  %v8632_v54 = vld [vmem:[#allocation9 + $0x20] sm:$0xff] }
0x2582   : > { %7953 = vmatmul.mubr.f32.vlgmr.msra.gmra.mxu1 %v4093_v28  ;;  %v8633_v28 = vld [vmem:[#allocation9 + $0x18] sm:$0xff] }
0x2583   : > { %7991 = vmatpush3.msra.mxu1 %v11085_v3  ;;  %8022 = vmatprep.mubr.msk.f32.mxu1 %vm8961_vm0, %v8960_v1 }
0x2584   : > { %7992 = vmatprep.subr.mxu1 %v8960_v1 }
0x2585   : > { %7993 = vmatpush3.msra.mxu1 %v11091_v4 }
0x2586   : > { %7994 = vmatprep.subr.mxu1 %v8960_v1 }
0x2587   : > { %7995 = vmatpush3.msra.mxu1 %v11095_v48 }
0x2588   : > { %7996 = vmatprep.subr.mxu1 %v8960_v1 }
0x2589   : > { %7997 = vmatpush3.msra.mxu1 %v11099_v49 }
0x258a   : > { %7998 = vmatprep.subr.mxu1 %v8960_v1 }
0x258b   : > { %7999 = vmatpush3.msra.mxu1 %v11103_v50 }
0x258c   : > { %8000 = vmatprep.subr.mxu1 %v8960_v1 }
0x258d   : > { %8001 = vmatpush3.msra.mxu1 %v11107_v51 }
0x258e   : > { %8002 = vmatprep.subr.mxu1 %v8960_v1 }
0x258f   : > { %8003 = vmatpush3.msra.mxu1 %v11111_v57 }
0x2590   : > { %8004 = vmatprep.subr.mxu1 %v8960_v1 }
0x2591   : > { %8005 = vmatpush3.msra.mxu1 %v11115_v59 }
0x2592   : > { %8006 = vmatprep.subr.mxu1 %v8960_v1 }
0x2593   : > { %8007 = vmatpush3.msra.mxu1 %v11119_v39 }
0x2594   : > { %8008 = vmatprep.subr.mxu1 %v8960_v1 }
0x2595   : > { %8009 = vmatpush3.msra.mxu1 %v11123_v40 }
0x2596   : > { %8010 = vmatprep.subr.mxu1 %v8960_v1 }
0x2597   : > { %8011 = vmatpush3.msra.mxu1 %v11127_v26 }
0x2598   : > { %8012 = vmatprep.subr.mxu1 %v8960_v1 }
0x2599   : > { %8013 = vmatpush3.msra.mxu1 %v11131_v42 }
0x259a   : > { %8014 = vmatprep.subr.mxu1 %v8960_v1 }
0x259b   : > { %8015 = vmatpush3.msra.mxu1 %v11135_v19 }
0x259c   : > { %8016 = vmatprep.subr.mxu1 %v8960_v1 }
0x259d   : > { %8017 = vmatpush3.msra.mxu1 %v11139_v52 }
0x259e   : > { %8018 = vmatprep.subr.mxu1 %v8960_v1 }
0x259f   : > { %8019 = vmatpush3.msra.mxu1 %v11143_v23 }
0x25a0   : > { %8020 = vmatprep.subr.mxu1 %v8960_v1 }
0x25a1   : > { %8021 = vmatpush3.msra.mxu1 %v11147_v25 }
0x25a2   : > { %8060 = vmatprep.subr.mxu1 %v8960_v1 }
0x2642   : > { %v4160_v32 = vpop.f32.mrf.mxu1 }
0x2643   : > { %v4161_v33 = vadd.f32 %v11346_v43, %v4160_v32  ;;  %v8635_v32 = vld [vmem:[#allocation9 + $0x8] sm:$0xff] }
0x2644   : > { %v7954_v34 = vpop.f32.mrf.mxu1 }
0x2645   : > { %8507 = vtanh.f32 %v4161_v33  ;;  %v8636_v33 = vld [vmem:[#allocation9] sm:$0xff] }
0x2652   : > { %v8508_v37 = vpop.eup %8507 }
0x2653   : > { %7988 = vmatmul.mubr.f32.vlgmr.msra.gmra.mxu0 %v8508_v37 }
0x2654   : > { %8026 = vmatpush3.msra.mxu0 %v11228_v56  ;;  %8057 = vmatprep.mubr.msk.f32.mxu0 %vm8961_vm0, %v8960_v1 }
0x2655   : > { %8027 = vmatprep.subr.mxu0 %v8960_v1 }
0x2656   : > { %8028 = vmatpush3.msra.mxu0 %v11234_v35 }
0x2657   : > { %8029 = vmatprep.subr.mxu0 %v8960_v1 }
0x2658   : > { %8030 = vmatpush3.msra.mxu0 %v11238_v36 }
0x2659   : > { %8031 = vmatprep.subr.mxu0 %v8960_v1 }
0x265a   : > { %8032 = vmatpush3.msra.mxu0 %v11242_v18 }
0x265b   : > { %8033 = vmatprep.subr.mxu0 %v8960_v1 }
0x265c   : > { %8034 = vmatpush3.msra.mxu0 %v11246_v38 }
0x265d   : > { %8035 = vmatprep.subr.mxu0 %v8960_v1 }
0x265e   : > { %8036 = vmatpush3.msra.mxu0 %v11250_v21 }
0x265f   : > { %8037 = vmatprep.subr.mxu0 %v8960_v1 }
0x2660   : > { %8038 = vmatpush3.msra.mxu0 %v11254_v41 }
0x2661   : > { %8039 = vmatprep.subr.mxu0 %v8960_v1 }
0x2662   : > { %8040 = vmatpush3.msra.mxu0 %v11258_v24 }
0x2663   : > { %8041 = vmatprep.subr.mxu0 %v8960_v1 }
0x2664   : > { %8042 = vmatpush3.msra.mxu0 %v11262_v7 }
0x2665   : > { %8043 = vmatprep.subr.mxu0 %v8960_v1 }
0x2666   : > { %8044 = vmatpush3.msra.mxu0 %v11266_v58 }
0x2667   : > { %8045 = vmatprep.subr.mxu0 %v8960_v1 }
0x2668   : > { %8046 = vmatpush3.msra.mxu0 %v11270_v11 }
0x2669   : > { %8047 = vmatprep.subr.mxu0 %v8960_v1 }
0x266a   : > { %8048 = vmatpush3.msra.mxu0 %v11274_v13 }
0x266b   : > { %8049 = vmatprep.subr.mxu0 %v8960_v1 }
0x266c   : > { %8050 = vmatpush3.msra.mxu0 %v11278_v44 }
0x266d   : > { %8051 = vmatprep.subr.mxu0 %v8960_v1 }
0x266e   : > { %8052 = vmatpush3.msra.mxu0 %v11282_v45 }
0x266f   : > { %8053 = vmatprep.subr.mxu0 %v8960_v1 }
0x2670   : > { %8054 = vmatpush3.msra.mxu0 %v11286_v46 }
0x2671   : > { %8055 = vmatprep.subr.mxu0 %v8960_v1 }
0x2672   : > { %8056 = vmatpush3.msra.mxu0 %v11290_v47 }
0x2673   : > { %8095 = vmatprep.subr.mxu0 %v8960_v1 }
0x2713   : > { %v4231_v22 = vpop.f32.mrf.mxu0 }
0x2714   : > { %v4232_v8 = vadd.f32 %v11386_v16, %v4231_v22 }
0x2715   : > { %v7989_v12 = vpop.f32.mrf.mxu0 }
0x2716   : > { %v4242_v14 = vadd.f32 %v11468_v30, %v4232_v8  ;;  %v8634_v30 = vld [vmem:[#allocation9 + $0x10] sm:$0xff]  ;;  %v4840_v12 = vld [vmem:[#allocation13 + $0x40] sm:$0xff] }
0x2718   : > { %v4244_v0 = vmul.f32 %v4243_v10, %v4242_v14  ;;  %v4841_v10 = vld [vmem:[#allocation13 + $0x48] sm:$0xff]  ;;  %v4839_v14 = vld [vmem:[#allocation13 + $0x38] sm:$0xff] }
0x271a   : > { %v11543_v2 = vadd.f32 %v4244_v0, %v11190_v9  ;;  %v4838_v0 = vld [vmem:[#allocation13 + $0x30] sm:$0xff] }
0x271c   : > { %8023 = vmatmul.mubr.f32.vlgmr.msra.gmra.mxu1 %v11543_v2 }
0x271d   : > { %8061 = vmatpush3.msra.mxu1 %v11085_v3  ;;  %8092 = vmatprep.mubr.msk.f32.mxu1 %vm8961_vm0, %v8960_v1 }
0x271e   : > { %8062 = vmatprep.subr.mxu1 %v8960_v1 }
0x271f   : > { %8063 = vmatpush3.msra.mxu1 %v11091_v4 }
0x2720   : > { %8064 = vmatprep.subr.mxu1 %v8960_v1 }
0x2721   : > { %8065 = vmatpush3.msra.mxu1 %v11095_v48 }
0x2722   : > { %8066 = vmatprep.subr.mxu1 %v8960_v1 }
0x2723   : > { %8067 = vmatpush3.msra.mxu1 %v11099_v49 }
0x2724   : > { %8068 = vmatprep.subr.mxu1 %v8960_v1 }
0x2725   : > { %8069 = vmatpush3.msra.mxu1 %v11103_v50 }
0x2726   : > { %8070 = vmatprep.subr.mxu1 %v8960_v1 }
0x2727   : > { %8071 = vmatpush3.msra.mxu1 %v11107_v51 }
0x2728   : > { %8072 = vmatprep.subr.mxu1 %v8960_v1 }
0x2729   : > { %8073 = vmatpush3.msra.mxu1 %v11111_v57 }
0x272a   : > { %8074 = vmatprep.subr.mxu1 %v8960_v1 }
0x272b   : > { %8075 = vmatpush3.msra.mxu1 %v11115_v59 }
0x272c   : > { %8076 = vmatprep.subr.mxu1 %v8960_v1 }
0x272d   : > { %8077 = vmatpush3.msra.mxu1 %v11119_v39 }
0x272e   : > { %8078 = vmatprep.subr.mxu1 %v8960_v1 }
0x272f   : > { %8079 = vmatpush3.msra.mxu1 %v11123_v40 }
0x2730   : > { %8080 = vmatprep.subr.mxu1 %v8960_v1 }
0x2731   : > { %8081 = vmatpush3.msra.mxu1 %v11127_v26 }
0x2732   : > { %8082 = vmatprep.subr.mxu1 %v8960_v1 }
0x2733   : > { %8083 = vmatpush3.msra.mxu1 %v11131_v42 }
0x2734   : > { %8084 = vmatprep.subr.mxu1 %v8960_v1 }
0x2735   : > { %8085 = vmatpush3.msra.mxu1 %v11135_v19 }
0x2736   : > { %8086 = vmatprep.subr.mxu1 %v8960_v1 }
0x2737   : > { %8087 = vmatpush3.msra.mxu1 %v11139_v52 }
0x2738   : > { %8088 = vmatprep.subr.mxu1 %v8960_v1 }
0x2739   : > { %8089 = vmatpush3.msra.mxu1 %v11143_v23 }
0x273a   : > { %8090 = vmatprep.subr.mxu1 %v8960_v1 }
0x273b   : > { %8091 = vmatpush3.msra.mxu1 %v11147_v25 }
0x273c   : > { %8130 = vmatprep.subr.mxu1 %v8960_v1 }
0x27dc   : > { %v4314_v9 = vpop.f32.mrf.mxu1 }
0x27dd   : > { %v4315_v27 = vadd.f32 %v11346_v43, %v4314_v9  ;;  %v4837_v9 = vld [vmem:[#allocation13 + $0x28] sm:$0xff] }
0x27de   : > { %v8024_v29 = vpop.f32.mrf.mxu1 }
0x27df   : > { %8509 = vtanh.f32 %v4315_v27 }
0x27ec   : > { %v8510_v31 = vpop.eup %8509 }
0x27ed   : > { %8058 = vmatmul.mubr.f32.vlgmr.msra.gmra.mxu0 %v8510_v31 }
0x27ee   : > { %8096 = vmatpush3.msra.mxu0 %v11228_v56  ;;  %8127 = vmatprep.mubr.msk.f32.mxu0 %vm8961_vm0, %v8960_v1 }
0x27ef   : > { %8097 = vmatprep.subr.mxu0 %v8960_v1 }
0x27f0   : > { %8098 = vmatpush3.msra.mxu0 %v11234_v35 }
0x27f1   : > { %8099 = vmatprep.subr.mxu0 %v8960_v1 }
0x27f2   : > { %8100 = vmatpush3.msra.mxu0 %v11238_v36 }
0x27f3   : > { %8101 = vmatprep.subr.mxu0 %v8960_v1 }
0x27f4   : > { %8102 = vmatpush3.msra.mxu0 %v11242_v18 }
0x27f5   : > { %8103 = vmatprep.subr.mxu0 %v8960_v1 }
0x27f6   : > { %8104 = vmatpush3.msra.mxu0 %v11246_v38 }
0x27f7   : > { %8105 = vmatprep.subr.mxu0 %v8960_v1 }
0x27f8   : > { %8106 = vmatpush3.msra.mxu0 %v11250_v21 }
0x27f9   : > { %8107 = vmatprep.subr.mxu0 %v8960_v1 }
0x27fa   : > { %8108 = vmatpush3.msra.mxu0 %v11254_v41 }
0x27fb   : > { %8109 = vmatprep.subr.mxu0 %v8960_v1 }
0x27fc   : > { %8110 = vmatpush3.msra.mxu0 %v11258_v24 }
0x27fd   : > { %8111 = vmatprep.subr.mxu0 %v8960_v1 }
0x27fe   : > { %8112 = vmatpush3.msra.mxu0 %v11262_v7 }
0x27ff   : > { %8113 = vmatprep.subr.mxu0 %v8960_v1 }
0x2800   : > { %8114 = vmatpush3.msra.mxu0 %v11266_v58 }
0x2801   : > { %8115 = vmatprep.subr.mxu0 %v8960_v1 }
0x2802   : > { %8116 = vmatpush3.msra.mxu0 %v11270_v11 }
0x2803   : > { %8117 = vmatprep.subr.mxu0 %v8960_v1 }
0x2804   : > { %8118 = vmatpush3.msra.mxu0 %v11274_v13 }
0x2805   : > { %8119 = vmatprep.subr.mxu0 %v8960_v1 }
0x2806   : > { %8120 = vmatpush3.msra.mxu0 %v11278_v44 }
0x2807   : > { %8121 = vmatprep.subr.mxu0 %v8960_v1 }
0x2808   : > { %8122 = vmatpush3.msra.mxu0 %v11282_v45 }
0x2809   : > { %8123 = vmatprep.subr.mxu0 %v8960_v1 }
0x280a   : > { %8124 = vmatpush3.msra.mxu0 %v11286_v46 }
0x280b   : > { %8125 = vmatprep.subr.mxu0 %v8960_v1 }
0x280c   : > { %8126 = vmatpush3.msra.mxu0 %v11290_v47 }
0x280d   : > { %8165 = vmatprep.subr.mxu0 %v8960_v1 }
0x28ad   : > { %v4385_v20 = vpop.f32.mrf.mxu0 }
0x28ae   : > { %v11622_v61 = vadd.f32 %v11386_v16, %v4385_v20 }
0x28af   : > { %v8059_v62 = vpop.f32.mrf.mxu0 }
0x28b0   : > { %v4391_v63 = vmul.f32 %v11619_v60, %v11622_v61  ;;  %v4834_v62 = vld [vmem:[#allocation13 + $0x10] sm:$0xff] }
0x28b2   : > { %v4392_v5 = vadd.f32 %v4391_v63, %v11543_v2  ;;  %v4832_v63 = vld [vmem:[#allocation13] sm:$0xff] }
0x28b4   : > { %8093 = vmatmul.mubr.f32.vlgmr.msra.gmra.mxu1 %v4392_v5  ;;  %v4935_v5 = vld [vmem:[#allocation15 + $0x78] sm:$0xff] }
0x28b5   : > { %8131 = vmatpush3.msra.mxu1 %v11085_v3  ;;  %8162 = vmatprep.mubr.msk.f32.mxu1 %vm8961_vm0, %v8960_v1 }
0x28b6   : > { %8132 = vmatprep.subr.mxu1 %v8960_v1 }
0x28b7   : > { %8133 = vmatpush3.msra.mxu1 %v11091_v4 }
0x28b8   : > { %8134 = vmatprep.subr.mxu1 %v8960_v1 }
0x28b9   : > { %8135 = vmatpush3.msra.mxu1 %v11095_v48 }
0x28ba   : > { %8136 = vmatprep.subr.mxu1 %v8960_v1 }
0x28bb   : > { %8137 = vmatpush3.msra.mxu1 %v11099_v49 }
0x28bc   : > { %8138 = vmatprep.subr.mxu1 %v8960_v1 }
0x28bd   : > { %8139 = vmatpush3.msra.mxu1 %v11103_v50 }
0x28be   : > { %8140 = vmatprep.subr.mxu1 %v8960_v1 }
0x28bf   : > { %8141 = vmatpush3.msra.mxu1 %v11107_v51 }
0x28c0   : > { %8142 = vmatprep.subr.mxu1 %v8960_v1 }
0x28c1   : > { %8143 = vmatpush3.msra.mxu1 %v11111_v57 }
0x28c2   : > { %8144 = vmatprep.subr.mxu1 %v8960_v1 }
0x28c3   : > { %8145 = vmatpush3.msra.mxu1 %v11115_v59 }
0x28c4   : > { %8146 = vmatprep.subr.mxu1 %v8960_v1 }
0x28c5   : > { %8147 = vmatpush3.msra.mxu1 %v11119_v39 }
0x28c6   : > { %8148 = vmatprep.subr.mxu1 %v8960_v1 }
0x28c7   : > { %8149 = vmatpush3.msra.mxu1 %v11123_v40  ;;  %v8621_v40 = vld [vmem:[#allocation9 + $0x78] sm:$0xff] }
0x28c8   : > { %8150 = vmatprep.subr.mxu1 %v8960_v1 }
0x28c9   : > { %8151 = vmatpush3.msra.mxu1 %v11127_v26  ;;  %v8622_v26 = vld [vmem:[#allocation9 + $0x70] sm:$0xff] }
0x28ca   : > { %8152 = vmatprep.subr.mxu1 %v8960_v1 }
0x28cb   : > { %8153 = vmatpush3.msra.mxu1 %v11131_v42  ;;  %v8623_v42 = vld [vmem:[#allocation9 + $0x68] sm:$0xff] }
0x28cc   : > { %8154 = vmatprep.subr.mxu1 %v8960_v1 }
0x28cd   : > { %8155 = vmatpush3.msra.mxu1 %v11135_v19  ;;  %v8624_v19 = vld [vmem:[#allocation9 + $0x60] sm:$0xff] }
0x28ce   : > { %8156 = vmatprep.subr.mxu1 %v8960_v1 }
0x28cf   : > { %8157 = vmatpush3.msra.mxu1 %v11139_v52  ;;  %v8625_v52 = vld [vmem:[#allocation9 + $0x58] sm:$0xff] }
0x28d0   : > { %8158 = vmatprep.subr.mxu1 %v8960_v1 }
0x28d1   : > { %8159 = vmatpush3.msra.mxu1 %v11143_v23  ;;  %v8626_v23 = vld [vmem:[#allocation9 + $0x50] sm:$0xff] }
0x28d2   : > { %8160 = vmatprep.subr.mxu1 %v8960_v1 }
0x28d3   : > { %8161 = vmatpush3.msra.mxu1 %v11147_v25  ;;  %v8627_v25 = vld [vmem:[#allocation9 + $0x48] sm:$0xff] }
0x28d4   : > { %8200 = vmatprep.subr.mxu1 %v8960_v1 }
0x2974   : > { %v4459_v3 = vpop.f32.mrf.mxu1 }
0x2975   : > { %v4460_v4 = vadd.f32 %v11346_v43, %v4459_v3  ;;  %v4934_v3 = vld [vmem:[#allocation15 + $0x70] sm:$0xff] }
0x2976   : > { %v8094_v48 = vpop.f32.mrf.mxu1 }
0x2977   : > { %8511 = vtanh.f32 %v4460_v4  ;;  %v4933_v4 = vld [vmem:[#allocation15 + $0x68] sm:$0xff]  ;;  %v4932_v48 = vld [vmem:[#allocation15 + $0x60] sm:$0xff] }
0x2984   : > { %v8512_v49 = vpop.eup %8511 }
0x2985   : > { %8128 = vmatmul.mubr.f32.vlgmr.msra.gmra.mxu0 %v8512_v49  ;;  %v4931_v49 = vld [vmem:[#allocation15 + $0x58] sm:$0xff] }
0x2986   : > { %8166 = vmatpush3.msra.mxu0 %v11228_v56  ;;  %8197 = vmatprep.mubr.msk.f32.mxu0 %vm8961_vm0, %v8960_v1 }
0x2987   : > { %8167 = vmatprep.subr.mxu0 %v8960_v1 }
0x2988   : > { %8168 = vmatpush3.msra.mxu0 %v11234_v35 }
0x2989   : > { %8169 = vmatprep.subr.mxu0 %v8960_v1 }
0x298a   : > { %8170 = vmatpush3.msra.mxu0 %v11238_v36 }
0x298b   : > { %8171 = vmatprep.subr.mxu0 %v8960_v1 }
0x298c   : > { %8172 = vmatpush3.msra.mxu0 %v11242_v18 }
0x298d   : > { %8173 = vmatprep.subr.mxu0 %v8960_v1 }
0x298e   : > { %8174 = vmatpush3.msra.mxu0 %v11246_v38 }
0x298f   : > { %8175 = vmatprep.subr.mxu0 %v8960_v1 }
0x2990   : > { %8176 = vmatpush3.msra.mxu0 %v11250_v21 }
0x2991   : > { %8177 = vmatprep.subr.mxu0 %v8960_v1 }
0x2992   : > { %8178 = vmatpush3.msra.mxu0 %v11254_v41 }
0x2993   : > { %8179 = vmatprep.subr.mxu0 %v8960_v1 }
0x2994   : > { %8180 = vmatpush3.msra.mxu0 %v11258_v24 }
0x2995   : > { %8181 = vmatprep.subr.mxu0 %v8960_v1 }
0x2996   : > { %8182 = vmatpush3.msra.mxu0 %v11262_v7 }
0x2997   : > { %8183 = vmatprep.subr.mxu0 %v8960_v1 }
0x2998   : > { %8184 = vmatpush3.msra.mxu0 %v11266_v58 }
0x2999   : > { %8185 = vmatprep.subr.mxu0 %v8960_v1 }
0x299a   : > { %8186 = vmatpush3.msra.mxu0 %v11270_v11 }
0x299b   : > { %8187 = vmatprep.subr.mxu0 %v8960_v1 }
0x299c   : > { %8188 = vmatpush3.msra.mxu0 %v11274_v13 }
0x299d   : > { %8189 = vmatprep.subr.mxu0 %v8960_v1 }
0x299e   : > { %8190 = vmatpush3.msra.mxu0 %v11278_v44 }
0x299f   : > { %8191 = vmatprep.subr.mxu0 %v8960_v1 }
0x29a0   : > { %8192 = vmatpush3.msra.mxu0 %v11282_v45 }
0x29a1   : > { %8193 = vmatprep.subr.mxu0 %v8960_v1 }
0x29a2   : > { %8194 = vmatpush3.msra.mxu0 %v11286_v46 }
0x29a3   : > { %8195 = vmatprep.subr.mxu0 %v8960_v1 }
0x29a4   : > { %8196 = vmatpush3.msra.mxu0 %v11290_v47 }
0x29a5   : > { %8235 = vmatprep.subr.mxu0 %v8960_v1 }
0x2a45   : > { %v4530_v50 = vpop.f32.mrf.mxu0 }
0x2a46   : > { %v11697_v51 = vadd.f32 %v11386_v16, %v4530_v50  ;;  %v4930_v50 = vld [vmem:[#allocation15 + $0x50] sm:$0xff] }
0x2a47   : > { %v8129_v57 = vpop.f32.mrf.mxu0 }
0x2a48   : > { %v4534_v59 = vmul.f32 %v11697_v51, %v11619_v60  ;;  %v4836_v60 = vld [vmem:[#allocation13 + $0x20] sm:$0xff] }
0x2a4a   : > { %v4535_v39 = vadd.f32 %v4534_v59, %v11543_v2 }
0x2a4c   : > { %8163 = vmatmul.mubr.f32.vlgmr.msra.gmra.mxu1 %v4535_v39  ;;  %v4829_v39 = vstv %s4823_s5 }
0x2a4d   : > { %8201 = vmatpush3.msra.mxu1 %v8621_v40  ;;  %8232 = vmatprep.mubr.msk.f32.mxu1 %vm8961_vm0, %v8960_v1 }
0x2a4e   : > { %8202 = vmatprep.subr.mxu1 %v8960_v1 }
0x2a4f   : > { %8203 = vmatpush3.msra.mxu1 %v8622_v26 }
0x2a50   : > { %8204 = vmatprep.subr.mxu1 %v8960_v1 }
0x2a51   : > { %8205 = vmatpush3.msra.mxu1 %v8623_v42 }
0x2a52   : > { %8206 = vmatprep.subr.mxu1 %v8960_v1 }
0x2a53   : > { %8207 = vmatpush3.msra.mxu1 %v8624_v19 }
0x2a54   : > { %8208 = vmatprep.subr.mxu1 %v8960_v1 }
0x2a55   : > { %8209 = vmatpush3.msra.mxu1 %v8625_v52  ;;  %v4928_v52 = vld [vmem:[#allocation15 + $0x40] sm:$0xff] }
0x2a56   : > { %8210 = vmatprep.subr.mxu1 %v8960_v1 }
0x2a57   : > { %8211 = vmatpush3.msra.mxu1 %v8626_v23  ;;  %v4927_v23 = vld [vmem:[#allocation15 + $0x38] sm:$0xff] }
0x2a58   : > { %8212 = vmatprep.subr.mxu1 %v8960_v1 }
0x2a59   : > { %8213 = vmatpush3.msra.mxu1 %v8627_v25  ;;  %v4926_v25 = vld [vmem:[#allocation15 + $0x30] sm:$0xff] }
0x2a5a   : > { %8214 = vmatprep.subr.mxu1 %v8960_v1 }
0x2a5b   : > { %8215 = vmatpush3.msra.mxu1 %v8628_v6  ;;  %v4925_v6 = vld [vmem:[#allocation15 + $0x28] sm:$0xff] }
0x2a5c   : > { %8216 = vmatprep.subr.mxu1 %v8960_v1 }
0x2a5d   : > { %8217 = vmatpush3.msra.mxu1 %v8629_v15  ;;  %v4923_v15 = vld [vmem:[#allocation15 + $0x18] sm:$0xff] }
0x2a5e   : > { %8218 = vmatprep.subr.mxu1 %v8960_v1 }
0x2a5f   : > { %8219 = vmatpush3.msra.mxu1 %v8630_v17  ;;  %v4921_v17 = vld [vmem:[#allocation15 + $0x8] sm:$0xff] }
0x2a60   : > { %8220 = vmatprep.subr.mxu1 %v8960_v1 }
0x2a61   : > { %8221 = vmatpush3.msra.mxu1 %v8631_v53  ;;  %v4920_v53 = vld [vmem:[#allocation15] sm:$0xff] }
0x2a62   : > { %8222 = vmatprep.subr.mxu1 %v8960_v1 }
0x2a63   : > { %8223 = vmatpush3.msra.mxu1 %v8632_v54  ;;  %v5255_v54 = vld [vmem:[%s11880_s9] ss:$0 sm:$0xff] }
0x2a64   : > { %8224 = vmatprep.subr.mxu1 %v8960_v1 }
0x2a65   : > { %8225 = vmatpush3.msra.mxu1 %v8633_v28  ;;  %v713_v28 = vadd.f32 %v5255_v54, %v9487_v55 }
0x2a66   : > { %8226 = vmatprep.subr.mxu1 %v8960_v1 }
0x2a67   : > { %8227 = vmatpush3.msra.mxu1 %v8634_v30 }
0x2a68   : > { %8228 = vmatprep.subr.mxu1 %v8960_v1 }
0x2a69   : > { %8229 = vmatpush3.msra.mxu1 %v8635_v32 }
0x2a6a   : > { %8230 = vmatprep.subr.mxu1 %v8960_v1 }
0x2a6b   : > { %8231 = vmatpush3.msra.mxu1 %v8636_v33 }
0x2a6c   : > { %8270 = vmatprep.subr.mxu1 %v8960_v1 }
0x2b0c   : > { %v4602_v34 = vpop.f32.mrf.mxu1 }
0x2b0d   : > { %v4603_v37 = vadd.f32 %v11346_v43, %v4602_v34 }
0x2b0e   : > { %v8164_v22 = vpop.f32.mrf.mxu1 }
0x2b0f   : > { %8513 = vtanh.f32 %v4603_v37 }
0x2b1c   : > { %v8514_v8 = vpop.eup %8513 }
0x2b1d   : > { %8198 = vmatmul.mubr.f32.vlgmr.msra.gmra.mxu0 %v8514_v8 }
0x2b1e   : > { %8236 = vmatpush3.msra.mxu0 %v11228_v56  ;;  %8267 = vmatprep.mubr.msk.f32.mxu0 %vm8961_vm0, %v8960_v1  ;;  %v4824_v56 = vmul.f32 2.0, %v11697_v51  ;;  %v4929_v51 = vld [vmem:[#allocation15 + $0x48] sm:$0xff] }
0x2b1f   : > { %8237 = vmatprep.subr.mxu0 %v8960_v1 }
0x2b20   : > { %8238 = vmatpush3.msra.mxu0 %v11234_v35 }
0x2b21   : > { %8239 = vmatprep.subr.mxu0 %v8960_v1 }
0x2b22   : > { %8240 = vmatpush3.msra.mxu0 %v11238_v36  ;;  %v4677_v36 = vstv %s11616_s21 }
0x2b23   : > { %8241 = vmatprep.subr.mxu0 %v8960_v1 }
0x2b24   : > { %8242 = vmatpush3.msra.mxu0 %v11242_v18 }
0x2b25   : > { %8243 = vmatprep.subr.mxu0 %v8960_v1 }
0x2b26   : > { %8244 = vmatpush3.msra.mxu0 %v11246_v38 }
0x2b27   : > { %8245 = vmatprep.subr.mxu0 %v8960_v1 }
0x2b28   : > { %8246 = vmatpush3.msra.mxu0 %v11250_v21  ;;  %v4825_v21 = vadd.f32 %v4824_v56, %v11622_v61  ;;  %v4835_v61 = vld [vmem:[#allocation13 + $0x18] sm:$0xff] }
0x2b29   : > { %8247 = vmatprep.subr.mxu0 %v8960_v1 }
0x2b2a   : > { %8248 = vmatpush3.msra.mxu0 %v11254_v41 }
0x2b2b   : > { %8249 = vmatprep.subr.mxu0 %v8960_v1 }
0x2b2c   : > { %8250 = vmatpush3.msra.mxu0 %v11258_v24 }
0x2b2d   : > { %8251 = vmatprep.subr.mxu0 %v8960_v1 }
0x2b2e   : > { %8252 = vmatpush3.msra.mxu0 %v11262_v7 }
0x2b2f   : > { %8253 = vmatprep.subr.mxu0 %v8960_v1 }
0x2b30   : > { %8254 = vmatpush3.msra.mxu0 %v11266_v58 }
0x2b31   : > { %8255 = vmatprep.subr.mxu0 %v8960_v1 }
0x2b32   : > { %8256 = vmatpush3.msra.mxu0 %v11270_v11  ;;  %v4847_v11 = vld [vmem:[#allocation13 + $0x78] sm:$0xff] }
0x2b33   : > { %8257 = vmatprep.subr.mxu0 %v8960_v1 }
0x2b34   : > { %8258 = vmatpush3.msra.mxu0 %v11274_v13  ;;  %v4846_v13 = vld [vmem:[#allocation13 + $0x70] sm:$0xff] }
0x2b35   : > { %8259 = vmatprep.subr.mxu0 %v8960_v1 }
0x2b36   : > { %8260 = vmatpush3.msra.mxu0 %v11278_v44  ;;  %v4845_v44 = vld [vmem:[#allocation13 + $0x68] sm:$0xff] }
0x2b37   : > { %8261 = vmatprep.subr.mxu0 %v8960_v1 }
0x2b38   : > { %8262 = vmatpush3.msra.mxu0 %v11282_v45  ;;  %v4844_v45 = vld [vmem:[#allocation13 + $0x60] sm:$0xff] }
0x2b39   : > { %8263 = vmatprep.subr.mxu0 %v8960_v1 }
0x2b3a   : > { %8264 = vmatpush3.msra.mxu0 %v11286_v46  ;;  %v4843_v46 = vld [vmem:[#allocation13 + $0x58] sm:$0xff] }
0x2b3b   : > { %8265 = vmatprep.subr.mxu0 %v8960_v1 }
0x2b3c   : > { %8266 = vmatpush3.msra.mxu0 %v11290_v47  ;;  %v4842_v47 = vld [vmem:[#allocation13 + $0x50] sm:$0xff] }
0x2b3d   : > { %8305 = vmatprep.subr.mxu0 %v8960_v1 }
0x2bdd   : > { %v4673_v35 = vpop.f32.mrf.mxu0 }
0x2bde   : > { %v4674_v18 = vadd.f32 %v11386_v16, %v4673_v35 }
0x2bdf   : > { %v8199_v38 = vpop.f32.mrf.mxu0 }
0x2be0   : > { %v4678_v41 = vmul.f32 %v4677_v36, %v4674_v18  ;;  %v4826_v24 = vmul.f32 2.0, %v4674_v18 }
0x2be2   : > { %v4679_v7 = vadd.f32 %v4678_v41, %v11543_v2  ;;  %v11760_v58 = vadd.f32 %v4826_v24, %v4825_v21 }
0x2be4   : > { %8233 = vmatmul.mubr.f32.vlgmr.msra.gmra.mxu1 %v4679_v7 }
0x2be5   : > { %8302 = vmatprep.mubr.msk.f32.mxu1 %vm8961_vm0, %v8960_v1  ;;  %8271 = vmatpush3.msra.mxu1 %v4847_v11 }
0x2be6   : > { %8272 = vmatprep.subr.mxu1 %v8960_v1 }
0x2be7   : > { %8273 = vmatpush3.msra.mxu1 %v4846_v13 }
0x2be8   : > { %8274 = vmatprep.subr.mxu1 %v8960_v1 }
0x2be9   : > { %8275 = vmatpush3.msra.mxu1 %v4845_v44 }
0x2bea   : > { %8276 = vmatprep.subr.mxu1 %v8960_v1 }
0x2beb   : > { %8277 = vmatpush3.msra.mxu1 %v4844_v45 }
0x2bec   : > { %8278 = vmatprep.subr.mxu1 %v8960_v1 }
0x2bed   : > { %8279 = vmatpush3.msra.mxu1 %v4843_v46 }
0x2bee   : > { %8280 = vmatprep.subr.mxu1 %v8960_v1 }
0x2bef   : > { %8281 = vmatpush3.msra.mxu1 %v4842_v47 }
0x2bf0   : > { %8282 = vmatprep.subr.mxu1 %v8960_v1 }
0x2bf1   : > { %8283 = vmatpush3.msra.mxu1 %v4841_v10 }
0x2bf2   : > { %8284 = vmatprep.subr.mxu1 %v8960_v1 }
0x2bf3   : > { %8285 = vmatpush3.msra.mxu1 %v4840_v12 }
0x2bf4   : > { %8286 = vmatprep.subr.mxu1 %v8960_v1 }
0x2bf5   : > { %8287 = vmatpush3.msra.mxu1 %v4839_v14 }
0x2bf6   : > { %8288 = vmatprep.subr.mxu1 %v8960_v1 }
0x2bf7   : > { %8289 = vmatpush3.msra.mxu1 %v4838_v0 }
0x2bf8   : > { %8290 = vmatprep.subr.mxu1 %v8960_v1 }
0x2bf9   : > { %8291 = vmatpush3.msra.mxu1 %v4837_v9 }
0x2bfa   : > { %8292 = vmatprep.subr.mxu1 %v8960_v1 }
0x2bfb   : > { %8293 = vmatpush3.msra.mxu1 %v4836_v60 }
0x2bfc   : > { %8294 = vmatprep.subr.mxu1 %v8960_v1 }
0x2bfd   : > { %8295 = vmatpush3.msra.mxu1 %v4835_v61 }
0x2bfe   : > { %8296 = vmatprep.subr.mxu1 %v8960_v1 }
0x2bff   : > { %8297 = vmatpush3.msra.mxu1 %v4834_v62 }
0x2c00   : > { %8298 = vmatprep.subr.mxu1 %v8960_v1 }
0x2ca4   : > { %v4746_v27 = vpop.f32.mrf.mxu1 }
0x2ca5   : > { %v4747_v29 = vadd.f32 %v11346_v43, %v4746_v27  ;;  %v4833_v43 = vld [vmem:[#allocation13 + $0x8] sm:$0xff] }
0x2ca6   : > { %v8234_v31 = vpop.f32.mrf.mxu1  ;;  %8299 = vmatpush3.msra.mxu1 %v4833_v43 }
0x2ca7   : > { %8515 = vtanh.f32 %v4747_v29  ;;  %8300 = vmatprep.subr.mxu1 %v8960_v1 }
0x2ca8   : > { %8301 = vmatpush3.msra.mxu1 %v4832_v63 }
0x2cb4   : > { %v8516_v20 = vpop.eup %8515 }
0x2cb5   : > { %8268 = vmatmul.mubr.f32.vlgmr.msra.gmra.mxu0 %v8516_v20 }
0x2cb6   : > { %8337 = vmatprep.mubr.msk.f32.mxu0 %vm8961_vm0, %v8960_v1  ;;  %8306 = vmatpush3.msra.mxu0 %v4935_v5 }
0x2cb7   : > { %8307 = vmatprep.subr.mxu0 %v8960_v1 }
0x2cb8   : > { %8308 = vmatpush3.msra.mxu0 %v4934_v3 }
0x2cb9   : > { %8309 = vmatprep.subr.mxu0 %v8960_v1 }
0x2cba   : > { %8310 = vmatpush3.msra.mxu0 %v4933_v4 }
0x2cbb   : > { %8311 = vmatprep.subr.mxu0 %v8960_v1 }
0x2cbc   : > { %8312 = vmatpush3.msra.mxu0 %v4932_v48 }
0x2cbd   : > { %8313 = vmatprep.subr.mxu0 %v8960_v1 }
0x2cbe   : > { %8314 = vmatpush3.msra.mxu0 %v4931_v49 }
0x2cbf   : > { %8315 = vmatprep.subr.mxu0 %v8960_v1 }
0x2cc0   : > { %8316 = vmatpush3.msra.mxu0 %v4930_v50 }
0x2cc1   : > { %8317 = vmatprep.subr.mxu0 %v8960_v1 }
0x2cc2   : > { %8318 = vmatpush3.msra.mxu0 %v4929_v51 }
0x2cc3   : > { %8319 = vmatprep.subr.mxu0 %v8960_v1 }
0x2cc4   : > { %8320 = vmatpush3.msra.mxu0 %v4928_v52 }
0x2cc5   : > { %8321 = vmatprep.subr.mxu0 %v8960_v1 }
0x2cc6   : > { %8322 = vmatpush3.msra.mxu0 %v4927_v23 }
0x2cc7   : > { %8323 = vmatprep.subr.mxu0 %v8960_v1 }
0x2cc8   : > { %8324 = vmatpush3.msra.mxu0 %v4926_v25 }
0x2cc9   : > { %8325 = vmatprep.subr.mxu0 %v8960_v1 }
0x2cca   : > { %8326 = vmatpush3.msra.mxu0 %v4925_v6 }
0x2ccb   : > { %8327 = vmatprep.subr.mxu0 %v8960_v1 }
0x2d75   : > { %v4817_v57 = vpop.f32.mrf.mxu0 }
0x2d76   : > { %v4818_v59 = vadd.f32 %v11386_v16, %v4817_v57  ;;  %v4924_v16 = vld [vmem:[#allocation15 + $0x20] sm:$0xff] }
0x2d77   : > { %v8269_v40 = vpop.f32.mrf.mxu0  ;;  %8328 = vmatpush3.msra.mxu0 %v4924_v16 }
0x2d78   : > { %v4828_v26 = vadd.f32 %v11760_v58, %v4818_v59  ;;  %8329 = vmatprep.subr.mxu0 %v8960_v1 }
0x2d79   : > { %8330 = vmatpush3.msra.mxu0 %v4923_v15 }
0x2d7a   : > { %v4830_v42 = vmul.f32 %v4829_v39, %v4828_v26  ;;  %8331 = vmatprep.subr.mxu0 %v8960_v1 }
0x2d7c   : > { %v4831_v19 = vadd.f32 %v4830_v42, %v11543_v2  ;;  %v4922_v2 = vld [vmem:[#allocation15 + $0x10] sm:$0xff] }
0x2d7d   : > { %8332 = vmatpush3.msra.mxu0 %v4922_v2 }
0x2d7e   : > { %8303 = vmatmul.mubr.f32.vlgmr.msra.gmra.mxu1 %v4831_v19  ;;  %8333 = vmatprep.subr.mxu0 %v8960_v1 }
0x2d7f   : > { %8334 = vmatpush3.msra.mxu0 %v4921_v17 }
0x2d80   : > { %8335 = vmatprep.subr.mxu0 %v8960_v1 }
0x2d81   : > { %8336 = vmatpush3.msra.mxu0 %v4920_v53 }
0x2e3e   : > { %v4914_v30 = vpop.f32.mrf.mxu1 }
0x2e3f   : > { %v4918_v32 = vadd.f32 %v4914_v30, %v713_v28 }
0x2e40   : > { %v8304_v33 = vpop.f32.mrf.mxu1 }
0x2e41   : > { %8517 = vtanh.f32 %v4918_v32 }
0x2e4e   : > { %v8518_v34 = vpop.eup %8517 }
0x2e4f   : > { %8338 = vmatmul.mubr.f32.vlgmr.msra.gmra.mxu0 %v8518_v34  ;;  %5014 = vst [vmem:[%s587_s22] sm:$0xff] %v8518_v34 }
0x2e50   : > { %8847 = shalt.err (!%p8844_p3)
}
0x2e51   : > { %s8848_s21 = scalar_lea.hbm %s5045_s7, 128  ;;  %s8852_s15 = scalar_lea.hbm %s11884_s13, 256 }
0x2e52   : > { %p8849_p13 = scmp.ne.s32.totalorder %s5045_s7, %s8848_s21  ;;  %p8853_p10 = scmp.lt.s32.totalorder %s5045_s7, %s11884_s13 }
0x2e53   : > { %p8854_p11 = scmp.lt.s32.totalorder %s8852_s15, %s8848_s21 }
0x2e54   : > { %p8850_p5 = pnand %p8849_p13, %p11925_p8 }
0x2e55   : > { %p8855_p4 = por %p8854_p11, %p8853_p10 }
0x2e56   : > { %p8851_p9 = pneg %p8850_p5 }
0x2e58   : > { %p8856_p2 = pnand %p8855_p4, %p8851_p9 }
0x2e5a   : > { %8859 = shalt.err (!%p8856_p2)
}
0x2e5b   : > { %8369 = dma.vmem_to_hbm [thread:$0]  (%p11925_p8), %s5048_s23, 128, %s5045_s7, %s5021_s16  }
0x2e5c   : > { %s11926_s29 = sld [smem:[#allocation35_spill]]  ;;  %s580_s8 = scalar_lea.vmem [#allocation16], %s9262_s10 }
0x2e5d   : > { %s5034_s20 = sshll.u32 %s580_s8, 4  ;;  %s11927_s17 = sld [smem:[#allocation36_spill]]  ;;  %s5035_s20 = int_to_ptr.vmem [resolvable:$true] %s5034_s20 }
0x2e5e   : > { %s5016_s15 = scalar_lea.sflag [#allocation4], %s9259_s11  ;;  %s8860_s27 = scalar_lea.vmem %s5035_s20, 128 }
0x2e5f   : > { %p8861_p1 = scmp.ne.s32.totalorder %s5035_s20, %s8860_s27  ;;  %s8963_s7 = smov [#allocation16]  }
0x2e60   : > { %s8864_s10 = sshll.u32 %s8963_s7, 4  ;;  %s8865_s10 = int_to_ptr.vmem [resolvable:$false] %s8864_s10 }
0x2e61   : > { %p8862_p6 = pnand %p8861_p1, %p11925_p8  ;;  %s8866_s23 = scalar_lea.vmem %s8865_s10, 256 }
0x2e62   : > { %v5265_v1 = vld [vmem:[%s11926_s29] ss:$0 sm:$0xff]  ;;  %p8867_p0 = scmp.lt.s32.totalorder %s5035_s20, %s8865_s10  ;;  %p8868_p7 = scmp.lt.s32.totalorder %s8866_s23, %s8860_s27 }
0x2e63   : > { %s11834_s5 = scalar_lea.hbm %s11927_s17, %s5268_s12  ;;  %p8863_p12 = pneg %p8862_p6 }
0x2e64   : > { %p8869_p3 = por %p8868_p7, %p8867_p0 }
0x2e66   : > { %p8870_p13 = pnand %p8869_p3, %p8863_p12 }
0x2f0f   : > { %v5009_v55 = vpop.f32.mrf.mxu0 }
0x2f10   : > { %v5010_v37 = vadd.f32 %v5265_v1, %v5009_v55 }
0x2f11   : > { %v8339_v22 = vpop.f32.mrf.mxu0 }
0x2f12   : > { %5013 = vst [vmem:[%s580_s8] sm:$0xff] %v5010_v37 }
0x2f13   : > { %8873 = shalt.err (!%p8870_p13)
}
0x2f14   : > { %s8874_s14 = scalar_lea.hbm %s11834_s5, 128  ;;  %s8878_s16 = scalar_lea.hbm %s11927_s17, 256 }
0x2f15   : > { %p8875_p5 = scmp.ne.s32.totalorder %s11834_s5, %s8874_s14  ;;  %p8879_p11 = scmp.lt.s32.totalorder %s11834_s5, %s11927_s17 }
0x2f16   : > { %p8880_p4 = scmp.lt.s32.totalorder %s8878_s16, %s8874_s14 }
0x2f17   : > { %p8876_p9 = pnand %p8875_p5, %p11925_p8 }
0x2f18   : > { %p8881_p2 = por %p8880_p4, %p8879_p11 }
0x2f19   : > { %p8877_p10 = pneg %p8876_p9 }
0x2f1b   : > { %p8882_p1 = pnand %p8881_p2, %p8877_p10 }
0x2f1d   : > { %8885 = shalt.err (!%p8882_p1)
}
0x2f1e   : > { %8368 = dma.vmem_to_hbm [thread:$0]  (%p11925_p8), %s5035_s20, 128, %s11834_s5, %s5016_s15  }
0x2f1f PF: > { %s5059_s0 = sand.u32 1, %s8936_s25   ;;  %p11928_p6 = scmp.ne.s32.totalorder %s11913_s30, 0 }
0x2f20   : > { %p11929_p12 = scmp.ge.s32.totalorder %s8948_s28, 2  ;;  %s5060_s29 = scalar_lea.sflag [#allocation4], %s5059_s0 }
0x2f22   : > { %p8399_p0 = pnand %p11929_p12, %p11928_p6 }
0x2f24   : > { %p8400_p7 = pneg %p8399_p0 }
0x2f26   : > { %8927 = dma.done.wait (%p8400_p7), %s5060_s29, 128  }
0x2f27   : > { %8929 = vsyncadd (%p8400_p7), %s5060_s29, 4294967168  ;;  %s5069_s8 = scalar_lea.sflag [#allocation18], %s5059_s0 }
0x2f28   : > { %8931 = dma.done.wait (%p8400_p7), %s5069_s8, 128  }
0x2f29   : > { %8933 = vsyncadd (%p8400_p7), %s5069_s8, 4294967168  ;;  %s11930_s24 = sld [smem:[#allocation27_spill]]  ;;  %p36_p8 = scmp.ge.s32.totalorder %s9150_s18, 4  }
0x2f2a   : > { %s11931_s27 = sld [smem:[#allocation28_spill]]  ;;  %s11932_s25 = smov %s8940_s26 }
0x2f2b   : > { %s11934_s28 = smov %s9150_s18  ;;  %38 = sbr.rel (!%p36_p8) target bundleno = 21 (0x15), region = 168 }
0x2f2f   : > { %s11933_s26 = smov %s11930_s24 }
0x2f30   :  { %5074 = vsyncpa [#allocation3], 1 }
0x2f31   :  { %5076 = vsyncpa [#allocation3 + $0x1], 1 }
0x2f32   :  { %5077 = vsyncpa [#allocation8], 1 }
0x2f33   :  { %5079 = vsyncpa [#allocation8 + $0x1], 1 }
0x2f34   :  { %5080 = vsyncpa [#allocation11], 1 }
0x2f35   :  { %5081 = vsyncpa [#allocation14], 1 }
0x2f36   :  { %5082 = vsyncpa [#allocation4], 1 }
0x2f37   :  { %5084 = vsyncpa [#allocation4 + $0x1], 1 }
0x2f38   :  { %5085 = vsyncpa [#allocation18], 1 }
0x2f39   :  { %5087 = vsyncpa [#allocation18 + $0x1], 1 }
0x2f3a   :  { %5088 = vsyncpa [#allocation5], 1 }
0x2f3b   :  { %5090 = vsyncpa [#allocation5 + $0x1], 1 }

</bundles_post_ra>
